<compile_context>
chip_gen: v7x
topology: tpu7x:2x2x1
jax: 0.10.0
libtpu: 0.0.40
codegen_flags: <defaults>
</compile_context>

<pallas_src>
import jax
import jax.numpy as jnp
from jax import lax
from jax.experimental import pallas as pl
from jax.experimental.pallas import tpu as pltpu


# ------------------------------ Pallas kernel --------------------------------

def _basic_block_kernel(x_ref, w1_ref, s1_ref, b1_ref, w2_ref, s2_ref, b2_ref,
                        o_ref, xpad_ref, col1_ref, tpad_ref, col2_ref):
    # One (batch, row-tile) step: fused conv1 -> bn1 -> relu -> conv2 -> bn2
    # -> +identity -> relu with in-kernel halo handling and zero padding.
    H, W, Cin = x_ref.shape                 # full image for this batch (bf16, resident)
    planes, MO = o_ref.shape                # MO = TH * W (lane-dense, channels-first)
    TH = MO // W                            # output rows of this tile
    M1 = (TH + 2) * W                       # stage-1 rows (1-row halo on each side)
    j = pl.program_id(1)
    NH = pl.num_programs(1)
    r0 = pl.multiple_of(j * TH, 8)          # first image row of this tile
    bdt = xpad_ref.dtype                    # bf16

    # ---- padded input tile (TH+4, W+2, Cin): zero ONLY borders / out-of-image halo ----
    xpad_ref[:, 0:1, :] = jnp.zeros((TH + 4, 1, Cin), bdt)
    xpad_ref[:, W + 1:W + 2, :] = jnp.zeros((TH + 4, 1, Cin), bdt)
    xpad_ref[2:TH + 2, 1:W + 1, :] = x_ref[pl.ds(r0, TH), :, :]     # body rows

    @pl.when(j == 0)
    def _():
        xpad_ref[0:2, 1:W + 1, :] = jnp.zeros((2, W, Cin), bdt)

    @pl.when(j > 0)
    def _():
        xpad_ref[0:2, 1:W + 1, :] = x_ref[pl.ds(r0 - 2, 2), :, :]

    @pl.when(j == NH - 1)
    def _():
        xpad_ref[TH + 2:TH + 4, 1:W + 1, :] = jnp.zeros((2, W, Cin), bdt)

    @pl.when(j < NH - 1)
    def _():
        xpad_ref[TH + 2:TH + 4, 1:W + 1, :] = (
            x_ref[pl.ds(pl.multiple_of(r0 + TH, 8), 2), :, :])

    # ---- conv1: ONE K = 9*Cin matmul over an im2col scratch (bf16 in, f32 acc) ----
    for dy in range(3):
        for dx in range(3):
            tap = 3 * dy + dx
            win = xpad_ref[dy:dy + TH + 2, dx:dx + W, :]            # (TH+2, W, Cin)
            col1_ref[:, tap * Cin:(tap + 1) * Cin] = win.reshape(M1, Cin)
    acc1 = jnp.dot(col1_ref[...], w1_ref[...], preferred_element_type=jnp.float32)

    # bn1 (folded) + relu in f32, single cast to bf16 into the padded stage-1 tile.
    t = jnp.maximum(acc1 * s1_ref[...] + b1_ref[...], 0.0)          # (M1, planes) f32
    tpad_ref[:, 0:1, :] = jnp.zeros((TH + 2, 1, planes), bdt)
    tpad_ref[:, W + 1:W + 2, :] = jnp.zeros((TH + 2, 1, planes), bdt)
    tpad_ref[:, 1:W + 1, :] = t.astype(bdt).reshape(TH + 2, W, planes)

    # conv2 zero-pads the *activation*: halo rows that fall outside the image are zero.
    @pl.when(j == 0)
    def _():
        tpad_ref[0:1, :, :] = jnp.zeros((1, W + 2, planes), bdt)

    @pl.when(j == NH - 1)
    def _():
        tpad_ref[TH + 1:TH + 2, :, :] = jnp.zeros((1, W + 2, planes), bdt)

    # ---- conv2: ONE K = 9*planes matmul ----
    for dy in range(3):
        for dx in range(3):
            tap = 3 * dy + dx
            win = tpad_ref[dy:dy + TH, dx:dx + W, :]                # (TH, W, planes)
            col2_ref[:, tap * planes:(tap + 1) * planes] = win.reshape(MO, planes)
    acc2 = jnp.dot(col2_ref[...], w2_ref[...], preferred_element_type=jnp.float32)

    # bn2 (folded) + identity + relu in f32; emit channels-first (lane-dense NCHW).
    ident = x_ref[pl.ds(r0, TH), :, :].astype(jnp.float32).reshape(MO, Cin)
    res = jnp.maximum(acc2 * s2_ref[...] + b2_ref[...] + ident, 0.0)  # (MO, planes)
    o_ref[...] = jnp.transpose(res).astype(o_ref.dtype)              # (planes, MO)


# -------------------------------- wrapper -------------------------------------

def basic_block_forward(x_nchw, params, *, nh=2):
    """Fused BasicBlock forward. x_nchw: (N, C, H, W) float32 (PyTorch layout)."""
    w1, s1, b1, w2, s2, b2 = params          # w1/w2: (9*C, planes) bf16, tap-major rows
    N, Cin, H, W = x_nchw.shape
    planes = w1.shape[-1]
    assert Cin == planes, "downsample=None & stride=1 require inplanes == planes"
    assert H % nh == 0
    TH = H // nh
    assert TH % 8 == 0 and W % 8 == 0 and (TH * W) % 128 == 0

    # NCHW -> NHWC once on the input (bf16 halves the DMA).  The kernel writes
    # channels-first output, so no output-side transpose is needed.
    x = jnp.transpose(x_nchw, (0, 2, 3, 1)).astype(jnp.bfloat16)

    out = pl.pallas_call(
        _basic_block_kernel,
        grid=(N, nh),
        out_shape=jax.ShapeDtypeStruct((N, planes, H * W), jnp.float32),
        in_specs=[
            pl.BlockSpec((None, H, W, Cin), lambda b, j: (b, 0, 0, 0)),    # x (resident per batch)
            pl.BlockSpec((9 * Cin, planes), lambda b, j: (0, 0)),          # w1 (resident)
            pl.BlockSpec((1, planes), lambda b, j: (0, 0)),                # s1
            pl.BlockSpec((1, planes), lambda b, j: (0, 0)),                # b1
            pl.BlockSpec((9 * planes, planes), lambda b, j: (0, 0)),       # w2 (resident)
            pl.BlockSpec((1, planes), lambda b, j: (0, 0)),                # s2
            pl.BlockSpec((1, planes), lambda b, j: (0, 0)),                # b2
        ],
        out_specs=pl.BlockSpec((None, planes, TH * W), lambda b, j: (b, 0, j)),
        scratch_shapes=[
            pltpu.VMEM((TH + 4, W + 2, Cin), jnp.bfloat16),        # padded input tile
            pltpu.VMEM(((TH + 2) * W, 9 * Cin), jnp.bfloat16),     # im2col for conv1
            pltpu.VMEM((TH + 2, W + 2, planes), jnp.bfloat16),     # padded stage-1 tile
            pltpu.VMEM((TH * W, 9 * planes), jnp.bfloat16),        # im2col for conv2
        ],
        compiler_params=pltpu.CompilerParams(
            # Batch axis shards across TensorCores; H-tile axis stays per-core so the
            # per-batch input block remains resident across its tiles.
            dimension_semantics=("parallel", "arbitrary"),
        ),
    )(x, w1, s1, b1, w2, s2, b2)

    return out.reshape(N, planes, H, W)                            # already NCHW


# --------------------------- parameters (synthetic) ----------------------------

def make_params(key, planes, eps=1e-5):
    keys = jax.random.split(key, 10)

    # PyTorch Conv2d weights: (out, in, 3, 3); inplanes == planes (downsample=None).
    W1 = 0.1 * jax.random.normal(keys[0], (planes, planes, 3, 3), jnp.float32)
    W2 = 0.1 * jax.random.normal(keys[1], (planes, planes, 3, 3), jnp.float32)

    def bn(kg, kb, km, kv, c):
        gamma = 1.0 + 0.1 * jax.random.normal(kg, (c,), jnp.float32)
        beta = 0.1 * jax.random.normal(kb, (c,), jnp.float32)
        mean = 0.1 * jax.random.normal(km, (c,), jnp.float32)
        var = jax.random.uniform(kv, (c,), jnp.float32, minval=0.5, maxval=1.5)
        return gamma, beta, mean, var

    bn1 = bn(keys[2], keys[3], keys[4], keys[5], planes)
    bn2 = bn(keys[6], keys[7], keys[8], keys[9], planes)

    def fold(p):                                   # eval-mode BN -> affine
        g, b, m, v = p
        scale = g / jnp.sqrt(v + eps)
        return scale.reshape(1, -1), (b - m * scale).reshape(1, -1)

    s1, b1 = fold(bn1)
    s2, b2 = fold(bn2)

    def prep(w_oihw):                              # OIHW -> HWIO -> (9*Cin, planes) bf16
        cin, cout = w_oihw.shape[1], w_oihw.shape[0]
        return (jnp.transpose(w_oihw, (2, 3, 1, 0))
                .reshape(9 * cin, cout).astype(jnp.bfloat16))

    kernel_params = (prep(W1), s1, b1, prep(W2), s2, b2)
    raw_params = (W1, bn1, W2, bn2)
    return kernel_params, raw_params


# ------------------------------ XLA reference ----------------------------------

def reference_nchw(x_nchw, raw, eps=1e-5):
    # Mirrors the kernel's dtype behavior: bf16 input / conv operands, f32 MXU
    # accumulation, f32 BN / ReLU / residual (identity = bf16(x) upcast to f32).
    W1, bn1, W2, bn2 = raw
    x = jnp.transpose(x_nchw, (0, 2, 3, 1)).astype(jnp.bfloat16)

    def conv(t, w_oihw):
        w = jnp.transpose(w_oihw, (2, 3, 1, 0)).astype(jnp.bfloat16)
        return lax.conv_general_dilated(
            t.astype(jnp.bfloat16), w, (1, 1), ((1, 1), (1, 1)),
            dimension_numbers=('NHWC', 'HWIO', 'NHWC'),
            preferred_element_type=jnp.float32)

    def bn(t, p):
        g, b, m, v = p
        return (t - m) / jnp.sqrt(v + eps) * g + b

    t = jax.nn.relu(bn(conv(x, W1), bn1))
    t = bn(conv(t, W2), bn2)
    out = jax.nn.relu(t + x.astype(jnp.float32))
    return jnp.transpose(out, (0, 3, 1, 2))


# ---------------------------------- main ----------------------------------------

if __name__ == "__main__":
    key = jax.random.PRNGKey(0)
    kx, kp = jax.random.split(key)

    N, planes, H, W = 2, 64, 16, 16
    inplanes = planes        # downsample=None & stride=1 -> identity add needs inplanes == planes
    x_nchw = jax.random.normal(kx, (N, inplanes, H, W), dtype=jnp.float32)

    kernel_params, raw_params = make_params(kp, planes)

    out = jax.block_until_ready(basic_block_forward(x_nchw, kernel_params, nh=2))

    ref = reference_nchw(x_nchw, raw_params)
    err = float(jnp.max(jnp.abs(out - ref)))

    assert out.shape == (N, planes, H, W), out.shape
    assert err < 2e-3, f"max abs err {err}"

    print("KERNEL_OK")
</pallas_src>

<mosaic_0001>
module attributes {stable_mosaic.version = 11 : i64} {
  func.func @_basic_block_kernel(%arg0: i32, %arg1: i32, %arg2: memref<1x16x16x64xbf16, #tpu.memory_space<vmem>>, %arg3: memref<576x64xbf16, #tpu.memory_space<vmem>>, %arg4: memref<1x64xf32, #tpu.memory_space<vmem>>, %arg5: memref<1x64xf32, #tpu.memory_space<vmem>>, %arg6: memref<576x64xbf16, #tpu.memory_space<vmem>>, %arg7: memref<1x64xf32, #tpu.memory_space<vmem>>, %arg8: memref<1x64xf32, #tpu.memory_space<vmem>>, %arg9: memref<1x64x128xf32, #tpu.memory_space<vmem>>, %arg10: memref<12x18x64xbf16, #tpu.memory_space<vmem>>, %arg11: memref<160x576xbf16, #tpu.memory_space<vmem>>, %arg12: memref<10x18x64xbf16, #tpu.memory_space<vmem>>, %arg13: memref<128x576xbf16, #tpu.memory_space<vmem>>) attributes {dimension_semantics = [#tpu.dimension_semantics<parallel>, #tpu.dimension_semantics<arbitrary>], iteration_bounds = array<i64: 2, 2>, scalar_prefetch = 0 : i64, scratch_operands = 4 : i64, tpu.core_type = #tpu.core_type<tc>, window_params = [{transform_indices = @transform_0, window_bounds = array<i64: 1, 16, 16, 64>}, {pipeline_mode = #tpu.pipeline_mode<synchronous>, transform_indices = @transform_1, window_bounds = array<i64: 576, 64>}, {pipeline_mode = #tpu.pipeline_mode<synchronous>, transform_indices = @transform_2, window_bounds = array<i64: 1, 64>}, {pipeline_mode = #tpu.pipeline_mode<synchronous>, transform_indices = @transform_3, window_bounds = array<i64: 1, 64>}, {pipeline_mode = #tpu.pipeline_mode<synchronous>, transform_indices = @transform_4, window_bounds = array<i64: 576, 64>}, {pipeline_mode = #tpu.pipeline_mode<synchronous>, transform_indices = @transform_5, window_bounds = array<i64: 1, 64>}, {pipeline_mode = #tpu.pipeline_mode<synchronous>, transform_indices = @transform_6, window_bounds = array<i64: 1, 64>}, {transform_indices = @transform_7, window_bounds = array<i64: 1, 64, 128>}]} {
    %c8_i32 = arith.constant 8 : i32
    %0 = arith.muli %arg1, %c8_i32 : i32
    %1 = tpu.assume_multiple %0, 8 : i32
    %cst = arith.constant 0.000000e+00 : bf16
    %2 = vector.broadcast %cst : bf16 to vector<12x1x64xbf16>
    %c0 = arith.constant 0 : index
    %c0_0 = arith.constant 0 : index
    %c0_1 = arith.constant 0 : index
    %3 = vector.load %arg10[%c0, %c0_0, %c0_1] : memref<12x18x64xbf16, #tpu.memory_space<vmem>>, vector<12x1x64xbf16>
    tpu.vector_store %arg10[%c0, %c0_0, %c0_1], %2 {strides = array<i32>} : memref<12x18x64xbf16, #tpu.memory_space<vmem>>, vector<12x1x64xbf16>,
    %cst_2 = arith.constant 0.000000e+00 : bf16
    %4 = vector.broadcast %cst_2 : bf16 to vector<12x1x64xbf16>
    %c0_3 = arith.constant 0 : index
    %c17 = arith.constant 17 : index
    %c0_4 = arith.constant 0 : index
    %5 = vector.load %arg10[%c0_3, %c17, %c0_4] : memref<12x18x64xbf16, #tpu.memory_space<vmem>>, vector<12x1x64xbf16>
    tpu.vector_store %arg10[%c0_3, %c17, %c0_4], %4 {strides = array<i32>} : memref<12x18x64xbf16, #tpu.memory_space<vmem>>, vector<12x1x64xbf16>,
    %c0_5 = arith.constant 0 : index
    %6 = arith.index_cast %1 : i32 to index
    %c0_6 = arith.constant 0 : index
    %c0_7 = arith.constant 0 : index
    %7 = vector.load %arg2[%c0_5, %6, %c0_6, %c0_7] : memref<1x16x16x64xbf16, #tpu.memory_space<vmem>>, vector<1x8x16x64xbf16>
    %8 = vector.shape_cast %7 : vector<1x8x16x64xbf16> to vector<8x16x64xbf16>
    %c2 = arith.constant 2 : index
    %c1 = arith.constant 1 : index
    %c0_8 = arith.constant 0 : index
    %9 = vector.load %arg10[%c2, %c1, %c0_8] : memref<12x18x64xbf16, #tpu.memory_space<vmem>>, vector<8x16x64xbf16>
    tpu.vector_store %arg10[%c2, %c1, %c0_8], %8 {strides = array<i32>} : memref<12x18x64xbf16, #tpu.memory_space<vmem>>, vector<8x16x64xbf16>,
    %c0_i32 = arith.constant 0 : i32
    %10 = arith.cmpi eq, %arg1, %c0_i32 : i32
    %11 = arith.extui %10 : i1 to i32
    %c0_i32_9 = arith.constant 0 : i32
    %12 = arith.cmpi ne, %11, %c0_i32_9 : i32
    scf.if %12 {
      %cst_138 = arith.constant 0.000000e+00 : bf16
      %121 = vector.broadcast %cst_138 : bf16 to vector<2x16x64xbf16>
      %c0_139 = arith.constant 0 : index
      %c1_140 = arith.constant 1 : index
      %c0_141 = arith.constant 0 : index
      %122 = vector.load %arg10[%c0_139, %c1_140, %c0_141] : memref<12x18x64xbf16, #tpu.memory_space<vmem>>, vector<2x16x64xbf16>
      tpu.vector_store %arg10[%c0_139, %c1_140, %c0_141], %121 {strides = array<i32>} : memref<12x18x64xbf16, #tpu.memory_space<vmem>>, vector<2x16x64xbf16>,
    } else {
    }
    %c0_i32_10 = arith.constant 0 : i32
    %13 = arith.cmpi sgt, %arg1, %c0_i32_10 : i32
    %14 = arith.extui %13 : i1 to i32
    %c0_i32_11 = arith.constant 0 : i32
    %15 = arith.cmpi ne, %14, %c0_i32_11 : i32
    scf.if %15 {
      %c2_i32 = arith.constant 2 : i32
      %121 = arith.subi %1, %c2_i32 : i32
      %c0_138 = arith.constant 0 : index
      %122 = arith.index_cast %121 : i32 to index
      %c0_139 = arith.constant 0 : index
      %c0_140 = arith.constant 0 : index
      %123 = vector.load %arg2[%c0_138, %122, %c0_139, %c0_140] : memref<1x16x16x64xbf16, #tpu.memory_space<vmem>>, vector<1x2x16x64xbf16>
      %124 = vector.shape_cast %123 : vector<1x2x16x64xbf16> to vector<2x16x64xbf16>
      %c0_141 = arith.constant 0 : index
      %c1_142 = arith.constant 1 : index
      %c0_143 = arith.constant 0 : index
      %125 = vector.load %arg10[%c0_141, %c1_142, %c0_143] : memref<12x18x64xbf16, #tpu.memory_space<vmem>>, vector<2x16x64xbf16>
      tpu.vector_store %arg10[%c0_141, %c1_142, %c0_143], %124 {strides = array<i32>} : memref<12x18x64xbf16, #tpu.memory_space<vmem>>, vector<2x16x64xbf16>,
    } else {
    }
    %c1_i32 = arith.constant 1 : i32
    %16 = arith.cmpi eq, %arg1, %c1_i32 : i32
    %17 = arith.extui %16 : i1 to i32
    %c0_i32_12 = arith.constant 0 : i32
    %18 = arith.cmpi ne, %17, %c0_i32_12 : i32
    scf.if %18 {
      %cst_138 = arith.constant 0.000000e+00 : bf16
      %121 = vector.broadcast %cst_138 : bf16 to vector<2x16x64xbf16>
      %c10 = arith.constant 10 : index
      %c1_139 = arith.constant 1 : index
      %c0_140 = arith.constant 0 : index
      %122 = vector.load %arg10[%c10, %c1_139, %c0_140] : memref<12x18x64xbf16, #tpu.memory_space<vmem>>, vector<2x16x64xbf16>
      tpu.vector_store %arg10[%c10, %c1_139, %c0_140], %121 {strides = array<i32>} : memref<12x18x64xbf16, #tpu.memory_space<vmem>>, vector<2x16x64xbf16>,
    } else {
    }
    %c1_i32_13 = arith.constant 1 : i32
    %19 = arith.cmpi slt, %arg1, %c1_i32_13 : i32
    %20 = arith.extui %19 : i1 to i32
    %c0_i32_14 = arith.constant 0 : i32
    %21 = arith.cmpi ne, %20, %c0_i32_14 : i32
    scf.if %21 {
      %c8_i32_138 = arith.constant 8 : i32
      %121 = arith.addi %1, %c8_i32_138 : i32
      %122 = tpu.assume_multiple %121, 8 : i32
      %c0_139 = arith.constant 0 : index
      %123 = arith.index_cast %122 : i32 to index
      %c0_140 = arith.constant 0 : index
      %c0_141 = arith.constant 0 : index
      %124 = vector.load %arg2[%c0_139, %123, %c0_140, %c0_141] : memref<1x16x16x64xbf16, #tpu.memory_space<vmem>>, vector<1x2x16x64xbf16>
      %125 = vector.shape_cast %124 : vector<1x2x16x64xbf16> to vector<2x16x64xbf16>
      %c10 = arith.constant 10 : index
      %c1_142 = arith.constant 1 : index
      %c0_143 = arith.constant 0 : index
      %126 = vector.load %arg10[%c10, %c1_142, %c0_143] : memref<12x18x64xbf16, #tpu.memory_space<vmem>>, vector<2x16x64xbf16>
      tpu.vector_store %arg10[%c10, %c1_142, %c0_143], %125 {strides = array<i32>} : memref<12x18x64xbf16, #tpu.memory_space<vmem>>, vector<2x16x64xbf16>,
    } else {
    }
    %c0_15 = arith.constant 0 : index
    %c0_16 = arith.constant 0 : index
    %c0_17 = arith.constant 0 : index
    %22 = vector.load %arg10[%c0_15, %c0_16, %c0_17] : memref<12x18x64xbf16, #tpu.memory_space<vmem>>, vector<10x16x64xbf16>
    %23 = vector.shape_cast %22 : vector<10x16x64xbf16> to vector<160x64xbf16>
    %c0_18 = arith.constant 0 : index
    %c0_19 = arith.constant 0 : index
    %24 = vector.load %arg11[%c0_18, %c0_19] : memref<160x576xbf16, #tpu.memory_space<vmem>>, vector<160x64xbf16>
    tpu.vector_store %arg11[%c0_18, %c0_19], %23 {strides = array<i32>} : memref<160x576xbf16, #tpu.memory_space<vmem>>, vector<160x64xbf16>,
    %c0_20 = arith.constant 0 : index
    %c1_21 = arith.constant 1 : index
    %c0_22 = arith.constant 0 : index
    %25 = vector.load %arg10[%c0_20, %c1_21, %c0_22] : memref<12x18x64xbf16, #tpu.memory_space<vmem>>, vector<10x16x64xbf16>
    %26 = vector.shape_cast %25 : vector<10x16x64xbf16> to vector<160x64xbf16>
    %c0_23 = arith.constant 0 : index
    %c64 = arith.constant 64 : index
    %27 = vector.load %arg11[%c0_23, %c64] : memref<160x576xbf16, #tpu.memory_space<vmem>>, vector<160x64xbf16>
    tpu.vector_store %arg11[%c0_23, %c64], %26 {strides = array<i32>} : memref<160x576xbf16, #tpu.memory_space<vmem>>, vector<160x64xbf16>,
    %c0_24 = arith.constant 0 : index
    %c2_25 = arith.constant 2 : index
    %c0_26 = arith.constant 0 : index
    %28 = vector.load %arg10[%c0_24, %c2_25, %c0_26] : memref<12x18x64xbf16, #tpu.memory_space<vmem>>, vector<10x16x64xbf16>
    %29 = vector.shape_cast %28 : vector<10x16x64xbf16> to vector<160x64xbf16>
    %c0_27 = arith.constant 0 : index
    %c128 = arith.constant 128 : index
    %30 = vector.load %arg11[%c0_27, %c128] : memref<160x576xbf16, #tpu.memory_space<vmem>>, vector<160x64xbf16>
    tpu.vector_store %arg11[%c0_27, %c128], %29 {strides = array<i32>} : memref<160x576xbf16, #tpu.memory_space<vmem>>, vector<160x64xbf16>,
    %c1_28 = arith.constant 1 : index
    %c0_29 = arith.constant 0 : index
    %c0_30 = arith.constant 0 : index
    %31 = vector.load %arg10[%c1_28, %c0_29, %c0_30] : memref<12x18x64xbf16, #tpu.memory_space<vmem>>, vector<10x16x64xbf16>
    %32 = vector.shape_cast %31 : vector<10x16x64xbf16> to vector<160x64xbf16>
    %c0_31 = arith.constant 0 : index
    %c192 = arith.constant 192 : index
    %33 = vector.load %arg11[%c0_31, %c192] : memref<160x576xbf16, #tpu.memory_space<vmem>>, vector<160x64xbf16>
    tpu.vector_store %arg11[%c0_31, %c192], %32 {strides = array<i32>} : memref<160x576xbf16, #tpu.memory_space<vmem>>, vector<160x64xbf16>,
    %c1_32 = arith.constant 1 : index
    %c1_33 = arith.constant 1 : index
    %c0_34 = arith.constant 0 : index
    %34 = vector.load %arg10[%c1_32, %c1_33, %c0_34] : memref<12x18x64xbf16, #tpu.memory_space<vmem>>, vector<10x16x64xbf16>
    %35 = vector.shape_cast %34 : vector<10x16x64xbf16> to vector<160x64xbf16>
    %c0_35 = arith.constant 0 : index
    %c256 = arith.constant 256 : index
    %36 = vector.load %arg11[%c0_35, %c256] : memref<160x576xbf16, #tpu.memory_space<vmem>>, vector<160x64xbf16>
    tpu.vector_store %arg11[%c0_35, %c256], %35 {strides = array<i32>} : memref<160x576xbf16, #tpu.memory_space<vmem>>, vector<160x64xbf16>,
    %c1_36 = arith.constant 1 : index
    %c2_37 = arith.constant 2 : index
    %c0_38 = arith.constant 0 : index
    %37 = vector.load %arg10[%c1_36, %c2_37, %c0_38] : memref<12x18x64xbf16, #tpu.memory_space<vmem>>, vector<10x16x64xbf16>
    %38 = vector.shape_cast %37 : vector<10x16x64xbf16> to vector<160x64xbf16>
    %c0_39 = arith.constant 0 : index
    %c320 = arith.constant 320 : index
    %39 = vector.load %arg11[%c0_39, %c320] : memref<160x576xbf16, #tpu.memory_space<vmem>>, vector<160x64xbf16>
    tpu.vector_store %arg11[%c0_39, %c320], %38 {strides = array<i32>} : memref<160x576xbf16, #tpu.memory_space<vmem>>, vector<160x64xbf16>,
    %c2_40 = arith.constant 2 : index
    %c0_41 = arith.constant 0 : index
    %c0_42 = arith.constant 0 : index
    %40 = vector.load %arg10[%c2_40, %c0_41, %c0_42] : memref<12x18x64xbf16, #tpu.memory_space<vmem>>, vector<10x16x64xbf16>
    %41 = vector.shape_cast %40 : vector<10x16x64xbf16> to vector<160x64xbf16>
    %c0_43 = arith.constant 0 : index
    %c384 = arith.constant 384 : index
    %42 = vector.load %arg11[%c0_43, %c384] : memref<160x576xbf16, #tpu.memory_space<vmem>>, vector<160x64xbf16>
    tpu.vector_store %arg11[%c0_43, %c384], %41 {strides = array<i32>} : memref<160x576xbf16, #tpu.memory_space<vmem>>, vector<160x64xbf16>,
    %c2_44 = arith.constant 2 : index
    %c1_45 = arith.constant 1 : index
    %c0_46 = arith.constant 0 : index
    %43 = vector.load %arg10[%c2_44, %c1_45, %c0_46] : memref<12x18x64xbf16, #tpu.memory_space<vmem>>, vector<10x16x64xbf16>
    %44 = vector.shape_cast %43 : vector<10x16x64xbf16> to vector<160x64xbf16>
    %c0_47 = arith.constant 0 : index
    %c448 = arith.constant 448 : index
    %45 = vector.load %arg11[%c0_47, %c448] : memref<160x576xbf16, #tpu.memory_space<vmem>>, vector<160x64xbf16>
    tpu.vector_store %arg11[%c0_47, %c448], %44 {strides = array<i32>} : memref<160x576xbf16, #tpu.memory_space<vmem>>, vector<160x64xbf16>,
    %c2_48 = arith.constant 2 : index
    %c2_49 = arith.constant 2 : index
    %c0_50 = arith.constant 0 : index
    %46 = vector.load %arg10[%c2_48, %c2_49, %c0_50] : memref<12x18x64xbf16, #tpu.memory_space<vmem>>, vector<10x16x64xbf16>
    %47 = vector.shape_cast %46 : vector<10x16x64xbf16> to vector<160x64xbf16>
    %c0_51 = arith.constant 0 : index
    %c512 = arith.constant 512 : index
    %48 = vector.load %arg11[%c0_51, %c512] : memref<160x576xbf16, #tpu.memory_space<vmem>>, vector<160x64xbf16>
    tpu.vector_store %arg11[%c0_51, %c512], %47 {strides = array<i32>} : memref<160x576xbf16, #tpu.memory_space<vmem>>, vector<160x64xbf16>,
    %c0_52 = arith.constant 0 : index
    %c0_53 = arith.constant 0 : index
    %49 = vector.load %arg11[%c0_52, %c0_53] : memref<160x576xbf16, #tpu.memory_space<vmem>>, vector<160x576xbf16>
    %c0_54 = arith.constant 0 : index
    %c0_55 = arith.constant 0 : index
    %50 = vector.load %arg3[%c0_54, %c0_55] : memref<576x64xbf16, #tpu.memory_space<vmem>>, vector<576x64xbf16>
    %cst_56 = arith.constant dense<0.000000e+00> : vector<160x64xf32>
    %51 = tpu.matmul %49, %50, %cst_56 {dimension_numbers = #tpu.dot_dimension_numbers<[1], [0], [0], [1], [0, 0, 1, 1], [], []>} : vector<160x576xbf16>, vector<576x64xbf16>, vector<160x64xf32> -> vector<160x64xf32>
    %c0_57 = arith.constant 0 : index
    %c0_58 = arith.constant 0 : index
    %52 = vector.load %arg4[%c0_57, %c0_58] : memref<1x64xf32, #tpu.memory_space<vmem>>, vector<1x64xf32>
    %53 = vector.broadcast %52 : vector<1x64xf32> to vector<160x64xf32>
    %54 = arith.mulf %51, %53 : vector<160x64xf32>
    %c0_59 = arith.constant 0 : index
    %c0_60 = arith.constant 0 : index
    %55 = vector.load %arg5[%c0_59, %c0_60] : memref<1x64xf32, #tpu.memory_space<vmem>>, vector<1x64xf32>
    %56 = vector.broadcast %55 : vector<1x64xf32> to vector<160x64xf32>
    %57 = arith.addf %54, %56 : vector<160x64xf32>
    %cst_61 = arith.constant 0.000000e+00 : f32
    %58 = vector.broadcast %cst_61 : f32 to vector<160x64xf32>
    %59 = arith.maximumf %57, %58 : vector<160x64xf32>
    %cst_62 = arith.constant 0.000000e+00 : bf16
    %60 = vector.broadcast %cst_62 : bf16 to vector<10x1x64xbf16>
    %c0_63 = arith.constant 0 : index
    %c0_64 = arith.constant 0 : index
    %c0_65 = arith.constant 0 : index
    %61 = vector.load %arg12[%c0_63, %c0_64, %c0_65] : memref<10x18x64xbf16, #tpu.memory_space<vmem>>, vector<10x1x64xbf16>
    tpu.vector_store %arg12[%c0_63, %c0_64, %c0_65], %60 {strides = array<i32>} : memref<10x18x64xbf16, #tpu.memory_space<vmem>>, vector<10x1x64xbf16>,
    %cst_66 = arith.constant 0.000000e+00 : bf16
    %62 = vector.broadcast %cst_66 : bf16 to vector<10x1x64xbf16>
    %c0_67 = arith.constant 0 : index
    %c17_68 = arith.constant 17 : index
    %c0_69 = arith.constant 0 : index
    %63 = vector.load %arg12[%c0_67, %c17_68, %c0_69] : memref<10x18x64xbf16, #tpu.memory_space<vmem>>, vector<10x1x64xbf16>
    tpu.vector_store %arg12[%c0_67, %c17_68, %c0_69], %62 {strides = array<i32>} : memref<10x18x64xbf16, #tpu.memory_space<vmem>>, vector<10x1x64xbf16>,
    %64 = arith.truncf %59 : vector<160x64xf32> to vector<160x64xbf16>
    %65 = vector.shape_cast %64 : vector<160x64xbf16> to vector<10x16x64xbf16>
    %c0_70 = arith.constant 0 : index
    %c1_71 = arith.constant 1 : index
    %c0_72 = arith.constant 0 : index
    %66 = vector.load %arg12[%c0_70, %c1_71, %c0_72] : memref<10x18x64xbf16, #tpu.memory_space<vmem>>, vector<10x16x64xbf16>
    tpu.vector_store %arg12[%c0_70, %c1_71, %c0_72], %65 {strides = array<i32>} : memref<10x18x64xbf16, #tpu.memory_space<vmem>>, vector<10x16x64xbf16>,
    %c0_i32_73 = arith.constant 0 : i32
    %67 = arith.cmpi eq, %arg1, %c0_i32_73 : i32
    %68 = arith.extui %67 : i1 to i32
    %c0_i32_74 = arith.constant 0 : i32
    %69 = arith.cmpi ne, %68, %c0_i32_74 : i32
    scf.if %69 {
      %cst_138 = arith.constant 0.000000e+00 : bf16
      %121 = vector.broadcast %cst_138 : bf16 to vector<1x18x64xbf16>
      %c0_139 = arith.constant 0 : index
      %c0_140 = arith.constant 0 : index
      %c0_141 = arith.constant 0 : index
      %122 = vector.load %arg12[%c0_139, %c0_140, %c0_141] : memref<10x18x64xbf16, #tpu.memory_space<vmem>>, vector<1x18x64xbf16>
      tpu.vector_store %arg12[%c0_139, %c0_140, %c0_141], %121 {strides = array<i32>} : memref<10x18x64xbf16, #tpu.memory_space<vmem>>, vector<1x18x64xbf16>,
    } else {
    }
    %c1_i32_75 = arith.constant 1 : i32
    %70 = arith.cmpi eq, %arg1, %c1_i32_75 : i32
    %71 = arith.extui %70 : i1 to i32
    %c0_i32_76 = arith.constant 0 : i32
    %72 = arith.cmpi ne, %71, %c0_i32_76 : i32
    scf.if %72 {
      %cst_138 = arith.constant 0.000000e+00 : bf16
      %121 = vector.broadcast %cst_138 : bf16 to vector<1x18x64xbf16>
      %c9 = arith.constant 9 : index
      %c0_139 = arith.constant 0 : index
      %c0_140 = arith.constant 0 : index
      %122 = vector.load %arg12[%c9, %c0_139, %c0_140] : memref<10x18x64xbf16, #tpu.memory_space<vmem>>, vector<1x18x64xbf16>
      tpu.vector_store %arg12[%c9, %c0_139, %c0_140], %121 {strides = array<i32>} : memref<10x18x64xbf16, #tpu.memory_space<vmem>>, vector<1x18x64xbf16>,
    } else {
    }
    %c0_77 = arith.constant 0 : index
    %c0_78 = arith.constant 0 : index
    %c0_79 = arith.constant 0 : index
    %73 = vector.load %arg12[%c0_77, %c0_78, %c0_79] : memref<10x18x64xbf16, #tpu.memory_space<vmem>>, vector<8x16x64xbf16>
    %74 = vector.shape_cast %73 : vector<8x16x64xbf16> to vector<128x64xbf16>
    %c0_80 = arith.constant 0 : index
    %c0_81 = arith.constant 0 : index
    %75 = vector.load %arg13[%c0_80, %c0_81] : memref<128x576xbf16, #tpu.memory_space<vmem>>, vector<128x64xbf16>
    tpu.vector_store %arg13[%c0_80, %c0_81], %74 {strides = array<i32>} : memref<128x576xbf16, #tpu.memory_space<vmem>>, vector<128x64xbf16>,
    %c0_82 = arith.constant 0 : index
    %c1_83 = arith.constant 1 : index
    %c0_84 = arith.constant 0 : index
    %76 = vector.load %arg12[%c0_82, %c1_83, %c0_84] : memref<10x18x64xbf16, #tpu.memory_space<vmem>>, vector<8x16x64xbf16>
    %77 = vector.shape_cast %76 : vector<8x16x64xbf16> to vector<128x64xbf16>
    %c0_85 = arith.constant 0 : index
    %c64_86 = arith.constant 64 : index
    %78 = vector.load %arg13[%c0_85, %c64_86] : memref<128x576xbf16, #tpu.memory_space<vmem>>, vector<128x64xbf16>
    tpu.vector_store %arg13[%c0_85, %c64_86], %77 {strides = array<i32>} : memref<128x576xbf16, #tpu.memory_space<vmem>>, vector<128x64xbf16>,
    %c0_87 = arith.constant 0 : index
    %c2_88 = arith.constant 2 : index
    %c0_89 = arith.constant 0 : index
    %79 = vector.load %arg12[%c0_87, %c2_88, %c0_89] : memref<10x18x64xbf16, #tpu.memory_space<vmem>>, vector<8x16x64xbf16>
    %80 = vector.shape_cast %79 : vector<8x16x64xbf16> to vector<128x64xbf16>
    %c0_90 = arith.constant 0 : index
    %c128_91 = arith.constant 128 : index
    %81 = vector.load %arg13[%c0_90, %c128_91] : memref<128x576xbf16, #tpu.memory_space<vmem>>, vector<128x64xbf16>
    tpu.vector_store %arg13[%c0_90, %c128_91], %80 {strides = array<i32>} : memref<128x576xbf16, #tpu.memory_space<vmem>>, vector<128x64xbf16>,
    %c1_92 = arith.constant 1 : index
    %c0_93 = arith.constant 0 : index
    %c0_94 = arith.constant 0 : index
    %82 = vector.load %arg12[%c1_92, %c0_93, %c0_94] : memref<10x18x64xbf16, #tpu.memory_space<vmem>>, vector<8x16x64xbf16>
    %83 = vector.shape_cast %82 : vector<8x16x64xbf16> to vector<128x64xbf16>
    %c0_95 = arith.constant 0 : index
    %c192_96 = arith.constant 192 : index
    %84 = vector.load %arg13[%c0_95, %c192_96] : memref<128x576xbf16, #tpu.memory_space<vmem>>, vector<128x64xbf16>
    tpu.vector_store %arg13[%c0_95, %c192_96], %83 {strides = array<i32>} : memref<128x576xbf16, #tpu.memory_space<vmem>>, vector<128x64xbf16>,
    %c1_97 = arith.constant 1 : index
    %c1_98 = arith.constant 1 : index
    %c0_99 = arith.constant 0 : index
    %85 = vector.load %arg12[%c1_97, %c1_98, %c0_99] : memref<10x18x64xbf16, #tpu.memory_space<vmem>>, vector<8x16x64xbf16>
    %86 = vector.shape_cast %85 : vector<8x16x64xbf16> to vector<128x64xbf16>
    %c0_100 = arith.constant 0 : index
    %c256_101 = arith.constant 256 : index
    %87 = vector.load %arg13[%c0_100, %c256_101] : memref<128x576xbf16, #tpu.memory_space<vmem>>, vector<128x64xbf16>
    tpu.vector_store %arg13[%c0_100, %c256_101], %86 {strides = array<i32>} : memref<128x576xbf16, #tpu.memory_space<vmem>>, vector<128x64xbf16>,
    %c1_102 = arith.constant 1 : index
    %c2_103 = arith.constant 2 : index
    %c0_104 = arith.constant 0 : index
    %88 = vector.load %arg12[%c1_102, %c2_103, %c0_104] : memref<10x18x64xbf16, #tpu.memory_space<vmem>>, vector<8x16x64xbf16>
    %89 = vector.shape_cast %88 : vector<8x16x64xbf16> to vector<128x64xbf16>
    %c0_105 = arith.constant 0 : index
    %c320_106 = arith.constant 320 : index
    %90 = vector.load %arg13[%c0_105, %c320_106] : memref<128x576xbf16, #tpu.memory_space<vmem>>, vector<128x64xbf16>
    tpu.vector_store %arg13[%c0_105, %c320_106], %89 {strides = array<i32>} : memref<128x576xbf16, #tpu.memory_space<vmem>>, vector<128x64xbf16>,
    %c2_107 = arith.constant 2 : index
    %c0_108 = arith.constant 0 : index
    %c0_109 = arith.constant 0 : index
    %91 = vector.load %arg12[%c2_107, %c0_108, %c0_109] : memref<10x18x64xbf16, #tpu.memory_space<vmem>>, vector<8x16x64xbf16>
    %92 = vector.shape_cast %91 : vector<8x16x64xbf16> to vector<128x64xbf16>
    %c0_110 = arith.constant 0 : index
    %c384_111 = arith.constant 384 : index
    %93 = vector.load %arg13[%c0_110, %c384_111] : memref<128x576xbf16, #tpu.memory_space<vmem>>, vector<128x64xbf16>
    tpu.vector_store %arg13[%c0_110, %c384_111], %92 {strides = array<i32>} : memref<128x576xbf16, #tpu.memory_space<vmem>>, vector<128x64xbf16>,
    %c2_112 = arith.constant 2 : index
    %c1_113 = arith.constant 1 : index
    %c0_114 = arith.constant 0 : index
    %94 = vector.load %arg12[%c2_112, %c1_113, %c0_114] : memref<10x18x64xbf16, #tpu.memory_space<vmem>>, vector<8x16x64xbf16>
    %95 = vector.shape_cast %94 : vector<8x16x64xbf16> to vector<128x64xbf16>
    %c0_115 = arith.constant 0 : index
    %c448_116 = arith.constant 448 : index
    %96 = vector.load %arg13[%c0_115, %c448_116] : memref<128x576xbf16, #tpu.memory_space<vmem>>, vector<128x64xbf16>
    tpu.vector_store %arg13[%c0_115, %c448_116], %95 {strides = array<i32>} : memref<128x576xbf16, #tpu.memory_space<vmem>>, vector<128x64xbf16>,
    %c2_117 = arith.constant 2 : index
    %c2_118 = arith.constant 2 : index
    %c0_119 = arith.constant 0 : index
    %97 = vector.load %arg12[%c2_117, %c2_118, %c0_119] : memref<10x18x64xbf16, #tpu.memory_space<vmem>>, vector<8x16x64xbf16>
    %98 = vector.shape_cast %97 : vector<8x16x64xbf16> to vector<128x64xbf16>
    %c0_120 = arith.constant 0 : index
    %c512_121 = arith.constant 512 : index
    %99 = vector.load %arg13[%c0_120, %c512_121] : memref<128x576xbf16, #tpu.memory_space<vmem>>, vector<128x64xbf16>
    tpu.vector_store %arg13[%c0_120, %c512_121], %98 {strides = array<i32>} : memref<128x576xbf16, #tpu.memory_space<vmem>>, vector<128x64xbf16>,
    %c0_122 = arith.constant 0 : index
    %c0_123 = arith.constant 0 : index
    %100 = vector.load %arg13[%c0_122, %c0_123] : memref<128x576xbf16, #tpu.memory_space<vmem>>, vector<128x576xbf16>
    %c0_124 = arith.constant 0 : index
    %c0_125 = arith.constant 0 : index
    %101 = vector.load %arg6[%c0_124, %c0_125] : memref<576x64xbf16, #tpu.memory_space<vmem>>, vector<576x64xbf16>
    %cst_126 = arith.constant dense<0.000000e+00> : vector<128x64xf32>
    %102 = tpu.matmul %100, %101, %cst_126 {dimension_numbers = #tpu.dot_dimension_numbers<[1], [0], [0], [1], [0, 0, 1, 1], [], []>} : vector<128x576xbf16>, vector<576x64xbf16>, vector<128x64xf32> -> vector<128x64xf32>
    %c0_127 = arith.constant 0 : index
    %103 = arith.index_cast %1 : i32 to index
    %c0_128 = arith.constant 0 : index
    %c0_129 = arith.constant 0 : index
    %104 = vector.load %arg2[%c0_127, %103, %c0_128, %c0_129] : memref<1x16x16x64xbf16, #tpu.memory_space<vmem>>, vector<1x8x16x64xbf16>
    %105 = vector.shape_cast %104 : vector<1x8x16x64xbf16> to vector<8x16x64xbf16>
    %106 = arith.extf %105 : vector<8x16x64xbf16> to vector<8x16x64xf32>
    %107 = vector.shape_cast %106 : vector<8x16x64xf32> to vector<128x64xf32>
    %c0_130 = arith.constant 0 : index
    %c0_131 = arith.constant 0 : index
    %108 = vector.load %arg7[%c0_130, %c0_131] : memref<1x64xf32, #tpu.memory_space<vmem>>, vector<1x64xf32>
    %109 = vector.broadcast %108 : vector<1x64xf32> to vector<128x64xf32>
    %110 = arith.mulf %102, %109 : vector<128x64xf32>
    %c0_132 = arith.constant 0 : index
    %c0_133 = arith.constant 0 : index
    %111 = vector.load %arg8[%c0_132, %c0_133] : memref<1x64xf32, #tpu.memory_space<vmem>>, vector<1x64xf32>
    %112 = vector.broadcast %111 : vector<1x64xf32> to vector<128x64xf32>
    %113 = arith.addf %110, %112 : vector<128x64xf32>
    %114 = arith.addf %113, %107 : vector<128x64xf32>
    %cst_134 = arith.constant 0.000000e+00 : f32
    %115 = vector.broadcast %cst_134 : f32 to vector<128x64xf32>
    %116 = arith.maximumf %114, %115 : vector<128x64xf32>
    %117 = tpu.transpose %116, [1, 0] : vector<128x64xf32> -> vector<64x128xf32>
    %c0_135 = arith.constant 0 : index
    %c0_136 = arith.constant 0 : index
    %c0_137 = arith.constant 0 : index
    %118 = vector.load %arg9[%c0_135, %c0_136, %c0_137] : memref<1x64x128xf32, #tpu.memory_space<vmem>>, vector<1x64x128xf32>
    %119 = vector.shape_cast %118 : vector<1x64x128xf32> to vector<64x128xf32>
    %120 = vector.shape_cast %117 : vector<64x128xf32> to vector<1x64x128xf32>
    tpu.vector_store %arg9[%c0_135, %c0_136, %c0_137], %120 {strides = array<i32>} : memref<1x64x128xf32, #tpu.memory_space<vmem>>, vector<1x64x128xf32>,
    return
  }
  func.func @transform_0(%arg0: i32, %arg1: i32) -> (i32, i32, i32, i32) {
    %c0_i32 = arith.constant 0 : i32
    %c0_i32_0 = arith.constant 0 : i32
    %c0_i32_1 = arith.constant 0 : i32
    %c0_i32_2 = arith.constant 0 : i32
    return %arg0, %c0_i32, %c0_i32_0, %c0_i32_1 : i32, i32, i32, i32
  }
  func.func @transform_1(%arg0: i32, %arg1: i32) -> (i32, i32) {
    %c0_i32 = arith.constant 0 : i32
    %c0_i32_0 = arith.constant 0 : i32
    %c0_i32_1 = arith.constant 0 : i32
    return %c0_i32, %c0_i32_0 : i32, i32
  }
  func.func @transform_2(%arg0: i32, %arg1: i32) -> (i32, i32) {
    %c0_i32 = arith.constant 0 : i32
    %c0_i32_0 = arith.constant 0 : i32
    %c0_i32_1 = arith.constant 0 : i32
    return %c0_i32, %c0_i32_0 : i32, i32
  }
  func.func @transform_3(%arg0: i32, %arg1: i32) -> (i32, i32) {
    %c0_i32 = arith.constant 0 : i32
    %c0_i32_0 = arith.constant 0 : i32
    %c0_i32_1 = arith.constant 0 : i32
    return %c0_i32, %c0_i32_0 : i32, i32
  }
  func.func @transform_4(%arg0: i32, %arg1: i32) -> (i32, i32) {
    %c0_i32 = arith.constant 0 : i32
    %c0_i32_0 = arith.constant 0 : i32
    %c0_i32_1 = arith.constant 0 : i32
    return %c0_i32, %c0_i32_0 : i32, i32
  }
  func.func @transform_5(%arg0: i32, %arg1: i32) -> (i32, i32) {
    %c0_i32 = arith.constant 0 : i32
    %c0_i32_0 = arith.constant 0 : i32
    %c0_i32_1 = arith.constant 0 : i32
    return %c0_i32, %c0_i32_0 : i32, i32
  }
  func.func @transform_6(%arg0: i32, %arg1: i32) -> (i32, i32) {
    %c0_i32 = arith.constant 0 : i32
    %c0_i32_0 = arith.constant 0 : i32
    %c0_i32_1 = arith.constant 0 : i32
    return %c0_i32, %c0_i32_0 : i32, i32
  }
  func.func @transform_7(%arg0: i32, %arg1: i32) -> (i32, i32, i32) {
    %c0_i32 = arith.constant 0 : i32
    %c0_i32_0 = arith.constant 0 : i32
    return %arg0, %c0_i32, %arg1 : i32, i32, i32
  }
}

</mosaic_0001>

<bundles_post_ra>
// kernel: tpu_custom_call.1
= control target key start
LH: loop header
LB: loop body
LE: loop exit
PB: predicated region body
PF: predicated region fallthrough
CT: control target
= control target key end

     0   :  { %12 = vsyncpa [#allocation7], 0  ;;  %s9005_s0 = inlined_call_operand.vmem [shape: bf16[2,16,16,64], index: 0, kind: input, shape index: {}]   ;;  %s9006_s1 = inlined_call_operand.vmem [shape: bf16[576,64], index: 1, kind: input, shape index: {}]   ;;  %s9007_s2 = inlined_call_operand.vmem [shape: f32[1,64], index: 2, kind: input, shape index: {}]   ;;  %s9008_s3 = inlined_call_operand.vmem [shape: f32[1,64], index: 3, kind: input, shape index: {}]   ;;  %s9009_s4 = inlined_call_operand.vmem [shape: bf16[576,64], index: 4, kind: input, shape index: {}]   ;;  %s9010_s5 = inlined_call_operand.vmem [shape: f32[1,64], index: 5, kind: input, shape index: {}]   ;;  %s9011_s6 = inlined_call_operand.vmem [shape: f32[1,64], index: 6, kind: input, shape index: {}]   ;;  %s9012_s7 = inlined_call_operand.hbm [shape: f32[2,64,256], index: 7, kind: output, shape index: {}]  }
   0x1   :  { %14 = vsyncpa [#allocation7 + $0x1], 0  ;;  %s7332_s24 = smov 0   ;;  %s7334_s25 = smov 0  }
   0x2   :  { %s7336_s26 = smov 0   ;;  %s7338_s27 = smov 0  }
   0x3   :  { %s7340_s28 = smov 0   ;;  %s7342_s29 = smov 0  }
   0x4   :  { %s7344_s30 = smov 0   ;;  %s7346_s8 = smov 0  }
   0x5 LB: > { %s6199_s9 = sadd.s32 4294967295, %s7281_s8   ;;  %s6200_s10 = sadd.s32 4294967294, %s7281_s8   ;;  %s7281_s8 = sphi %s7346_s8, %s20_s8   ;;  %s7277_s30 = sphi %s7344_s30, %s9033_s30   ;;  %s7273_s29 = sphi %s7342_s29, %s9032_s29   ;;  %s7269_s28 = sphi %s7340_s28, %s9031_s28   ;;  %s7265_s27 = sphi %s7338_s27, %s9030_s27   ;;  %s7261_s26 = sphi %s7336_s26, %s9029_s26   ;;  %s7257_s25 = sphi %s7334_s25, %s9028_s25   ;;  %s7253_s24 = sphi %s7332_s24, %s9027_s24  }
   0x6   : > { %s29_s11 = sadd.s32 1, %s7273_s29  ;;  %s32_s12 = sadd.s32 1, %s7277_s30 }
   0x7   : > { %p30_p0 = scmp.ge.s32.totalorder %s29_s11, 2  ;;  %p203_p1 = scmp.ne.s32.totalorder %s7261_s26, %s7257_s25 }
   0x8   : > { %p204_p2 = scmp.eq.s32.totalorder %s6199_s9, 3  ;;  %p209_p5 = scmp.ne.s32.totalorder %s7257_s25, %s7253_s24 }
   0x9   : > { %s9035_s11 = smov (%p30_p0, %s29_s11), 0  ;;  %s9037_s12 = smov (!%p30_p0, %s32_s12), %s7277_s30 }
   0xa   : > { %s189_s13 = ssub.s32 %s7273_s29, %s9035_s11  ;;  %p7383_p3 = por %p204_p2, %p203_p1 }
   0xb   : > { %p34_p4 = scmp.ge.s32.totalorder %s9037_s12, 2  ;;  %p210_p6 = scmp.eq.s32.totalorder %s6200_s10, 3 }
   0xc   : > { %p6203_p7 = scmp.ge.s32.totalorder %s7281_s8, 1  ;;  %p254_p9 = scmp.lt.s32.totalorder %s7281_s8, 5 }
   0xd   : > { %s9039_s12 = smov (%p34_p4, %s9037_s12), 0  ;;  %p7392_p8 = por %p210_p6, %p209_p5 }
   0xe   : > { %s188_s16 = ssub.s32 %s7277_s30, %s9039_s12  ;;  %s193_s17 = sadd.s32 1, %s7261_s26 }
   0xf   : > { %s190_s18 = sor.u32 %s189_s13, %s188_s16  ;;  %p255_p10 = pnand %p6203_p7, %p254_p9 }
  0x10   : > { %p191_p11 = scmp.eq.s32.totalorder %s190_s18, 0  ;;  %vm293_vm0 = vcmask (!%p255_p10), 516096   ;;  %vm294_vm1 = vsmask.f32 (!%p255_p10), 256  ;;  %v302_v0 = vld [vmem:[#allocation2 + $0x18] sm:$0x1] (!%p255_p10) }
  0x11   : > { %258 = sbr.rel (%p255_p10) target bundleno = 1224 (0x4c8), region = 48  ;;  %s283_s20 = sand.u32 (!%p255_p10), 1, %s7257_s25   ;;  %vm7406_vm2 = vmand (!%p255_p10), %vm293_vm0, %vm294_vm1  ;;  %v305_v2 = vld [vmem:[#allocation2 + $0x24] sm:$0x1] (!%p255_p10)  ;;  %v308_v3 = vld [vmem:[#allocation2 + $0x30] sm:$0x1] (!%p255_p10) }
  0x12   : > { %s7401_s19 = scalar_select %p191_p11, %s7261_s26, %s193_s17  }
  0x13   : > { %vm332_vm3 = vsmask.f32 (!%p255_p10), 7938  ;;  %v303_v4 = vsel (!%p255_p10), %vm7406_vm2, 0, %v302_v0  ;;  %v306_v5 = vsel (!%p255_p10), %vm7406_vm2, 0, %v305_v2  ;;  %v309_v6 = vsel (!%p255_p10), %vm7406_vm2, 0, %v308_v3  ;;  %s7418_s21 = sshll.u32 (!%p255_p10), %s283_s20, 6 }
  0x14   : > { %v311_v7 = vld [vmem:[#allocation2 + $0x3c] sm:$0x1] (!%p255_p10)  ;;  %304 = vst [vmem:[#allocation2 + $0x18] sm:$0x1] (!%p255_p10), %v303_v4  ;;  %307 = vst [vmem:[#allocation2 + $0x24] sm:$0x1] (!%p255_p10), %v306_v5 }
  0x15   : > { %310 = vst [vmem:[#allocation2 + $0x30] sm:$0x1] (!%p255_p10), %v309_v6  ;;  %v312_v8 = vsel (!%p255_p10), %vm7406_vm2, 0, %v311_v7  ;;  %v314_v9 = vld [vmem:[#allocation2 + $0x48] sm:$0x1] (!%p255_p10)  ;;  %vm7424_vm4 = vmand (!%p255_p10), %vm293_vm0, %vm332_vm3  ;;  %s6207_s22 = sshll.u32 (!%p255_p10), %s7265_s27, 3 }
  0x16   : > { %v317_v10 = vld [vmem:[#allocation2 + $0x54] sm:$0x1] (!%p255_p10)  ;;  %313 = vst [vmem:[#allocation2 + $0x3c] sm:$0x1] (!%p255_p10), %v312_v8  ;;  %v315_v12 = vsel (!%p255_p10), %vm7406_vm2, 0, %v314_v9  ;;  %p286_p12 = scmp.lt.s32.totalorder (!%p255_p10), %s7269_s28, 1 }
  0x17   : > { %v318_v13 = vsel (!%p255_p10), %vm7406_vm2, 0, %v317_v10  ;;  %v320_v14 = vld [vmem:[#allocation2 + $0x60] sm:$0x1] (!%p255_p10)  ;;  %v323_v15 = vld [vmem:[#allocation2 + $0x6c] sm:$0x1] (!%p255_p10)  ;;  %s6562_s9 = sshll.u32 (!%p255_p10), %s7265_s27, 6 }
  0x18   : > { %316 = vst [vmem:[#allocation2 + $0x48] sm:$0x1] %v315_v12  ;;  %319 = vst [vmem:[#allocation2 + $0x54] sm:$0x1] %v318_v13  ;;  %v321_v16 = vsel %vm7406_vm2, 0, %v320_v14  ;;  %v324_v17 = vsel %vm7406_vm2, 0, %v323_v15 }
  0x19   : > { %v340_v18 = vld [vmem:[#allocation2 + $0x20] sm:$0x1]  ;;  %v343_v19 = vld [vmem:[#allocation2 + $0x2c] sm:$0x1]  ;;  %322 = vst [vmem:[#allocation2 + $0x60] sm:$0x1] %v321_v16 }
  0x1a   : > { %325 = vst [vmem:[#allocation2 + $0x6c] sm:$0x1] %v324_v17  ;;  %v341_v20 = vsel %vm7424_vm4, 0, %v340_v18  ;;  %v344_v21 = vsel %vm7424_vm4, 0, %v343_v19  ;;  %v346_v22 = vld [vmem:[#allocation2 + $0x38] sm:$0x1] }
  0x1b   : > { %v349_v23 = vld [vmem:[#allocation2 + $0x44] sm:$0x1]  ;;  %342 = vst [vmem:[#allocation2 + $0x20] sm:$0x1] %v341_v20  ;;  %345 = vst [vmem:[#allocation2 + $0x2c] sm:$0x1] %v344_v21 }
  0x1c   : > { %v347_v24 = vsel %vm7424_vm4, 0, %v346_v22  ;;  %v350_v25 = vsel %vm7424_vm4, 0, %v349_v23  ;;  %v352_v26 = vld [vmem:[#allocation2 + $0x50] sm:$0x1]  ;;  %v355_v27 = vld [vmem:[#allocation2 + $0x5c] sm:$0x1] }
  0x1d   : > { %348 = vst [vmem:[#allocation2 + $0x38] sm:$0x1] %v347_v24  ;;  %351 = vst [vmem:[#allocation2 + $0x44] sm:$0x1] %v350_v25  ;;  %v353_v28 = vsel %vm7424_vm4, 0, %v352_v26  ;;  %v356_v29 = vsel %vm7424_vm4, 0, %v355_v27 }
  0x1e   : > { %v358_v30 = vld [vmem:[#allocation2 + $0x68] sm:$0x1]  ;;  %v361_v31 = vld [vmem:[#allocation2 + $0x74] sm:$0x1]  ;;  %354 = vst [vmem:[#allocation2 + $0x50] sm:$0x1] %v353_v28 }
  0x1f   : > { %357 = vst [vmem:[#allocation2 + $0x5c] sm:$0x1] %v356_v29  ;;  %v359_v32 = vsel %vm7424_vm4, 0, %v358_v30  ;;  %v362_v33 = vsel %vm7424_vm4, 0, %v361_v31  ;;  %v296_v34 = vld [vmem:[#allocation2] sm:$0x1] }
  0x20   : > { %360 = vst [vmem:[#allocation2 + $0x68] sm:$0x1] %v359_v32  ;;  %363 = vst [vmem:[#allocation2 + $0x74] sm:$0x1] %v362_v33  ;;  %v297_v35 = vsel %vm7406_vm2, 0, %v296_v34  ;;  %s287_s23 = scalar_select %p286_p12, %s7269_s28, 1 }
  0x21   : > { %v299_v36 = vld [vmem:[#allocation2 + $0xc] sm:$0x1]  ;;  %v326_v37 = vld [vmem:[#allocation2 + $0x78] sm:$0x1]  ;;  %298 = vst [vmem:[#allocation2] sm:$0x1] %v297_v35 }
  0x22   : > { %v300_v38 = vsel %vm7406_vm2, 0, %v299_v36  ;;  %v327_v39 = vsel %vm7406_vm2, 0, %v326_v37  ;;  %v329_v40 = vld [vmem:[#allocation2 + $0x84] sm:$0x1]  ;;  %v334_v41 = vld [vmem:[#allocation2 + $0x8] sm:$0x1] }
  0x23   : > { %301 = vst [vmem:[#allocation2 + $0xc] sm:$0x1] %v300_v38  ;;  %328 = vst [vmem:[#allocation2 + $0x78] sm:$0x1] %v327_v39  ;;  %v330_v42 = vsel %vm7406_vm2, 0, %v329_v40  ;;  %v335_v43 = vsel %vm7424_vm4, 0, %v334_v41 }
  0x24   : > { %v337_v44 = vld [vmem:[#allocation2 + $0x14] sm:$0x1]  ;;  %v364_v45 = vld [vmem:[#allocation2 + $0x80] sm:$0x1]  ;;  %331 = vst [vmem:[#allocation2 + $0x84] sm:$0x1] %v330_v42 }
  0x25   : > { %336 = vst [vmem:[#allocation2 + $0x8] sm:$0x1] %v335_v43  ;;  %v338_v46 = vsel %vm7424_vm4, 0, %v337_v44  ;;  %v365_v47 = vsel %vm7424_vm4, 0, %v364_v45  ;;  %v367_v48 = vld [vmem:[#allocation2 + $0x8c] sm:$0x1] }
  0x26   : > { %339 = vst [vmem:[#allocation2 + $0x14] sm:$0x1] %v338_v46  ;;  %366 = vst [vmem:[#allocation2 + $0x80] sm:$0x1] %v365_v47  ;;  %v368_v49 = vsel %vm7424_vm4, 0, %v367_v48  ;;  %s6560_s10 = sshll.u32 %s287_s23, 7 }
  0x27   : > { %369 = vst [vmem:[#allocation2 + $0x8c] sm:$0x1] %v368_v49  ;;  %s7477_s17 = scalar_lea.vmem %s9005_s0, %s6560_s10  ;;  %vm552_vm5 = vcmask 519168   ;;  %vm389_vm6 = vsmask.f32 4368  ;;  %s7567_s23 = scalar_lea.vmem [#allocation6], %s7418_s21 }
  0x28   : > { %s7480_s18 = scalar_lea.vmem %s7477_s17, %s6562_s9  ;;  %v554_v58 = vld [vmem:[#allocation2 + $0x18] sm:$0xf]  ;;  %vm7489_vm7 = vmand %vm552_vm5, %vm332_vm3  ;;  %v559_v8 = vld [vmem:[#allocation2 + $0x20] sm:$0x1]  ;;  %p6210_p13 = scmp.ne.s32.totalorder %s7265_s27, 0 }
  0x29   : > { %v373_v50 = vld [vmem:[%s7480_s18] sm:$0xf]  ;;  %v374_v51 = vld [vmem:[%s7480_s18 + $0x4] sm:$0xf]  ;;  %v375_v52 = vld [vmem:[%s7480_s18 + $0x8] sm:$0xf] }
  0x2a   : > { %v392_v53 = vshrl.u32 %v373_v50, 16  ;;  %v395_v54 = vshll.u32 %v373_v50, 16  ;;  %v400_v55 = vshrl.u32 %v374_v51, 16  ;;  %v403_v56 = vshll.u32 %v374_v51, 16  ;;  %v376_v57 = vld [vmem:[%s7480_s18 + $0xc] sm:$0xf]  ;;  %vm7496_vm8 = vmor %vm294_vm1, %vm389_vm6 }
  0x2b   : > { %v409_v59 = vshrl.u32 %v375_v52, 16  ;;  %v412_v60 = vshll.u32 %v375_v52, 16  ;;  %v417_v61 = vshrl.u32 %v376_v57, 16  ;;  %v420_v62 = vshll.u32 %v376_v57, 16  ;;  %v377_v63 = vld [vmem:[%s7480_s18 + $0x10] sm:$0xf] }
  0x2c   : > { %v394_v0 = vrot.slane %v392_v53, 7  ;;  %v402_v3 = vrot.slane %v400_v55, 7  ;;  %v426_v4 = vshrl.u32 %v377_v63, 16  ;;  %v429_v5 = vshll.u32 %v377_v63, 16  ;;  %v378_v6 = vld [vmem:[%s7480_s18 + $0x14] sm:$0xf] }
  0x2d   : > { %v411_v9 = vrot.slane %v409_v59, 7  ;;  %v419_v10 = vrot.slane %v417_v61, 7  ;;  %v434_v12 = vshrl.u32 %v378_v6, 16  ;;  %v437_v13 = vshll.u32 %v378_v6, 16  ;;  %v562_v18 = vld [vmem:[#allocation2 + $0x24] sm:$0xf] }
  0x2e   : > { %v397_v14 = vor.u32 %v395_v54, %v394_v0  ;;  %v398_v15 = vrot.slane %v394_v0, 4  ;;  %v405_v16 = vor.u32 %v403_v56, %v402_v3  ;;  %v407_v17 = vrot.slane %v402_v3, 4  ;;  %v566_v19 = vld [vmem:[#allocation2 + $0x2c] sm:$0x1]  ;;  %v379_v24 = vld [vmem:[%s7480_s18 + $0x18] sm:$0xf] }
  0x2f   : > { %v414_v20 = vor.u32 %v412_v60, %v411_v9  ;;  %v415_v21 = vrot.slane %v411_v9, 4  ;;  %v422_v22 = vor.u32 %v420_v62, %v419_v10  ;;  %v424_v23 = vrot.slane %v419_v10, 4  ;;  %v569_v29 = vld [vmem:[#allocation2 + $0x30] sm:$0xf]  ;;  %v380_v30 = vld [vmem:[%s7480_s18 + $0x1c] sm:$0xf] }
  0x30   : > { %v555_v25 = vsel %vm7489_vm7, %v397_v14, %v554_v58  ;;  %v406_v26 = vsel %vm7496_vm8, %v398_v15, %v405_v16  ;;  %v560_v27 = vsel %vm7406_vm2, %v407_v17, %v559_v8  ;;  %v428_v28 = vrot.slane %v426_v4, 7  ;;  %v573_v35 = vld [vmem:[#allocation2 + $0x38] sm:$0x1]  ;;  %v381_v36 = vld [vmem:[%s7480_s18 + $0x20] sm:$0xf] }
  0x31   : > { %556 = vst [vmem:[#allocation2 + $0x18] sm:$0xf] %v555_v25  ;;  %558 = vst.msk [vmem:[#allocation2 + $0x1c] sm:$0xf] %vm552_vm5, %v406_v26  ;;  %v563_v31 = vsel %vm7489_vm7, %v414_v20, %v562_v18  ;;  %v423_v32 = vsel %vm7496_vm8, %v415_v21, %v422_v22  ;;  %v567_v33 = vsel %vm7406_vm2, %v424_v23, %v566_v19  ;;  %v436_v34 = vrot.slane %v434_v12, 7 }
  0x32   : > { %561 = vst [vmem:[#allocation2 + $0x20] sm:$0x1] %v560_v27  ;;  %564 = vst [vmem:[#allocation2 + $0x24] sm:$0xf] %v563_v31  ;;  %v431_v37 = vor.u32 %v429_v5, %v428_v28  ;;  %v432_v38 = vrot.slane %v428_v28, 4  ;;  %v443_v39 = vshrl.u32 %v379_v24, 16 }
  0x33   : > { %565 = vst.msk [vmem:[#allocation2 + $0x28] sm:$0xf] %vm552_vm5, %v423_v32  ;;  %568 = vst [vmem:[#allocation2 + $0x2c] sm:$0x1] %v567_v33  ;;  %v446_v40 = vshll.u32 %v379_v24, 16  ;;  %v439_v42 = vor.u32 %v437_v13, %v436_v34  ;;  %v441_v43 = vrot.slane %v436_v34, 4 }
  0x34   : > { %v382_v41 = vld [vmem:[%s7480_s18 + $0x24] sm:$0xf]  ;;  %v451_v44 = vshrl.u32 %v380_v30, 16  ;;  %v454_v45 = vshll.u32 %v380_v30, 16  ;;  %v570_v46 = vsel %vm7489_vm7, %v431_v37, %v569_v29  ;;  %v445_v47 = vrot.slane %v443_v39, 7 }
  0x35   : > { %v460_v48 = vshrl.u32 %v381_v36, 16  ;;  %v463_v49 = vshll.u32 %v381_v36, 16  ;;  %v383_v50 = vld [vmem:[%s7480_s18 + $0x28] sm:$0xf]  ;;  %571 = vst [vmem:[#allocation2 + $0x30] sm:$0xf] %v570_v46  ;;  %v440_v51 = vsel %vm7496_vm8, %v432_v38, %v439_v42  ;;  %v574_v52 = vsel %vm7406_vm2, %v441_v43, %v573_v35 }
  0x36   : > { %v576_v53 = vld [vmem:[#allocation2 + $0x3c] sm:$0xf]  ;;  %v453_v54 = vrot.slane %v451_v44, 7  ;;  %v580_v55 = vld [vmem:[#allocation2 + $0x44] sm:$0x1]  ;;  %v468_v56 = vshrl.u32 %v382_v41, 16  ;;  %v448_v57 = vor.u32 %v446_v40, %v445_v47 }
  0x37   : > { %572 = vst.msk [vmem:[#allocation2 + $0x34] sm:$0xf] %vm552_vm5, %v440_v51  ;;  %575 = vst [vmem:[#allocation2 + $0x38] sm:$0x1] %v574_v52  ;;  %v449_v58 = vrot.slane %v445_v47, 4  ;;  %v462_v59 = vrot.slane %v460_v48, 7 }
  0x38   : > { %v583_v60 = vld [vmem:[#allocation2 + $0x48] sm:$0xf]  ;;  %v471_v61 = vshll.u32 %v382_v41, 16  ;;  %v456_v62 = vor.u32 %v454_v45, %v453_v54  ;;  %v458_v63 = vrot.slane %v453_v54, 4  ;;  %v470_v0 = vrot.slane %v468_v56, 7 }
  0x39   : > { %v477_v3 = vshrl.u32 %v383_v50, 16  ;;  %v384_v4 = vld [vmem:[%s7480_s18 + $0x2c] sm:$0xf]  ;;  %v577_v5 = vsel %vm7489_vm7, %v448_v57, %v576_v53  ;;  %v465_v6 = vor.u32 %v463_v49, %v462_v59  ;;  %v466_v8 = vrot.slane %v462_v59, 4  ;;  %v587_v9 = vld [vmem:[#allocation2 + $0x50] sm:$0x1] }
  0x3a   : > { %v480_v10 = vshll.u32 %v383_v50, 16  ;;  %v385_v12 = vld [vmem:[%s7480_s18 + $0x30] sm:$0xf]  ;;  %578 = vst [vmem:[#allocation2 + $0x3c] sm:$0xf] %v577_v5  ;;  %v457_v13 = vsel %vm7496_vm8, %v449_v58, %v456_v62  ;;  %v581_v14 = vsel %vm7406_vm2, %v458_v63, %v580_v55  ;;  %v473_v15 = vor.u32 %v471_v61, %v470_v0 }
  0x3b   : > { %v475_v16 = vrot.slane %v470_v0, 4  ;;  %v386_v17 = vld [vmem:[%s7480_s18 + $0x34] sm:$0xf]  ;;  %579 = vst.msk [vmem:[#allocation2 + $0x40] sm:$0xf] %vm552_vm5, %v457_v13  ;;  %v584_v18 = vsel %vm7489_vm7, %v465_v6, %v583_v60  ;;  %v479_v19 = vrot.slane %v477_v3, 7 }
  0x3c   : > { %582 = vst [vmem:[#allocation2 + $0x44] sm:$0x1] %v581_v14  ;;  %v485_v20 = vshrl.u32 %v384_v4, 16  ;;  %v488_v21 = vshll.u32 %v384_v4, 16  ;;  %v387_v22 = vld [vmem:[%s7480_s18 + $0x38] sm:$0xf]  ;;  %v474_v23 = vsel %vm7496_vm8, %v466_v8, %v473_v15 }
  0x3d   : > { %585 = vst [vmem:[#allocation2 + $0x48] sm:$0xf] %v584_v18  ;;  %v588_v24 = vsel %vm7406_vm2, %v475_v16, %v587_v9  ;;  %v590_v25 = vld [vmem:[#allocation2 + $0x54] sm:$0xf]  ;;  %v494_v26 = vshrl.u32 %v385_v12, 16  ;;  %v497_v27 = vshll.u32 %v385_v12, 16  ;;  %v482_v28 = vor.u32 %v480_v10, %v479_v19 }
  0x3e   : > { %586 = vst.msk [vmem:[#allocation2 + $0x4c] sm:$0xf] %vm552_vm5, %v474_v23  ;;  %589 = vst [vmem:[#allocation2 + $0x50] sm:$0x1] %v588_v24  ;;  %v483_v29 = vrot.slane %v479_v19, 4  ;;  %v487_v30 = vrot.slane %v485_v20, 7 }
  0x3f   : > { %v502_v31 = vshrl.u32 %v386_v17, 16  ;;  %v388_v32 = vld [vmem:[%s7480_s18 + $0x3c] sm:$0xf]  ;;  %v496_v34 = vrot.slane %v494_v26, 7  ;;  %v505_v35 = vshll.u32 %v386_v17, 16  ;;  %v511_v36 = vshrl.u32 %v387_v22, 16 }
  0x40   : > { %v594_v33 = vld [vmem:[#allocation2 + $0x5c] sm:$0x1]  ;;  %v514_v37 = vshll.u32 %v387_v22, 16  ;;  %v591_v38 = vsel %vm7489_vm7, %v482_v28, %v590_v25  ;;  %v490_v39 = vor.u32 %v488_v21, %v487_v30  ;;  %v492_v40 = vrot.slane %v487_v30, 4  ;;  %v597_v41 = vld [vmem:[#allocation2 + $0x60] sm:$0xf] }
  0x41   : > { %v504_v42 = vrot.slane %v502_v31, 7  ;;  %592 = vst [vmem:[#allocation2 + $0x54] sm:$0xf] %v591_v38  ;;  %v499_v43 = vor.u32 %v497_v27, %v496_v34  ;;  %v500_v44 = vrot.slane %v496_v34, 4  ;;  %v601_v45 = vld [vmem:[#allocation2 + $0x68] sm:$0x1] }
  0x42   : > { %v513_v46 = vrot.slane %v511_v36, 7  ;;  %v519_v47 = vshrl.u32 %v388_v32, 16  ;;  %v491_v48 = vsel %vm7496_vm8, %v483_v29, %v490_v39  ;;  %v595_v49 = vsel %vm7406_vm2, %v492_v40, %v594_v33  ;;  %v604_v52 = vld [vmem:[#allocation2 + $0x6c] sm:$0xf]  ;;  %v608_v60 = vld [vmem:[#allocation2 + $0x74] sm:$0x1] }
  0x43   : > { %v507_v50 = vor.u32 %v505_v35, %v504_v42  ;;  %v509_v51 = vrot.slane %v504_v42, 4  ;;  %593 = vst.msk [vmem:[#allocation2 + $0x58] sm:$0xf] %vm552_vm5, %v491_v48  ;;  %596 = vst [vmem:[#allocation2 + $0x5c] sm:$0x1] %v595_v49  ;;  %v598_v53 = vsel %vm7489_vm7, %v499_v43, %v597_v41  ;;  %v522_v59 = vshll.u32 %v388_v32, 16 }
  0x44   : > { %v516_v54 = vor.u32 %v514_v37, %v513_v46  ;;  %v521_v55 = vrot.slane %v519_v47, 7  ;;  %599 = vst [vmem:[#allocation2 + $0x60] sm:$0xf] %v598_v53  ;;  %v517_v58 = vrot.slane %v513_v46, 4  ;;  %614 = sbr.rel (%p6210_p13) target bundleno = 76 (0x4c), region = 52  ;;  %v7283_v8 = vmov (!%p6210_p13), 0  }
  0x45   : > { %v508_v56 = vsel %vm7496_vm8, %v500_v44, %v507_v50  ;;  %v602_v57 = vsel %vm7406_vm2, %v509_v51, %v601_v45  ;;  %v615_v4 = vld [vmem:[#allocation2] sm:$0xf] (!%p6210_p13)  ;;  %v619_v5 = vld [vmem:[#allocation2 + $0x8] sm:$0x1] (!%p6210_p13)  ;;  %618 = vst.msk [vmem:[#allocation2 + $0x4] sm:$0xf] (!%p6210_p13), %vm552_vm5, %v7283_v8 }
  0x46   : > { %600 = vst.msk [vmem:[#allocation2 + $0x64] sm:$0xf] %vm552_vm5, %v508_v56  ;;  %603 = vst [vmem:[#allocation2 + $0x68] sm:$0x1] %v602_v57  ;;  %v605_v61 = vsel %vm7489_vm7, %v516_v54, %v604_v52  ;;  %v526_v62 = vrot.slane %v521_v55, 4  ;;  %v524_v63 = vor.u32 %v522_v59, %v521_v55  ;;  %v616_v6 = vsel (!%p6210_p13), %vm7489_vm7, 0, %v615_v4 }
  0x47   : > { %606 = vst [vmem:[#allocation2 + $0x6c] sm:$0xf] %v605_v61  ;;  %625 = vst.msk [vmem:[#allocation2 + $0x10] sm:$0xf] (!%p6210_p13), %vm552_vm5, %v7283_v8  ;;  %v620_v9 = vsel (!%p6210_p13), %vm7406_vm2, 0, %v619_v5 }
  0x48   : > { %v609_v0 = vsel %vm7406_vm2, %v526_v62, %v608_v60  ;;  %v525_v3 = vsel %vm7496_vm8, %v517_v58, %v524_v63  ;;  %v622_v10 = vld [vmem:[#allocation2 + $0xc] sm:$0xf] (!%p6210_p13)  ;;  %v626_v12 = vld [vmem:[#allocation2 + $0x14] sm:$0x1] (!%p6210_p13)  ;;  %617 = vst [vmem:[#allocation2] sm:$0xf] (!%p6210_p13), %v616_v6 }
  0x49   : > { %610 = vst [vmem:[#allocation2 + $0x74] sm:$0x1] %v609_v0  ;;  %607 = vst.msk [vmem:[#allocation2 + $0x70] sm:$0xf] %vm552_vm5, %v525_v3  ;;  %v623_v13 = vsel (!%p6210_p13), %vm7489_vm7, 0, %v622_v10  ;;  %v627_v14 = vsel (!%p6210_p13), %vm7406_vm2, 0, %v626_v12 }
  0x4a   : > { %621 = vst [vmem:[#allocation2 + $0x8] sm:$0x1] (!%p6210_p13), %v620_v9  ;;  %624 = vst [vmem:[#allocation2 + $0xc] sm:$0xf] (!%p6210_p13), %v623_v13 }
  0x4b   : > { %628 = vst [vmem:[#allocation2 + $0x14] sm:$0x1] %v627_v14 }
  0x4c PF: > { %p6211_p0 = scmp.le.s32.totalorder %s7265_s27, 0 }
  0x4d   : > { %s6212_s21 = sadd.s32 (!%p6211_p0), 4294967294, %s6207_s22 }
  0x4e   : > { %632 = sbr.rel (%p6211_p0) target bundleno = 91 (0x5b), region = 56  ;;  %s6563_s9 = sshll.u32 (!%p6211_p0), %s6212_s21, 3 }
  0x4f   : > { %s636_s10 = scalar_lea.vmem (!%p6211_p0), %s7477_s17, %s6563_s9 }
  0x50   : > { %v637_v15 = vld [vmem:[%s636_s10] sm:$0xf] (!%p6211_p0)  ;;  %v638_v16 = vld [vmem:[%s636_s10 + $0x4] sm:$0xf] (!%p6211_p0)  ;;  %v639_v17 = vld [vmem:[%s636_s10 + $0x8] sm:$0xf] (!%p6211_p0) }
  0x51   : > { %v642_v18 = vshrl.u32 (!%p6211_p0), %v637_v15, 16  ;;  %v645_v19 = vshll.u32 (!%p6211_p0), %v637_v15, 16  ;;  %v650_v20 = vshrl.u32 (!%p6211_p0), %v638_v16, 16  ;;  %v653_v21 = vshll.u32 (!%p6211_p0), %v638_v16, 16  ;;  %v640_v22 = vld [vmem:[%s636_s10 + $0xc] sm:$0xf] (!%p6211_p0) }
  0x52   : > { %v659_v23 = vshrl.u32 (!%p6211_p0), %v639_v17, 16  ;;  %v662_v24 = vshll.u32 (!%p6211_p0), %v639_v17, 16  ;;  %v667_v25 = vshrl.u32 (!%p6211_p0), %v640_v22, 16  ;;  %v670_v26 = vshll.u32 (!%p6211_p0), %v640_v22, 16  ;;  %v681_v29 = vld [vmem:[#allocation2] sm:$0xf] (!%p6211_p0) }
  0x53   : > { %v644_v27 = vrot.slane (!%p6211_p0), %v642_v18, 7  ;;  %v652_v28 = vrot.slane (!%p6211_p0), %v650_v20, 7  ;;  %v685_v30 = vld [vmem:[#allocation2 + $0x8] sm:$0x1] (!%p6211_p0)  ;;  %v688_v37 = vld [vmem:[#allocation2 + $0xc] sm:$0xf] (!%p6211_p0) }
  0x54   : > { %v661_v31 = vrot.slane (!%p6211_p0), %v659_v23, 7  ;;  %v669_v32 = vrot.slane (!%p6211_p0), %v667_v25, 7  ;;  %v692_v38 = vld [vmem:[#allocation2 + $0x14] sm:$0x1] (!%p6211_p0) }
  0x55   : > { %v647_v33 = vor.u32 %v645_v19, %v644_v27  ;;  %v648_v34 = vrot.slane %v644_v27, 4  ;;  %v655_v35 = vor.u32 %v653_v21, %v652_v28  ;;  %v657_v36 = vrot.slane %v652_v28, 4 }
  0x56   : > { %v664_v39 = vor.u32 %v662_v24, %v661_v31  ;;  %v665_v40 = vrot.slane %v661_v31, 4  ;;  %v672_v41 = vor.u32 %v670_v26, %v669_v32  ;;  %v674_v42 = vrot.slane %v669_v32, 4 }
  0x57   : > { %v682_v43 = vsel %vm7489_vm7, %v647_v33, %v681_v29  ;;  %v656_v44 = vsel %vm7496_vm8, %v648_v34, %v655_v35  ;;  %v686_v45 = vsel %vm7406_vm2, %v657_v36, %v685_v30 }
  0x58   : > { %683 = vst [vmem:[#allocation2] sm:$0xf] %v682_v43  ;;  %684 = vst.msk [vmem:[#allocation2 + $0x4] sm:$0xf] %vm552_vm5, %v656_v44  ;;  %v689_v46 = vsel %vm7489_vm7, %v664_v39, %v688_v37  ;;  %v673_v47 = vsel %vm7496_vm8, %v665_v40, %v672_v41  ;;  %v693_v48 = vsel %vm7406_vm2, %v674_v42, %v692_v38 }
  0x59   : > { %687 = vst [vmem:[#allocation2 + $0x8] sm:$0x1] %v686_v45  ;;  %690 = vst [vmem:[#allocation2 + $0xc] sm:$0xf] %v689_v46 }
  0x5a   : > { %691 = vst.msk [vmem:[#allocation2 + $0x10] sm:$0xf] %vm552_vm5, %v673_v47  ;;  %694 = vst [vmem:[#allocation2 + $0x14] sm:$0x1] %v693_v48 }
  0x5b PF: > { %p6215_p1 = scmp.ne.s32.totalorder %s7265_s27, 1 }
  0x5c   : > { %v700_v49 = vld [vmem:[#allocation2 + $0x78] sm:$0xf] (!%p6215_p1)  ;;  %v704_v50 = vld [vmem:[#allocation2 + $0x80] sm:$0x1] (!%p6215_p1)  ;;  %v7284_v52 = vmov (!%p6215_p1), 0  }
  0x5d   : > { %698 = sbr.rel (%p6215_p1) target bundleno = 100 (0x64), region = 60  ;;  %v701_v51 = vsel (!%p6215_p1), %vm7489_vm7, 0, %v700_v49  ;;  %703 = vst.msk [vmem:[#allocation2 + $0x7c] sm:$0xf] (!%p6215_p1), %vm552_vm5, %v7284_v52  ;;  %710 = vst.msk [vmem:[#allocation2 + $0x88] sm:$0xf] (!%p6215_p1), %vm552_vm5, %v7284_v52 }
  0x5e   : > { %v705_v53 = vsel (!%p6215_p1), %vm7406_vm2, 0, %v704_v50  ;;  %v707_v54 = vld [vmem:[#allocation2 + $0x84] sm:$0xf] (!%p6215_p1)  ;;  %v711_v55 = vld [vmem:[#allocation2 + $0x8c] sm:$0x1] (!%p6215_p1) }
  0x5f   : > { %702 = vst [vmem:[#allocation2 + $0x78] sm:$0xf] (!%p6215_p1), %v701_v51  ;;  %706 = vst [vmem:[#allocation2 + $0x80] sm:$0x1] (!%p6215_p1), %v705_v53  ;;  %v708_v56 = vsel (!%p6215_p1), %vm7489_vm7, 0, %v707_v54  ;;  %v712_v57 = vsel (!%p6215_p1), %vm7406_vm2, 0, %v711_v55 }
  0x60   : > { %709 = vst [vmem:[#allocation2 + $0x84] sm:$0xf] (!%p6215_p1), %v708_v56  ;;  %713 = vst [vmem:[#allocation2 + $0x8c] sm:$0x1] (!%p6215_p1), %v712_v57 }
  0x64 PF: > { %p6216_p2 = scmp.ge.s32.totalorder %s7265_s27, 1 }
  0x65   : > { %v6219_v58 = vld [vmem:[%s7480_s18 + $0x40] sm:$0xf] (!%p6216_p2)  ;;  %v6220_v59 = vld [vmem:[%s7480_s18 + $0x44] sm:$0xf] (!%p6216_p2)  ;;  %v6221_v0 = vld [vmem:[%s7480_s18 + $0x48] sm:$0xf] (!%p6216_p2) }
  0x66   : > { %717 = sbr.rel (%p6216_p2) target bundleno = 113 (0x71), region = 64  ;;  %v727_v60 = vshrl.u32 (!%p6216_p2), %v6219_v58, 16  ;;  %v730_v61 = vshll.u32 (!%p6216_p2), %v6219_v58, 16  ;;  %v735_v62 = vshrl.u32 (!%p6216_p2), %v6220_v59, 16  ;;  %v738_v63 = vshll.u32 (!%p6216_p2), %v6220_v59, 16 }
  0x67   : > { %v6222_v3 = vld [vmem:[%s7480_s18 + $0x4c] sm:$0xf] (!%p6216_p2)  ;;  %v767_v5 = vld [vmem:[#allocation2 + $0x78] sm:$0xf] (!%p6216_p2)  ;;  %v744_v8 = vshrl.u32 (!%p6216_p2), %v6221_v0, 16  ;;  %v747_v10 = vshll.u32 (!%p6216_p2), %v6221_v0, 16 }
  0x68   : > { %v729_v4 = vrot.slane (!%p6216_p2), %v727_v60, 7  ;;  %v737_v6 = vrot.slane (!%p6216_p2), %v735_v62, 7  ;;  %v771_v9 = vld [vmem:[#allocation2 + $0x80] sm:$0x1] (!%p6216_p2)  ;;  %v752_v12 = vshrl.u32 (!%p6216_p2), %v6222_v3, 16  ;;  %v755_v13 = vshll.u32 (!%p6216_p2), %v6222_v3, 16 }
  0x69   : > { %v746_v18 = vrot.slane (!%p6216_p2), %v744_v8, 7  ;;  %v774_v23 = vld [vmem:[#allocation2 + $0x84] sm:$0xf] (!%p6216_p2)  ;;  %v778_v24 = vld [vmem:[#allocation2 + $0x8c] sm:$0x1] (!%p6216_p2) }
  0x6a   : > { %v732_v14 = vor.u32 (!%p6216_p2), %v730_v61, %v729_v4  ;;  %v733_v15 = vrot.slane (!%p6216_p2), %v729_v4, 4  ;;  %v740_v16 = vor.u32 (!%p6216_p2), %v738_v63, %v737_v6  ;;  %v742_v17 = vrot.slane (!%p6216_p2), %v737_v6, 4 }
  0x6b   : > { %v754_v19 = vrot.slane (!%p6216_p2), %v752_v12, 7  ;;  %v749_v25 = vor.u32 (!%p6216_p2), %v747_v10, %v746_v18  ;;  %v750_v26 = vrot.slane (!%p6216_p2), %v746_v18, 4 }
  0x6c   : > { %v768_v20 = vsel (!%p6216_p2), %vm7489_vm7, %v732_v14, %v767_v5  ;;  %v741_v21 = vsel (!%p6216_p2), %vm7496_vm8, %v733_v15, %v740_v16  ;;  %v772_v22 = vsel (!%p6216_p2), %vm7406_vm2, %v742_v17, %v771_v9 }
  0x6d   : > { %769 = vst [vmem:[#allocation2 + $0x78] sm:$0xf] %v768_v20  ;;  %770 = vst.msk [vmem:[#allocation2 + $0x7c] sm:$0xf] %vm552_vm5, %v741_v21  ;;  %v757_v27 = vor.u32 %v755_v13, %v754_v19  ;;  %v759_v28 = vrot.slane %v754_v19, 4  ;;  %v775_v29 = vsel %vm7489_vm7, %v749_v25, %v774_v23 }
  0x6e   : > { %773 = vst [vmem:[#allocation2 + $0x80] sm:$0x1] %v772_v22  ;;  %776 = vst [vmem:[#allocation2 + $0x84] sm:$0xf] %v775_v29 }
  0x6f   : > { %v758_v30 = vsel %vm7496_vm8, %v750_v26, %v757_v27  ;;  %v779_v31 = vsel %vm7406_vm2, %v759_v28, %v778_v24 }
  0x70   : > { %777 = vst.msk [vmem:[#allocation2 + $0x88] sm:$0xf] %vm552_vm5, %v758_v30  ;;  %780 = vst [vmem:[#allocation2 + $0x8c] sm:$0x1] %v779_v31 }
  0x71 PF: > { %v7061_v32 = vld [vmem:[#allocation2 + $0xc] sm:$0xff]   ;;  %v7062_v33 = vld [vmem:[#allocation2 + $0x18] sm:$0xff]   ;;  %s7285_s22 = smov 64   ;;  %v872_v34 = vld [vmem:[#allocation2] sm:$0xf]  ;;  %vm1276_vm12 = vcmask 1042432  }
  0x72   : > { %1470 = vrot.lane.b32.xlu0 %v7061_v32, %s7285_s22  ;;  %v873_v35 = vld [vmem:[#allocation2 + $0x4] sm:$0xf]  ;;  %v874_v36 = vld [vmem:[#allocation2 + $0x8] sm:$0x1]  ;;  %1472 = vrot.lane.b32.xlu1 %v7062_v33, %s7285_s22  ;;  %vm902_vm9 = vsmask.f32 3328 }
  0x73   : > { %vm903_vm10 = vsmask.f32 7440  ;;  %v906_v37 = vshrl.u32 %v872_v34, 16  ;;  %v909_v38 = vshll.u32 %v872_v34, 16  ;;  %v915_v39 = vshll.u32 %v873_v35, 16  ;;  %v7063_v25 = vld [vmem:[#allocation2 + $0x24] sm:$0xff]  }
  0x74   : > { %v919_v40 = vshrl.u32 %v873_v35, 16  ;;  %v925_v41 = vshll.u32 %v874_v36, 16  ;;  %v875_v42 = vld [vmem:[#allocation2 + $0xc] sm:$0xf]  ;;  %v876_v45 = vld [vmem:[#allocation2 + $0x10] sm:$0xf]  ;;  %vm7636_vm11 = vmor %vm902_vm9, %vm903_vm10 }
  0x75   : > { %v908_v43 = vrot.slane %v906_v37, 4  ;;  %v911_v44 = vrot.slane %v909_v38, 5  ;;  %v877_v46 = vld [vmem:[#allocation2 + $0x14] sm:$0x1]  ;;  %v917_v47 = vrot.slane %v915_v39, 5  ;;  %v930_v50 = vshrl.u32 %v875_v42, 16 }
  0x76   : > { %v921_v48 = vrot.slane %v919_v40, 4  ;;  %v927_v49 = vrot.slane %v925_v41, 5  ;;  %v933_v52 = vshll.u32 %v875_v42, 16  ;;  %v939_v53 = vshll.u32 %v876_v45, 16  ;;  %v878_v59 = vld [vmem:[#allocation2 + $0x18] sm:$0xf] }
  0x77   : > { %v912_v51 = vor.u32 %v911_v44, %v908_v43  ;;  %v943_v54 = vshrl.u32 %v876_v45, 16  ;;  %v932_v57 = vrot.slane %v930_v50, 4  ;;  %v949_v58 = vshll.u32 %v877_v46, 16  ;;  %v879_v60 = vld [vmem:[#allocation2 + $0x1c] sm:$0xf] }
  0x78   : > { %v922_v56 = vor.u32 %v921_v48, %v917_v47  ;;  %v935_v62 = vrot.slane %v933_v52, 5  ;;  %v941_v63 = vrot.slane %v939_v53, 5  ;;  %v880_v3 = vld [vmem:[#allocation2 + $0x20] sm:$0x1]  ;;  %v954_v6 = vshrl.u32 %v878_v59, 16 }
  0x79   : > { %v913_v61 = vrot.slane %v912_v51, 4  ;;  %v945_v0 = vrot.slane %v943_v54, 4  ;;  %v951_v5 = vrot.slane %v949_v58, 5  ;;  %v957_v8 = vshll.u32 %v878_v59, 16  ;;  %v881_v14 = vld [vmem:[#allocation2 + $0x24] sm:$0xf] }
  0x7a   : > { %v923_v4 = vrot.slane %v922_v56, 4  ;;  %v936_v10 = vor.u32 %v935_v62, %v932_v57  ;;  %v963_v13 = vshll.u32 %v879_v60, 16  ;;  %v956_v16 = vrot.slane %v954_v6, 4  ;;  %v882_v19 = vld [vmem:[#allocation2 + $0x28] sm:$0xf] }
  0x7b   : > { %v918_v9 = vsel %vm7636_vm11, %v913_v61, %v917_v47  ;;  %v946_v12 = vor.u32 %v945_v0, %v941_v63  ;;  %v959_v17 = vrot.slane %v957_v8, 5  ;;  %v967_v18 = vshrl.u32 %v879_v60, 16  ;;  %v883_v24 = vld [vmem:[#allocation2 + $0x2c] sm:$0x1]  ;;  %v884_v34 = vld [vmem:[#allocation2 + $0x30] sm:$0xf] }
  0x7c   : > { %v928_v15 = vsel %vm7636_vm11, %v923_v4, %v927_v49  ;;  %v937_v21 = vrot.slane %v936_v10, 4  ;;  %v965_v23 = vrot.slane %v963_v13, 5  ;;  %v973_v28 = vshll.u32 %v880_v3, 16  ;;  %v885_v39 = vld [vmem:[#allocation2 + $0x34] sm:$0xf]  ;;  %v7071_v60 = vld [vmem:[%s9006_s1 + $0x40] sm:$0xff]  }
  0x7d   : > { %v6233_v20 = vcombine.low %v918_v9, %v928_v15  ;;  %v947_v22 = vrot.slane %v946_v12, 4  ;;  %v960_v26 = vor.u32 %v959_v17, %v956_v16  ;;  %v969_v27 = vrot.slane %v967_v18, 4  ;;  %v886_v47 = vld [vmem:[#allocation2 + $0x38] sm:$0x1]  ;;  %v7064_v49 = vld [vmem:[#allocation2 + $0x30] sm:$0xff]   ;;  %v7065_v0 = vld [vmem:[#allocation2 + $0x3c] sm:$0xff]   ;;  %6624 = vmatprep.subr.bf16.mxu0 %v7071_v60 }
  0x7e   : > { %v978_v29 = vshrl.u32 %v881_v14, 16  ;;  %v942_v30 = vsel %vm7636_vm11, %v937_v21, %v941_v63  ;;  %v981_v32 = vshll.u32 %v881_v14, 16  ;;  %v987_v33 = vshll.u32 %v882_v19, 16  ;;  %v2120_v54 = vld [vmem:[#allocation2 + $0x18] sm:$0xf]  ;;  %v7072_v21 = vld [vmem:[%s9006_s1] sm:$0xff]  }
  0x7f   : > { %1175 = vrot.lane.b32.xlu0 %v6233_v20, %s7285_s22  ;;  %v952_v31 = vsel %vm7636_vm11, %v947_v22, %v951_v5  ;;  %v961_v36 = vrot.slane %v960_v26, 4  ;;  %v970_v37 = vor.u32 %v969_v27, %v965_v23  ;;  %v975_v38 = vrot.slane %v973_v28, 5  ;;  %v2121_v4 = vld [vmem:[#allocation2 + $0x1c] sm:$0xf]  ;;  %v2122_v14 = vld [vmem:[#allocation2 + $0x20] sm:$0x1]  ;;  %6625 = vmatpush3.bf16.msra.mxu0 %v7072_v21 }
  0x80   : > { %v6234_v35 = vcombine.low %v942_v30, %v952_v31  ;;  %v980_v40 = vrot.slane %v978_v29, 4  ;;  %v983_v41 = vrot.slane %v981_v32, 5  ;;  %v989_v42 = vrot.slane %v987_v33, 5  ;;  %v1830_v20 = vld [vmem:[#allocation2 + $0xc] sm:$0xe] }
  0x81   : > { %v991_v43 = vshrl.u32 %v882_v19, 16  ;;  %v966_v44 = vsel %vm7636_vm11, %v961_v36, %v965_v23  ;;  %v971_v45 = vrot.slane %v970_v37, 4  ;;  %v997_v46 = vshll.u32 %v883_v24, 16  ;;  %v1831_v26 = vld [vmem:[#allocation2 + $0x10] sm:$0xf]  ;;  %v7073_v27 = vld [vmem:[%s9006_s1 + $0x48] sm:$0xff]  }
  0x82   : > { %1177 = vrot.lane.b32.xlu1 %v6234_v35, %s7285_s22  ;;  %v1002_v48 = vshrl.u32 %v884_v34, 16  ;;  %v984_v50 = vor.u32 %v983_v41, %v980_v40  ;;  %v1005_v52 = vshll.u32 %v884_v34, 16  ;;  %v1011_v53 = vshll.u32 %v885_v39, 16  ;;  %v1832_v32 = vld [vmem:[#allocation2 + $0x14] sm:$0x1]  ;;  %v7074_v33 = vld [vmem:[%s9006_s1 + $0x8] sm:$0xff]   ;;  %6626 = vmatprep.subr.bf16.mxu0 %v7073_v27 }
  0x83   : > { %1474 = vrot.lane.b32.xlu0 %v7063_v25, %s7285_s22  ;;  %v993_v51 = vrot.slane %v991_v43, 4  ;;  %v976_v56 = vsel %vm7636_vm11, %v971_v45, %v975_v38  ;;  %v999_v57 = vrot.slane %v997_v46, 5  ;;  %v1015_v59 = vshrl.u32 %v885_v39, 16  ;;  %v887_v37 = vld [vmem:[#allocation2 + $0x3c] sm:$0xf]  ;;  %6627 = vmatpush3.bf16.msra.mxu0 %v7074_v33 }
  0x84   : > { %v1004_v58 = vrot.slane %v1002_v48, 4  ;;  %v6235_v61 = vcombine.low %v966_v44, %v976_v56  ;;  %v985_v62 = vrot.slane %v984_v50, 4  ;;  %v1007_v3 = vrot.slane %v1005_v52, 5  ;;  %v888_v43 = vld [vmem:[#allocation2 + $0x40] sm:$0xf]  ;;  %v7075_v44 = vld [vmem:[%s9006_s1 + $0x50] sm:$0xff]  }
  0x85   : > { %v994_v63 = vor.u32 %v993_v51, %v989_v42  ;;  %v1013_v5 = vrot.slane %v1011_v53, 5  ;;  %v1017_v6 = vrot.slane %v1015_v59, 4  ;;  %v1021_v8 = vshll.u32 %v886_v47, 16  ;;  %v2123_v50 = vld [vmem:[#allocation2 + $0x24] sm:$0xf]  ;;  %v7076_v56 = vld [vmem:[%s9006_s1 + $0x10] sm:$0xff]   ;;  %6628 = vmatprep.subr.bf16.mxu0 %v7075_v44 }
  0x86   : > { %v2151_v9 = vshrl.u32 %v2120_v54, 16  ;;  %1179 = vrot.lane.b32.xlu1 %v6235_v61, %s7285_s22  ;;  %v990_v10 = vsel %vm7636_vm11, %v985_v62, %v989_v42  ;;  %v1008_v13 = vor.u32 %v1007_v3, %v1004_v58  ;;  %v2154_v15 = vshll.u32 %v2120_v54, 16  ;;  %v7077_v61 = vld [vmem:[%s9006_s1 + $0x58] sm:$0xff]  }
  0x87   : > { %1476 = vrot.lane.b32.xlu0 %v7064_v49, %s7285_s22  ;;  %v995_v12 = vrot.slane %v994_v63, 4  ;;  %v1018_v16 = vor.u32 %v1017_v6, %v1013_v5  ;;  %v1023_v17 = vrot.slane %v1021_v8, 5  ;;  %v2160_v19 = vshll.u32 %v2121_v4, 16  ;;  %v889_v49 = vld [vmem:[#allocation2 + $0x44] sm:$0x1]  ;;  %6629 = vmatpush3.bf16.msra.mxu0 %v7076_v56 }
  0x88   : > { %v2153_v18 = vrot.slane %v2151_v9, 4  ;;  %v1009_v23 = vrot.slane %v1008_v13, 4  ;;  %v2156_v24 = vrot.slane %v2154_v15, 5  ;;  %v2164_v25 = vshrl.u32 %v2121_v4, 16  ;;  %v2124_v4 = vld [vmem:[#allocation2 + $0x28] sm:$0xf]  ;;  %6630 = vmatprep.subr.bf16.mxu0 %v7077_v61 }
  0x89   : > { %v1000_v22 = vsel %vm7636_vm11, %v995_v12, %v999_v57  ;;  %v1019_v29 = vrot.slane %v1018_v16, 4  ;;  %v2162_v30 = vrot.slane %v2160_v19, 5  ;;  %v2170_v31 = vshll.u32 %v2122_v14, 16  ;;  %v1833_v12 = vld [vmem:[#allocation2 + $0x18] sm:$0xe]  ;;  %v7066_v14 = vld [vmem:[#allocation2 + $0x48] sm:$0xff]  }
  0x8a   : > { %v6236_v28 = vcombine.low %v990_v10, %v1000_v22  ;;  %v1014_v34 = vsel %vm7636_vm11, %v1009_v23, %v1013_v5  ;;  %v2157_v35 = vor.u32 %v2156_v24, %v2153_v18  ;;  %v2166_v36 = vrot.slane %v2164_v25, 4  ;;  %v2125_v10 = vld [vmem:[#allocation2 + $0x2c] sm:$0x1]  ;;  %v1834_v18 = vld [vmem:[#allocation2 + $0x1c] sm:$0xf]  ;;  %v7079_v25 = vld [vmem:[%s9006_s1 + $0x60] sm:$0xff]  }
  0x8b   : > { %1478 = vrot.lane.b32.xlu0 %v7065_v0, %s7285_s22  ;;  %vm1277_vm13 = vcmask 1046532   ;;  %v1024_v38 = vsel %vm7636_vm11, %v1019_v29, %v1023_v17  ;;  %v2172_v39 = vrot.slane %v2170_v31, 5  ;;  %v6283_v41 = vrot.slane %v1830_v20, 9  ;;  %v7078_v19 = vld [vmem:[%s9006_s1 + $0x18] sm:$0xff]   ;;  %v1835_v24 = vld [vmem:[#allocation2 + $0x20] sm:$0x1] }
  0x8c   : > { %1181 = vrot.lane.b32.xlu1 %v6236_v28, %s7285_s22  ;;  %vm7680_vm14 = vmor %vm1276_vm12, %vm1277_vm13  ;;  %v1892_v42 = vrot.slane %v1831_v26, 5  ;;  %v6237_v45 = vcombine.low %v1014_v34, %v1024_v38  ;;  %v2158_v46 = vrot.slane %v2157_v35, 4  ;;  %v2167_v47 = vor.u32 %v2166_v36, %v2162_v30  ;;  %v891_v35 = vld [vmem:[#allocation2 + $0x4c] sm:$0xf]  ;;  %6631 = vmatpush3.bf16.msra.mxu0 %v7078_v19 }
  0x8d   : > { %v1895_v48 = vrot.slane %v1832_v32, 5  ;;  %v1026_v53 = vshrl.u32 %v887_v37, 16  ;;  %v1029_v54 = vshll.u32 %v887_v37, 16  ;;  %v1035_v59 = vshll.u32 %v888_v43, 16  ;;  %6632 = vmatprep.subr.bf16.mxu0 %v7079_v25 }
  0x8e   : > { %v1893_v51 = vsel %vm7680_vm14, %v6283_v41, %v1892_v42  ;;  %v1894_v52 = vrot.slane %v1892_v42, 4  ;;  %v2163_v57 = vsel %vm7636_vm11, %v2158_v46, %v2162_v30  ;;  %v2168_v58 = vrot.slane %v2167_v47, 4  ;;  %v890_v30 = vld [vmem:[#allocation2 + $0x48] sm:$0xf]  ;;  %v892_v41 = vld [vmem:[#allocation2 + $0x50] sm:$0x1] }
  0x8f   : > { %v1039_v60 = vshrl.u32 %v888_v43, 16  ;;  %v1028_v63 = vrot.slane %v1026_v53, 4  ;;  %v1031_v0 = vrot.slane %v1029_v54, 5  ;;  %v1045_v3 = vshll.u32 %v889_v49, 16  ;;  %v7080_v42 = vld [vmem:[%s9006_s1 + $0x20] sm:$0xff]  }
  0x90   : > { %1183 = vrot.lane.b32.xlu1 %v6237_v45, %s7285_s22  ;;  %v1896_v62 = vsel %vm7680_vm14, %v1894_v52, %v1895_v48  ;;  %v2173_v5 = vsel %vm7636_vm11, %v2168_v58, %v2172_v39  ;;  %v1037_v8 = vrot.slane %v1035_v59, 5  ;;  %v2175_v17 = vshrl.u32 %v2123_v50, 16  ;;  %v7081_v47 = vld [vmem:[%s9006_s1 + $0xc0] sm:$0xff]   ;;  %6633 = vmatpush3.bf16.msra.mxu0 %v7080_v42 }
  0x91   : > { %v6293_v6 = vcombine.low %v1893_v51, %v1896_v62  ;;  %v1041_v9 = vrot.slane %v1039_v60, 4  ;;  %v6313_v13 = vcombine.low %v2163_v57, %v2173_v5  ;;  %v1032_v15 = vor.u32 %v1031_v0, %v1028_v63  ;;  %v2126_v57 = vld [vmem:[#allocation2 + $0x30] sm:$0xf]  ;;  %6700 = vmatprep.subr.bf16.mxu1 %v7081_v47  ;;  %v2127_v62 = vld [vmem:[#allocation2 + $0x34] sm:$0xf]  ;;  %v7082_v63 = vld [vmem:[%s9006_s1 + $0x80] sm:$0xff]  }
  0x92   : > { %v1047_v16 = vrot.slane %v1045_v3, 5  ;;  %v2178_v21 = vshll.u32 %v2123_v50, 16  ;;  %v2184_v22 = vshll.u32 %v2124_v4, 16  ;;  %v2188_v23 = vshrl.u32 %v2124_v4, 16  ;;  %6701 = vmatpush3.bf16.msra.mxu1 %v7082_v63 }
  0x93   : > { %v1042_v20 = vor.u32 %v1041_v9, %v1037_v8  ;;  %2420 = vrot.lane.b32.xlu0 %v6313_v13, %s7285_s22  ;;  %v1033_v26 = vrot.slane %v1032_v15, 4  ;;  %v2177_v27 = vrot.slane %v2175_v17, 4  ;;  %v2194_v28 = vshll.u32 %v2125_v10, 16  ;;  %v7083_v9 = vld [vmem:[%s9006_s1 + $0x68] sm:$0xff]  }
  0x94   : > { %1990 = vrot.lane.b32.xlu1 %v6293_v6, %s7285_s22  ;;  %v6284_v29 = vrot.slane %v1833_v12, 9  ;;  %v2180_v32 = vrot.slane %v2178_v21, 5  ;;  %v2186_v33 = vrot.slane %v2184_v22, 5  ;;  %v2190_v34 = vrot.slane %v2188_v23, 4  ;;  %v2128_v6 = vld [vmem:[#allocation2 + $0x38] sm:$0x1]  ;;  %6634 = vmatprep.subr.bf16.mxu0 %v7083_v9 }
  0x95   : > { %v1043_v31 = vrot.slane %v1042_v20, 4  ;;  %v1038_v36 = vsel %vm7636_vm11, %v1033_v26, %v1037_v8  ;;  %v2196_v37 = vrot.slane %v2194_v28, 5  ;;  %v1899_v38 = vrot.slane %v1834_v18, 5  ;;  %v1836_v8 = vld [vmem:[#allocation2 + $0x24] sm:$0xe]  ;;  %v7067_v12 = vld [vmem:[#allocation2 + $0x54] sm:$0xff]  }
  0x96   : > { %v1902_v39 = vrot.slane %v1835_v24, 5  ;;  %v2181_v44 = vor.u32 %v2180_v32, %v2177_v27  ;;  %v2191_v45 = vor.u32 %v2190_v34, %v2186_v33  ;;  %v1050_v46 = vshrl.u32 %v890_v30, 16  ;;  %v1838_v17 = vld [vmem:[#allocation2 + $0x2c] sm:$0x1]  ;;  %v893_v22 = vld [vmem:[#allocation2 + $0x54] sm:$0xf] }
  0x97   : > { %v1048_v43 = vsel %vm7636_vm11, %v1043_v31, %v1047_v16  ;;  %1480 = vrot.lane.b32.xlu0 %v7066_v14, %s7285_s22  ;;  %v1900_v49 = vsel %vm7680_vm14, %v6284_v29, %v1899_v38  ;;  %v1901_v50 = vrot.slane %v1899_v38, 4  ;;  %v1053_v51 = vshll.u32 %v890_v30, 16  ;;  %v1837_v16 = vld [vmem:[#allocation2 + $0x28] sm:$0xf] }
  0x98   : > { %v6238_v48 = vcombine.low %v1038_v36, %v1048_v43  ;;  %v2182_v52 = vrot.slane %v2181_v44, 4  ;;  %v2192_v53 = vrot.slane %v2191_v45, 4  ;;  %v1052_v54 = vrot.slane %v1050_v46, 4  ;;  %v7084_v27 = vld [vmem:[%s9006_s1 + $0x28] sm:$0xff]   ;;  %v895_v46 = vld [vmem:[#allocation2 + $0x5c] sm:$0x1] }
  0x99   : > { %v1059_v56 = vshll.u32 %v891_v35, 16  ;;  %v1903_v58 = vsel %vm7680_vm14, %v1901_v50, %v1902_v39  ;;  %v1055_v59 = vrot.slane %v1053_v51, 5  ;;  %v1063_v60 = vshrl.u32 %v891_v35, 16  ;;  %6635 = vmatpush3.bf16.msra.mxu0 %v7084_v27  ;;  %v7085_v36 = vld [vmem:[%s9006_s1 + $0xc8] sm:$0xff]  }
  0x9a   : > { %1185 = vrot.lane.b32.xlu1 %v6238_v48, %s7285_s22  ;;  %v1069_v61 = vshll.u32 %v892_v41, 16  ;;  %v2187_v0 = vsel %vm7636_vm11, %v2182_v52, %v2186_v33  ;;  %v2197_v3 = vsel %vm7636_vm11, %v2192_v53, %v2196_v37  ;;  %v6294_v4 = vcombine.low %v1900_v49, %v1903_v58  ;;  %v894_v41 = vld [vmem:[#allocation2 + $0x58] sm:$0xf]  ;;  %6702 = vmatprep.subr.bf16.mxu1 %v7085_v36  ;;  %v2129_v52 = vld [vmem:[#allocation2 + $0x3c] sm:$0xf]  ;;  %v7086_v53 = vld [vmem:[%s9006_s1 + $0x88] sm:$0xff]  }
  0x9b   : > { %v1061_v5 = vrot.slane %v1059_v56, 5  ;;  %v6314_v10 = vcombine.low %v2187_v0, %v2197_v3  ;;  %v1056_v13 = vor.u32 %v1055_v59, %v1052_v54  ;;  %v1065_v14 = vrot.slane %v1063_v60, 4  ;;  %v2130_v59 = vld [vmem:[#allocation2 + $0x40] sm:$0xf]  ;;  %v7087_v60 = vld [vmem:[%s9006_s1 + $0x70] sm:$0xff]   ;;  %6703 = vmatpush3.bf16.msra.mxu1 %v7086_v53 }
  0x9c   : > { %v1071_v15 = vrot.slane %v1069_v61, 5  ;;  %v2199_v18 = vshrl.u32 %v2126_v57, 16  ;;  %v2202_v19 = vshll.u32 %v2126_v57, 16  ;;  %v2208_v20 = vshll.u32 %v2127_v62, 16  ;;  %v2131_v3 = vld [vmem:[#allocation2 + $0x44] sm:$0x1]  ;;  %6636 = vmatprep.subr.bf16.mxu0 %v7087_v60 }
  0x9d   : > { %v2212_v21 = vshrl.u32 %v2127_v62, 16  ;;  %2422 = vrot.lane.b32.xlu0 %v6314_v10, %s7285_s22  ;;  %v1057_v23 = vrot.slane %v1056_v13, 4  ;;  %v1066_v24 = vor.u32 %v1065_v14, %v1061_v5  ;;  %v2218_v25 = vshll.u32 %v2128_v6, 16  ;;  %v7068_v6 = vld [vmem:[#allocation2 + $0x60] sm:$0xff]  }
  0x9e   : > { %1992 = vrot.lane.b32.xlu1 %v6294_v4, %s7285_s22  ;;  %v6285_v26 = vrot.slane %v1836_v8, 9  ;;  %v2201_v28 = vrot.slane %v2199_v18, 4  ;;  %v2204_v29 = vrot.slane %v2202_v19, 5  ;;  %v2210_v30 = vrot.slane %v2208_v20, 5  ;;  %v1839_v4 = vld [vmem:[#allocation2 + $0x30] sm:$0xe] }
  0x9f   : > { %v2214_v31 = vrot.slane %v2212_v21, 4  ;;  %v1062_v32 = vsel %vm7636_vm11, %v1057_v23, %v1061_v5  ;;  %v1067_v33 = vrot.slane %v1066_v24, 4  ;;  %v2220_v34 = vrot.slane %v2218_v25, 5  ;;  %v7089_v23 = vld [vmem:[%s9006_s1 + $0x30] sm:$0xff]  }
  0xa0   : > { %v1906_v35 = vrot.slane %v1837_v16, 5  ;;  %v2205_v37 = vor.u32 %v2204_v29, %v2201_v28  ;;  %v1909_v39 = vrot.slane %v1838_v17, 5  ;;  %v1074_v42 = vshrl.u32 %v893_v22, 16  ;;  %v1841_v17 = vld [vmem:[#allocation2 + $0x38] sm:$0x1]  ;;  %6637 = vmatpush3.bf16.msra.mxu0 %v7089_v23 }
  0xa1   : > { %v2215_v38 = vor.u32 %v2214_v31, %v2210_v30  ;;  %1482 = vrot.lane.b32.xlu0 %v7067_v12, %s7285_s22  ;;  %v1072_v43 = vsel %vm7636_vm11, %v1067_v33, %v1071_v15  ;;  %v1077_v47 = vshll.u32 %v893_v22, 16  ;;  %v1083_v57 = vshll.u32 %v894_v41, 16  ;;  %v1840_v12 = vld [vmem:[#allocation2 + $0x34] sm:$0xf]  ;;  %v896_v22 = vld [vmem:[#allocation2 + $0x60] sm:$0xf] }
  0xa2   : > { %v1907_v44 = vsel %vm7680_vm14, %v6285_v26, %v1906_v35  ;;  %v1908_v45 = vrot.slane %v1906_v35, 4  ;;  %v6239_v48 = vcombine.low %v1062_v32, %v1072_v43  ;;  %v2206_v49 = vrot.slane %v2205_v37, 4  ;;  %v897_v28 = vld [vmem:[#allocation2 + $0x64] sm:$0xf]  ;;  %v7091_v37 = vld [vmem:[%s9006_s1 + $0xd0] sm:$0xff]   ;;  %v7094_v23 = vld [vmem:[%s9006_s1 + $0x38] sm:$0xff]  }
  0xa3   : > { %v2216_v50 = vrot.slane %v2215_v38, 4  ;;  %v1076_v51 = vrot.slane %v1074_v42, 4  ;;  %v1079_v56 = vrot.slane %v1077_v47, 5  ;;  %v1087_v58 = vshrl.u32 %v894_v41, 16  ;;  %v898_v41 = vld [vmem:[#allocation2 + $0x68] sm:$0x1]  ;;  %6704 = vmatprep.subr.bf16.mxu1 %v7091_v37 }
  0xa4   : > { %v1910_v54 = vsel %vm7680_vm14, %v1908_v45, %v1909_v39  ;;  %1187 = vrot.lane.b32.xlu1 %v6239_v48, %s7285_s22  ;;  %v2211_v61 = vsel %vm7636_vm11, %v2206_v49, %v2210_v30  ;;  %v1093_v0 = vshll.u32 %v895_v46, 16  ;;  %v1085_v9 = vrot.slane %v1083_v57, 5  ;;  %v2132_v48 = vld [vmem:[#allocation2 + $0x48] sm:$0xf]  ;;  %v901_v37 = vld [vmem:[#allocation2 + $0x74] sm:$0x1] }
  0xa5   : > { %v2221_v62 = vsel %vm7636_vm11, %v2216_v50, %v2220_v34  ;;  %v6295_v63 = vcombine.low %v1907_v44, %v1910_v54  ;;  %v1080_v8 = vor.u32 %v1079_v56, %v1076_v51  ;;  %v1089_v10 = vrot.slane %v1087_v58, 4  ;;  %v2133_v58 = vld [vmem:[#allocation2 + $0x4c] sm:$0xf] }
  0xa6   : > { %v6315_v5 = vcombine.low %v2211_v61, %v2221_v62  ;;  %v1095_v13 = vrot.slane %v1093_v0, 5  ;;  %v2223_v14 = vshrl.u32 %v2129_v52, 16  ;;  %v2226_v15 = vshll.u32 %v2129_v52, 16  ;;  %v2134_v62 = vld [vmem:[#allocation2 + $0x50] sm:$0x1] }
  0xa7   : > { %v2232_v16 = vshll.u32 %v2130_v59, 16  ;;  %v1081_v18 = vrot.slane %v1080_v8, 4  ;;  %v1090_v19 = vor.u32 %v1089_v10, %v1085_v9  ;;  %v2236_v20 = vshrl.u32 %v2130_v59, 16  ;;  %v1842_v0 = vld [vmem:[#allocation2 + $0x3c] sm:$0xe] }
  0xa8   : > { %2424 = vrot.lane.b32.xlu0 %v6315_v5, %s7285_s22  ;;  %v2242_v21 = vshll.u32 %v2131_v3, 16  ;;  %1994 = vrot.lane.b32.xlu1 %v6295_v63, %s7285_s22  ;;  %v2225_v24 = vrot.slane %v2223_v14, 4  ;;  %v2228_v25 = vrot.slane %v2226_v15, 5  ;;  %v6286_v27 = vrot.slane %v1839_v4, 9  ;;  %v7092_v3 = vld [vmem:[%s9006_s1 + $0x90] sm:$0xff]  }
  0xa9   : > { %v2234_v26 = vrot.slane %v2232_v16, 5  ;;  %v1086_v29 = vsel %vm7636_vm11, %v1081_v18, %v1085_v9  ;;  %v1091_v30 = vrot.slane %v1090_v19, 4  ;;  %v2238_v31 = vrot.slane %v2236_v20, 4  ;;  %v7069_v5 = vld [vmem:[#allocation2 + $0x6c] sm:$0xff]   ;;  %v1843_v10 = vld [vmem:[#allocation2 + $0x40] sm:$0xf]  ;;  %6705 = vmatpush3.bf16.msra.mxu1 %v7092_v3 }
  0xaa   : > { %v2244_v32 = vrot.slane %v2242_v21, 5  ;;  %v2229_v33 = vor.u32 %v2228_v25, %v2225_v24  ;;  %v1913_v34 = vrot.slane %v1840_v12, 5  ;;  %v1916_v35 = vrot.slane %v1841_v17, 5  ;;  %v7093_v12 = vld [vmem:[%s9006_s1 + $0x78] sm:$0xff]   ;;  %v1844_v17 = vld [vmem:[#allocation2 + $0x44] sm:$0x1] }
  0xab   : > { %v1098_v36 = vshrl.u32 %v896_v22, 16  ;;  %v1096_v38 = vsel %vm7636_vm11, %v1091_v30, %v1095_v13  ;;  %v2239_v39 = vor.u32 %v2238_v31, %v2234_v26  ;;  %v1101_v42 = vshll.u32 %v896_v22, 16  ;;  %v899_v22 = vld [vmem:[#allocation2 + $0x6c] sm:$0xf]  ;;  %6638 = vmatprep.subr.bf16.mxu0 %v7093_v12 }
  0xac   : > { %1484 = vrot.lane.b32.xlu0 %v7068_v6, %s7285_s22  ;;  %v1107_v43 = vshll.u32 %v897_v28, 16  ;;  %v6240_v44 = vcombine.low %v1086_v29, %v1096_v38  ;;  %v2230_v45 = vrot.slane %v2229_v33, 4  ;;  %v1914_v46 = vsel %vm7680_vm14, %v6286_v27, %v1913_v34  ;;  %6639 = vmatpush3.bf16.msra.mxu0 %v7094_v23  ;;  %v7096_v33 = vld [vmem:[%s9006_s1 + $0xd8] sm:$0xff]   ;;  %v2139_v23 = vld [vmem:[#allocation2 + $0x64] sm:$0xf] }
  0xad   : > { %v1915_v47 = vrot.slane %v1913_v34, 4  ;;  %v2240_v49 = vrot.slane %v2239_v39, 4  ;;  %v1100_v50 = vrot.slane %v1098_v36, 4  ;;  %v1103_v51 = vrot.slane %v1101_v42, 5  ;;  %6706 = vmatprep.subr.bf16.mxu1 %v7096_v33  ;;  %v1848_v33 = vld [vmem:[#allocation2 + $0x54] sm:$0xe] }
  0xae   : > { %v1109_v52 = vrot.slane %v1107_v43, 5  ;;  %1189 = vrot.lane.b32.xlu1 %v6240_v44, %s7285_s22  ;;  %v2235_v53 = vsel %vm7636_vm11, %v2230_v45, %v2234_v26  ;;  %v1111_v56 = vshrl.u32 %v897_v28, 16  ;;  %v1117_v57 = vshll.u32 %v898_v41, 16  ;;  %v900_v28 = vld [vmem:[#allocation2 + $0x70] sm:$0xf]  ;;  %v7097_v45 = vld [vmem:[%s9006_s1 + $0x98] sm:$0xff]  }
  0xaf   : > { %v1917_v54 = vsel %vm7680_vm14, %v1915_v47, %v1916_v35  ;;  %v2245_v59 = vsel %vm7636_vm11, %v2240_v49, %v2244_v32  ;;  %v1104_v61 = vor.u32 %v1103_v51, %v1100_v50  ;;  %v2247_v63 = vshrl.u32 %v2132_v48, 16  ;;  %v2135_v44 = vld [vmem:[#allocation2 + $0x54] sm:$0xf]  ;;  %v2136_v50 = vld [vmem:[#allocation2 + $0x58] sm:$0xf]  ;;  %6707 = vmatpush3.bf16.msra.mxu1 %v7097_v45 }
  0xb0   : > { %v6296_v60 = vcombine.low %v1914_v46, %v1917_v54  ;;  %v6316_v4 = vcombine.low %v2235_v53, %v2245_v59  ;;  %v1113_v6 = vrot.slane %v1111_v56, 4  ;;  %v1119_v8 = vrot.slane %v1117_v57, 5  ;;  %v2137_v59 = vld [vmem:[#allocation2 + $0x5c] sm:$0x1] }
  0xb1   : > { %v2250_v9 = vshll.u32 %v2132_v48, 16  ;;  %v1105_v13 = vrot.slane %v1104_v61, 4  ;;  %v2249_v14 = vrot.slane %v2247_v63, 4  ;;  %v2256_v15 = vshll.u32 %v2133_v58, 16  ;;  %v7820_v61 = vld [vmem:[%s9006_s1 + $0x100] sm:$0xff]   ;;  %v7070_v63 = vld [vmem:[#allocation2 + $0x78] sm:$0xff]  }
  0xb2   : > { %v2260_v16 = vshrl.u32 %v2133_v58, 16  ;;  %2426 = vrot.lane.b32.xlu0 %v6316_v4, %s7285_s22  ;;  %1996 = vrot.lane.b32.xlu1 %v6296_v60, %s7285_s22  ;;  %v1114_v18 = vor.u32 %v1113_v6, %v1109_v52  ;;  %v2266_v20 = vshll.u32 %v2134_v62, 16  ;;  %v6287_v21 = vrot.slane %v1842_v0, 9  ;;  %v1846_v6 = vld [vmem:[#allocation2 + $0x4c] sm:$0xf] }
  0xb3   : > { %v2252_v19 = vrot.slane %v2250_v9, 5  ;;  %v1110_v24 = vsel %vm7636_vm11, %v1105_v13, %v1109_v52  ;;  %v2258_v25 = vrot.slane %v2256_v15, 5  ;;  %v1920_v27 = vrot.slane %v1843_v10, 5  ;;  %v1847_v13 = vld [vmem:[#allocation2 + $0x50] sm:$0x1]  ;;  %6930 = vmatprep.subr.bf16.mxu0 %v7820_v61 }
  0xb4   : > { %v2262_v26 = vrot.slane %v2260_v16, 4  ;;  %v1115_v29 = vrot.slane %v1114_v18, 4  ;;  %v2268_v31 = vrot.slane %v2266_v20, 5  ;;  %v1923_v32 = vrot.slane %v1844_v17, 5  ;;  %v2138_v18 = vld [vmem:[#allocation2 + $0x60] sm:$0xf] }
  0xb5   : > { %v2253_v30 = vor.u32 %v2252_v19, %v2249_v14  ;;  %v1921_v35 = vsel %vm7680_vm14, %v6287_v21, %v1920_v27  ;;  %v1922_v36 = vrot.slane %v1920_v27, 4  ;;  %v1122_v38 = vshrl.u32 %v899_v22, 16 }
  0xb6   : > { %v2263_v34 = vor.u32 %v2262_v26, %v2258_v25  ;;  %1486 = vrot.lane.b32.xlu0 %v7069_v5, %s7285_s22  ;;  %v1120_v39 = vsel %vm7636_vm11, %v1115_v29, %v1119_v8  ;;  %v1125_v42 = vshll.u32 %v899_v22, 16  ;;  %v1131_v43 = vshll.u32 %v900_v28, 16  ;;  %v1845_v5 = vld [vmem:[#allocation2 + $0x48] sm:$0xe] }
  0xb7   : > { %v2254_v41 = vrot.slane %v2253_v30, 4  ;;  %v6241_v46 = vcombine.low %v1110_v24, %v1120_v39  ;;  %v1924_v48 = vsel %vm7680_vm14, %v1922_v36, %v1923_v32  ;;  %v1124_v49 = vrot.slane %v1122_v38, 4  ;;  %v2140_v32 = vld [vmem:[#allocation2 + $0x68] sm:$0x1]  ;;  %v1850_v39 = vld [vmem:[#allocation2 + $0x5c] sm:$0x1] }
  0xb8   : > { %v2264_v47 = vrot.slane %v2263_v34, 4  ;;  %v6297_v52 = vcombine.low %v1921_v35, %v1924_v48  ;;  %v1127_v53 = vrot.slane %v1125_v42, 5  ;;  %v1133_v54 = vrot.slane %v1131_v43, 5  ;;  %v1849_v34 = vld [vmem:[#allocation2 + $0x58] sm:$0xf] }
  0xb9   : > { %v2259_v51 = vsel %vm7636_vm11, %v2254_v41, %v2258_v25  ;;  %1191 = vrot.lane.b32.xlu1 %v6241_v46, %s7285_s22  ;;  %v1135_v57 = vshrl.u32 %v900_v28, 16  ;;  %v1141_v58 = vshll.u32 %v901_v37, 16  ;;  %v2271_v60 = vshrl.u32 %v2135_v44, 16  ;;  %v2141_v41 = vld [vmem:[#allocation2 + $0x6c] sm:$0xf] }
  0xba   : > { %v2269_v56 = vsel %vm7636_vm11, %v2264_v47, %v2268_v31  ;;  %v1128_v0 = vor.u32 %v1127_v53, %v1124_v49  ;;  %v2274_v3 = vshll.u32 %v2135_v44, 16  ;;  %v2280_v4 = vshll.u32 %v2136_v50, 16 }
  0xbb   : > { %v6317_v62 = vcombine.low %v2259_v51, %v2269_v56  ;;  %v1137_v8 = vrot.slane %v1135_v57, 4  ;;  %v1143_v9 = vrot.slane %v1141_v58, 5  ;;  %v2273_v10 = vrot.slane %v2271_v60, 4  ;;  %v7100_v51 = vld [vmem:[%s9006_s1 + $0xe0] sm:$0xff]   ;;  %v2143_v57 = vld [vmem:[#allocation2 + $0x74] sm:$0x1] }
  0xbc   : > { %v2284_v12 = vshrl.u32 %v2136_v50, 16  ;;  %v1129_v14 = vrot.slane %v1128_v0, 4  ;;  %v2276_v15 = vrot.slane %v2274_v3, 5  ;;  %v2282_v16 = vrot.slane %v2280_v4, 5  ;;  %v2142_v50 = vld [vmem:[#allocation2 + $0x70] sm:$0xf]  ;;  %6708 = vmatprep.subr.bf16.mxu1 %v7100_v51 }
  0xbd   : > { %2428 = vrot.lane.b32.xlu0 %v6317_v62, %s7285_s22  ;;  %v2290_v17 = vshll.u32 %v2137_v59, 16  ;;  %1998 = vrot.lane.b32.xlu1 %v6297_v52, %s7285_s22  ;;  %v1138_v19 = vor.u32 %v1137_v8, %v1133_v54  ;;  %v6288_v21 = vrot.slane %v1845_v5, 9  ;;  %v1927_v22 = vrot.slane %v1846_v6, 5  ;;  %v7101_v58 = vld [vmem:[%s9006_s1 + $0xa0] sm:$0xff]  }
  0xbe   : > { %v2286_v20 = vrot.slane %v2284_v12, 4  ;;  %v1134_v24 = vsel %vm7636_vm11, %v1129_v14, %v1133_v54  ;;  %v2277_v25 = vor.u32 %v2276_v15, %v2273_v10  ;;  %v1930_v27 = vrot.slane %v1847_v13, 5  ;;  %6709 = vmatpush3.bf16.msra.mxu1 %v7101_v58  ;;  %v1851_v12 = vld [vmem:[#allocation2 + $0x60] sm:$0xe]  ;;  %v1852_v13 = vld [vmem:[#allocation2 + $0x64] sm:$0xf] }
  0xbf   : > { %v2292_v26 = vrot.slane %v2290_v17, 5  ;;  %v1139_v28 = vrot.slane %v1138_v19, 4  ;;  %v1928_v30 = vsel %vm7680_vm14, %v6288_v21, %v1927_v22  ;;  %v1929_v31 = vrot.slane %v1927_v22, 4  ;;  %v1853_v14 = vld [vmem:[#allocation2 + $0x68] sm:$0x1] }
  0xc0   : > { %v2287_v29 = vor.u32 %v2286_v20, %v2282_v16  ;;  %v2278_v35 = vrot.slane %v2277_v25, 4  ;;  %v2295_v36 = vshrl.u32 %v2138_v18, 16  ;;  %v2298_v37 = vshll.u32 %v2138_v18, 16  ;;  %v2144_v15 = vld [vmem:[#allocation2 + $0x78] sm:$0xf] }
  0xc1   : > { %1488 = vrot.lane.b32.xlu0 %v7070_v63, %s7285_s22  ;;  %v2304_v38 = vshll.u32 %v2139_v23, 16  ;;  %v1144_v42 = vsel %vm7636_vm11, %v1139_v28, %v1143_v9  ;;  %v1931_v44 = vsel %vm7680_vm14, %v1929_v31, %v1930_v27  ;;  %v2308_v45 = vshrl.u32 %v2139_v23, 16  ;;  %v2145_v21 = vld [vmem:[#allocation2 + $0x7c] sm:$0xf] }
  0xc2   : > { %v2288_v43 = vrot.slane %v2287_v29, 4  ;;  %v6242_v46 = vcombine.low %v1134_v24, %v1144_v42  ;;  %v2283_v47 = vsel %vm7636_vm11, %v2278_v35, %v2282_v16  ;;  %v6298_v48 = vcombine.low %v1928_v30, %v1931_v44  ;;  %v7103_v16 = vld [vmem:[%s9006_s1 + $0xe8] sm:$0xff]   ;;  %v2146_v35 = vld [vmem:[#allocation2 + $0x80] sm:$0x1]  ;;  %v1855_v42 = vld [vmem:[#allocation2 + $0x70] sm:$0xf] }
  0xc3   : > { %v2297_v49 = vrot.slane %v2295_v36, 4  ;;  %v2300_v53 = vrot.slane %v2298_v37, 5  ;;  %v2306_v54 = vrot.slane %v2304_v38, 5  ;;  %v2310_v56 = vrot.slane %v2308_v45, 4  ;;  %6710 = vmatprep.subr.bf16.mxu1 %v7103_v16  ;;  %v1854_v36 = vld [vmem:[#allocation2 + $0x6c] sm:$0xe] }
  0xc4   : > { %v2293_v52 = vsel %vm7636_vm11, %v2288_v43, %v2292_v26  ;;  %1193 = vrot.lane.b32.xlu1 %v6242_v46, %s7285_s22  ;;  %v2314_v60 = vshll.u32 %v2140_v32, 16  ;;  %v6289_v62 = vrot.slane %v1848_v33, 9  ;;  %v1934_v63 = vrot.slane %v1849_v34, 5  ;;  %v7104_v26 = vld [vmem:[%s9006_s1 + $0xa8] sm:$0xff]  }
  0xc5   : > { %v6318_v59 = vcombine.low %v2283_v47, %v2293_v52  ;;  %v2301_v0 = vor.u32 %v2300_v53, %v2297_v49  ;;  %v2311_v3 = vor.u32 %v2310_v56, %v2306_v54  ;;  %v1937_v4 = vrot.slane %v1850_v39, 5  ;;  %6711 = vmatpush3.bf16.msra.mxu1 %v7104_v26  ;;  %v1856_v47 = vld [vmem:[#allocation2 + $0x74] sm:$0x1]  ;;  %v2147_v53 = vld [vmem:[#allocation2 + $0x84] sm:$0xf] }
  0xc6   : > { %v2319_v5 = vshrl.u32 %v2141_v41, 16  ;;  %v2316_v6 = vrot.slane %v2314_v60, 5  ;;  %v1935_v8 = vsel %vm7680_vm14, %v6289_v62, %v1934_v63  ;;  %v1936_v9 = vrot.slane %v1934_v63, 4  ;;  %v2148_v60 = vld [vmem:[#allocation2 + $0x88] sm:$0xf] }
  0xc7   : > { %2430 = vrot.lane.b32.xlu0 %v6318_v59, %s7285_s22  ;;  %v2322_v10 = vshll.u32 %v2141_v41, 16  ;;  %v2302_v17 = vrot.slane %v2301_v0, 4  ;;  %v2312_v18 = vrot.slane %v2311_v3, 4  ;;  %v2328_v20 = vshll.u32 %v2142_v50, 16  ;;  %v2149_v16 = vld [vmem:[#allocation2 + $0x8c] sm:$0x1] }
  0xc8   : > { %v2321_v19 = vrot.slane %v2319_v5, 4  ;;  %2000 = vrot.lane.b32.xlu1 %v6298_v48, %s7285_s22  ;;  %v1938_v22 = vsel %vm7680_vm14, %v1936_v9, %v1937_v4  ;;  %v2332_v24 = vshrl.u32 %v2142_v50, 16  ;;  %v2338_v25 = vshll.u32 %v2143_v57, 16  ;;  %v7106_v48 = vld [vmem:[%s9006_s1 + $0xf0] sm:$0xff]   ;;  %v7109_v4 = vld [vmem:[%s9006_s1 + $0xf8] sm:$0xff]  }
  0xc9   : > { %v2324_v23 = vrot.slane %v2322_v10, 5  ;;  %v2307_v27 = vsel %vm7636_vm11, %v2302_v17, %v2306_v54  ;;  %v2317_v28 = vsel %vm7636_vm11, %v2312_v18, %v2316_v6  ;;  %v6299_v29 = vcombine.low %v1935_v8, %v1938_v22  ;;  %v7107_v54 = vld [vmem:[%s9006_s1 + $0xb0] sm:$0xff]   ;;  %6712 = vmatprep.subr.bf16.mxu1 %v7106_v48  ;;  %v7110_v10 = vld [vmem:[%s9006_s1 + $0xb8] sm:$0xff]   ;;  %v7111_v48 = vld [vmem:[#allocation2 + $0x24] sm:$0xff]  }
  0xca   : > { %v2330_v30 = vrot.slane %v2328_v20, 5  ;;  %v6319_v31 = vcombine.low %v2307_v27, %v2317_v28  ;;  %v2334_v33 = vrot.slane %v2332_v24, 4  ;;  %v2340_v34 = vrot.slane %v2338_v25, 5  ;;  %6713 = vmatpush3.bf16.msra.mxu1 %v7107_v54  ;;  %v1857_v17 = vld [vmem:[#allocation2 + $0x78] sm:$0xe] }
  0xcb   : > { %v2325_v32 = vor.u32 %v2324_v23, %v2321_v19  ;;  %v6290_v37 = vrot.slane %v1851_v12, 9  ;;  %v1941_v38 = vrot.slane %v1852_v13, 5  ;;  %v1944_v39 = vrot.slane %v1853_v14, 5  ;;  %6714 = vmatprep.subr.bf16.mxu1 %v7109_v4  ;;  %v1858_v22 = vld [vmem:[#allocation2 + $0x7c] sm:$0xf] }
  0xcc   : > { %v2343_v41 = vshrl.u32 %v2144_v15, 16  ;;  %2432 = vrot.lane.b32.xlu0 %v6319_v31, %s7285_s22  ;;  %2002 = vrot.lane.b32.xlu1 %v6299_v29, %s7285_s22  ;;  %v2335_v44 = vor.u32 %v2334_v33, %v2330_v30  ;;  %v2346_v45 = vshll.u32 %v2144_v15, 16  ;;  %v2352_v46 = vshll.u32 %v2145_v21, 16  ;;  %v7886_v23 = vld [vmem:[#allocation2 + $0x80] sm:$0x1] }
  0xcd   : > { %v2326_v43 = vrot.slane %v2325_v32, 4  ;;  %v1942_v49 = vsel %vm7680_vm14, %v6290_v37, %v1941_v38  ;;  %v1943_v50 = vrot.slane %v1941_v38, 4  ;;  %v2356_v52 = vshrl.u32 %v2145_v21, 16  ;;  %v1216_v28 = vld [vmem:[#allocation2] sm:$0xe]  ;;  %v7095_v37 = vld [vmem:[#allocation2 + $0x18] sm:$0xff]  }
  0xce   : > { %v2345_v51 = vrot.slane %v2343_v41, 4  ;;  %v2336_v57 = vrot.slane %v2335_v44, 4  ;;  %v2348_v58 = vrot.slane %v2346_v45, 5  ;;  %v2354_v59 = vrot.slane %v2352_v46, 5  ;;  %v1217_v29 = vld [vmem:[#allocation2 + $0x4] sm:$0xf]  ;;  %6715 = vmatpush3.bf16.msra.mxu1 %v7110_v10 }
  0xcf   : > { %v2331_v56 = vsel %vm7636_vm11, %v2326_v43, %v2330_v30  ;;  %v1945_v62 = vsel %vm7680_vm14, %v1943_v50, %v1944_v39  ;;  %v2358_v63 = vrot.slane %v2356_v52, 4  ;;  %v2362_v0 = vshll.u32 %v2146_v35, 16  ;;  %v7088_v35 = vld [vmem:[#allocation2] sm:$0xff]   ;;  %v7102_v39 = vld [vmem:[#allocation2 + $0x30] sm:$0xff]   ;;  %v7105_v41 = vld [vmem:[#allocation2 + $0x18] sm:$0xff]  }
  0xd0   : > { %v6291_v3 = vrot.slane %v1854_v36, 9  ;;  %v2341_v5 = vsel %vm7636_vm11, %v2336_v57, %v2340_v34  ;;  %v6300_v6 = vcombine.low %v1942_v49, %v1945_v62  ;;  %v2349_v8 = vor.u32 %v2348_v58, %v2345_v51  ;;  %v1218_v34 = vld [vmem:[#allocation2 + $0x8] sm:$0x1]  ;;  %v7090_v36 = vld [vmem:[#allocation2 + $0xc] sm:$0xff]  }
  0xd1   : > { %v1948_v9 = vrot.slane %v1855_v42, 5  ;;  %v6320_v12 = vcombine.low %v2331_v56, %v2341_v5  ;;  %v2359_v13 = vor.u32 %v2358_v63, %v2354_v59  ;;  %v2364_v14 = vrot.slane %v2362_v0, 5  ;;  %v7099_v38 = vld [vmem:[#allocation2 + $0x24] sm:$0xff]   ;;  %v1219_v46 = vld [vmem:[#allocation2 + $0xc] sm:$0xe] }
  0xd2   : > { %v1951_v15 = vrot.slane %v1856_v47, 5  ;;  %2004 = vrot.lane.b32.xlu1 %v6300_v6, %s7285_s22  ;;  %v2350_v18 = vrot.slane %v2349_v8, 4  ;;  %v2367_v21 = vshrl.u32 %v2147_v53, 16  ;;  %v2370_v25 = vshll.u32 %v2147_v53, 16  ;;  %v7108_v47 = vld [vmem:[#allocation2 + $0x3c] sm:$0xff]   ;;  %v7115_v8 = vld [vmem:[#allocation2 + $0x54] sm:$0xff]  }
  0xd3   : > { %v1949_v19 = vsel %vm7680_vm14, %v6291_v3, %v1948_v9  ;;  %v1950_v20 = vrot.slane %v1948_v9, 4  ;;  %2434 = vrot.lane.b32.xlu0 %v6320_v12, %s7285_s22  ;;  %v2360_v24 = vrot.slane %v2359_v13, 4  ;;  %v2376_v26 = vshll.u32 %v2148_v60, 16  ;;  %v1220_v52 = vld [vmem:[#allocation2 + $0x10] sm:$0xf] }
  0xd4   : > { %v2380_v27 = vshrl.u32 %v2148_v60, 16  ;;  %v2355_v30 = vsel %vm7636_vm11, %v2350_v18, %v2354_v59  ;;  %v2369_v32 = vrot.slane %v2367_v21, 4  ;;  %v2386_v33 = vshll.u32 %v2149_v16, 16  ;;  %v1221_v53 = vld [vmem:[#allocation2 + $0x14] sm:$0x1]  ;;  %v7113_v59 = vld [vmem:[#allocation2 + $0x48] sm:$0xff]  }
  0xd5   : > { %v1952_v31 = vsel %vm7680_vm14, %v1950_v20, %v1951_v15  ;;  %v2365_v42 = vsel %vm7636_vm11, %v2360_v24, %v2364_v14  ;;  %v2372_v44 = vrot.slane %v2370_v25, 5  ;;  %v2378_v45 = vrot.slane %v2376_v26, 5  ;;  %v7114_v3 = vld [vmem:[#allocation2 + $0x30] sm:$0xff]   ;;  %v7116_v14 = vld [vmem:[#allocation2 + $0x3c] sm:$0xff]  }
  0xd6   : > { %v6301_v43 = vcombine.low %v1949_v19, %v1952_v31  ;;  %v6321_v49 = vcombine.low %v2355_v30, %v2365_v42  ;;  %v2382_v50 = vrot.slane %v2380_v27, 4  ;;  %v6292_v51 = vrot.slane %v1857_v17, 9  ;;  %v7117_v26 = vld [vmem:[#allocation2 + $0x60] sm:$0xff]   ;;  %v1223_v30 = vld [vmem:[#allocation2 + $0x1c] sm:$0xf] }
  0xd7   : > { %v2373_v54 = vor.u32 %v2372_v44, %v2369_v32  ;;  %v2388_v56 = vrot.slane %v2386_v33, 5  ;;  %v1955_v57 = vrot.slane %v1858_v22, 5  ;;  %v1958_v58 = vrot.slane %v7886_v23, 5  ;;  %v1224_v31 = vld [vmem:[#allocation2 + $0x20] sm:$0x1] }
  0xd8   : > { %2006 = vrot.lane.b32.xlu1 %v6301_v43, %s7285_s22  ;;  %2436 = vrot.lane.b32.xlu0 %v6321_v49, %s7285_s22  ;;  %v2383_v60 = vor.u32 %v2382_v50, %v2378_v45  ;;  %v6243_v62 = vrot.slane %v1216_v28, 9  ;;  %v1281_v63 = vrot.slane %v1217_v29, 5  ;;  %v1284_v0 = vrot.slane %v1218_v34, 5  ;;  %v1222_v29 = vld [vmem:[#allocation2 + $0x18] sm:$0xe]  ;;  %v7120_v49 = vld [vmem:[#allocation2 + $0x6c] sm:$0xff]  }
  0xd9   : > { %v2374_v4 = vrot.slane %v2373_v54, 4  ;;  %v1956_v5 = vsel %vm7680_vm14, %v6292_v51, %v1955_v57  ;;  %v1957_v6 = vrot.slane %v1955_v57, 4  ;;  %vm1205_vm15 = vcmask 1048064   ;;  %v1225_v42 = vld [vmem:[#allocation2 + $0x24] sm:$0xe] }
  0xda   : > { %vm861_vm1 = vcmask 523264   ;;  %v2384_v9 = vrot.slane %v2383_v60, 4  ;;  %v1282_v10 = vsel %vm7680_vm14, %v6243_v62, %v1281_v63  ;;  %v1283_v12 = vrot.slane %v1281_v63, 4  ;;  %v1226_v43 = vld [vmem:[#allocation2 + $0x28] sm:$0xf] }
  0xdb   : > { %v6244_v13 = vrot.slane %v1219_v46, 9  ;;  %862 = vst.msk [vmem:[#allocation3] sm:$0xff] %vm861_vm1, %v7088_v35  ;;  %863 = vst.msk [vmem:[#allocation3 + $0x28] sm:$0xff] %vm861_vm1, %v7090_v36  ;;  %v2379_v15 = vsel %vm7636_vm11, %v2374_v4, %v2378_v45  ;;  %v1959_v16 = vsel %vm7680_vm14, %v1957_v6, %v1958_v58  ;;  %v1288_v17 = vrot.slane %v1220_v52, 5  ;;  %v7118_v35 = vld [vmem:[#allocation2 + $0x48] sm:$0xff]   ;;  %v7121_v52 = vld [vmem:[#allocation2 + $0x54] sm:$0xff]  }
  0xdc   : > { %864 = vst.msk [vmem:[#allocation3 + $0x50] sm:$0xff] %vm861_vm1, %v7095_v37  ;;  %865 = vst.msk [vmem:[#allocation3 + $0x78] sm:$0xff] %vm861_vm1, %v7099_v38  ;;  %v1291_v18 = vrot.slane %v1221_v53, 5  ;;  %v2389_v19 = vsel %vm7636_vm11, %v2384_v9, %v2388_v56  ;;  %v6302_v20 = vcombine.low %v1956_v5, %v1959_v16  ;;  %v1285_v21 = vsel %vm7680_vm14, %v1283_v12, %v1284_v0  ;;  %v1227_v45 = vld [vmem:[#allocation2 + $0x2c] sm:$0x1] }
  0xdd   : > { %866 = vst.msk [vmem:[#allocation3 + $0xa0] sm:$0xff] %vm861_vm1, %v7102_v39  ;;  %2110 = vst.msk [vmem:[#allocation3 + $0x18] sm:$0xff] %vm861_vm1, %v7105_v41  ;;  %v6322_v22 = vcombine.low %v2379_v15, %v2389_v19  ;;  %v6253_v23 = vcombine.low %v1282_v10, %v1285_v21  ;;  %v1289_v24 = vsel %vm7680_vm14, %v6244_v13, %v1288_v17  ;;  %v1290_v25 = vrot.slane %v1288_v17, 4  ;;  %v1228_v53 = vld [vmem:[#allocation2 + $0x30] sm:$0xe] }
  0xde   : > { %867 = vst.msk [vmem:[#allocation3 + $0xc8] sm:$0xff] %vm861_vm1, %v7108_v47  ;;  %2111 = vst.msk [vmem:[#allocation3 + $0x40] sm:$0xff] %vm861_vm1, %v7111_v48  ;;  %2008 = vrot.lane.b32.xlu1 %v6302_v20, %s7285_s22  ;;  %v6245_v32 = vrot.slane %v1222_v29, 9  ;;  %v1295_v33 = vrot.slane %v1223_v30, 5  ;;  %v1298_v34 = vrot.slane %v1224_v31, 5  ;;  %v6246_v46 = vrot.slane %v1225_v42, 9 }
  0xdf   : > { %868 = vst.msk [vmem:[#allocation3 + $0xf0] sm:$0xff] %vm861_vm1, %v7113_v59  ;;  %2112 = vst.msk [vmem:[#allocation3 + $0x68] sm:$0xff] %vm861_vm1, %v7114_v3  ;;  %2438 = vrot.lane.b32.xlu0 %v6322_v22, %s7285_s22  ;;  %v1292_v27 = vsel %vm7680_vm14, %v1290_v25, %v1291_v18  ;;  %v1302_v47 = vrot.slane %v1226_v43, 5  ;;  %v1305_v48 = vrot.slane %v1227_v45, 5  ;;  %v1229_v54 = vld [vmem:[#allocation2 + $0x34] sm:$0xf] }
  0xe0   : > { %869 = vst.msk [vmem:[#allocation3 + $0x118] sm:$0xff] %vm861_vm1, %v7115_v8  ;;  %2113 = vst.msk [vmem:[#allocation3 + $0x90] sm:$0xff] %vm861_vm1, %v7116_v14  ;;  %v6254_v28 = vcombine.low %v1289_v24, %v1292_v27  ;;  %v1296_v37 = vsel %vm7680_vm14, %v6245_v32, %v1295_v33  ;;  %v1297_v38 = vrot.slane %v1295_v33, 4  ;;  %v1230_v57 = vld [vmem:[#allocation2 + $0x38] sm:$0x1]  ;;  %v6247_v58 = vrot.slane %v1228_v53, 9 }
  0xe1   : > { %1389 = vst.msk [vmem:[#allocation3 + $0x8] sm:$0xff] %vm861_vm1, %v6253_v23  ;;  %870 = vst.msk [vmem:[#allocation3 + $0x140] sm:$0xff] %vm861_vm1, %v7117_v26  ;;  %v1303_v50 = vsel %vm7680_vm14, %v6246_v46, %v1302_v47  ;;  %v1304_v51 = vrot.slane %v1302_v47, 4  ;;  %v1309_v59 = vrot.slane %v1229_v54, 5  ;;  %v1312_v63 = vrot.slane %v1230_v57, 5  ;;  %v7122_v14 = vld [vmem:[#allocation2 + $0x60] sm:$0xff]  }
  0xe2   : > { %1390 = vst.msk [vmem:[#allocation3 + $0x30] sm:$0xff] %vm861_vm1, %v6254_v28  ;;  %2114 = vst.msk [vmem:[#allocation3 + $0xb8] sm:$0xff] %vm861_vm1, %v7118_v35  ;;  %v1299_v41 = vsel %vm7680_vm14, %v1297_v38, %v1298_v34  ;;  %v1510_v5 = vld [vmem:[#allocation2 + $0xc] sm:$0xf]  ;;  %v1511_v6 = vld [vmem:[#allocation2 + $0x10] sm:$0xf] }
  0xe3   : > { %v6255_v44 = vcombine.low %v1296_v37, %v1299_v41  ;;  %871 = vst.msk [vmem:[#allocation3 + $0x168] sm:$0xff] %vm861_vm1, %v7120_v49  ;;  %v1306_v56 = vsel %vm7680_vm14, %v1304_v51, %v1305_v48  ;;  %2115 = vst.msk [vmem:[#allocation3 + $0xe0] sm:$0xff] %vm861_vm1, %v7121_v52  ;;  %v1310_v0 = vsel %vm7680_vm14, %v6247_v58, %v1309_v59  ;;  %v1311_v3 = vrot.slane %v1309_v59, 4  ;;  %v1512_v8 = vld [vmem:[#allocation2 + $0x14] sm:$0x1]  ;;  %v7124_v33 = vld [vmem:[#allocation2 + $0x6c] sm:$0xff]  }
  0xe4   : > { %v1471_v36 = vpop.permute.xlu0 %1470  ;;  %v1473_v39 = vpop.permute.xlu1 %1472  ;;  %v6256_v62 = vcombine.low %v1303_v50, %v1306_v56  ;;  %v1541_v10 = vshrl.u32 %v1510_v5, 16  ;;  %v1544_v12 = vshll.u32 %v1510_v5, 16  ;;  %v1550_v13 = vshll.u32 %v1511_v6, 16  ;;  %2116 = vst.msk [vmem:[#allocation3 + $0x108] sm:$0xff] %vm861_vm1, %v7122_v14  ;;  %v1231_v23 = vld [vmem:[#allocation2 + $0x3c] sm:$0xe] }
  0xe5   : > { %1500 = vst.msk [vmem:[#allocation3 + $0x8] sm:$0xff] %vm1205_vm15, %v1471_v36  ;;  %1501 = vst.msk [vmem:[#allocation3 + $0x30] sm:$0xff] %vm1205_vm15, %v1473_v39  ;;  %v1313_v4 = vsel %vm7680_vm14, %v1311_v3, %v1312_v63  ;;  %v1554_v16 = vshrl.u32 %v1511_v6, 16  ;;  %v1560_v17 = vshll.u32 %v1512_v8, 16  ;;  %v1232_v24 = vld [vmem:[#allocation2 + $0x40] sm:$0xf] }
  0xe6   : > { %1391 = vst.msk [vmem:[#allocation3 + $0x58] sm:$0xff] %vm861_vm1, %v6255_v44  ;;  %1392 = vst.msk [vmem:[#allocation3 + $0x80] sm:$0xff] %vm861_vm1, %v6256_v62  ;;  %v6257_v9 = vcombine.low %v1310_v0, %v1313_v4  ;;  %v1543_v18 = vrot.slane %v1541_v10, 4  ;;  %v1546_v19 = vrot.slane %v1544_v12, 5  ;;  %v1552_v20 = vrot.slane %v1550_v13, 5  ;;  %v7112_v38 = vld [vmem:[%s9006_s1 + $0x108] sm:$0xff]  }
  0xe7   : > { %v1556_v21 = vrot.slane %v1554_v16, 4  ;;  %v1562_v22 = vrot.slane %v1560_v17, 5  ;;  %v1233_v27 = vld [vmem:[#allocation2 + $0x44] sm:$0x1]  ;;  %v6248_v28 = vrot.slane %v1231_v23, 9  ;;  %v1316_v29 = vrot.slane %v1232_v24, 5 }
  0xe8   : > { %1393 = vst.msk [vmem:[#allocation3 + $0xa8] sm:$0xff] %vm861_vm1, %v6257_v9  ;;  %v1547_v26 = vor.u32 %v1546_v19, %v1543_v18  ;;  %v1319_v32 = vrot.slane %v1233_v27, 5  ;;  %2117 = vst.msk [vmem:[#allocation3 + $0x130] sm:$0xff] %vm861_vm1, %v7124_v33  ;;  %v7125_v41 = vld [vmem:[#allocation2 + $0x78] sm:$0xff]   ;;  %v1515_v51 = vld [vmem:[#allocation2 + $0x20] sm:$0x1] }
  0xe9   : > { %v1557_v31 = vor.u32 %v1556_v21, %v1552_v20  ;;  %v1317_v36 = vsel %vm7680_vm14, %v6248_v28, %v1316_v29  ;;  %v1318_v37 = vrot.slane %v1316_v29, 4  ;;  %v1513_v44 = vld [vmem:[#allocation2 + $0x18] sm:$0xf]  ;;  %v1514_v45 = vld [vmem:[#allocation2 + $0x1c] sm:$0xf]  ;;  %2118 = vst.msk [vmem:[#allocation3 + $0x158] sm:$0xff] %vm861_vm1, %v7125_v41 }
  0xea   : > { %v1548_v35 = vrot.slane %v1547_v26, 4  ;;  %v1565_v52 = vshrl.u32 %v1513_v44, 16  ;;  %v1568_v53 = vshll.u32 %v1513_v44, 16  ;;  %v7126_v54 = vld [vmem:[#allocation2 + $0x84] sm:$0xff]   ;;  %v1574_v57 = vshll.u32 %v1514_v45, 16  ;;  %v7119_v8 = vld [vmem:[%s9006_s1 + $0x110] sm:$0xff]  }
  0xeb   : > { %v1558_v39 = vrot.slane %v1557_v31, 4  ;;  %v1320_v43 = vsel %vm7680_vm14, %v1318_v37, %v1319_v32  ;;  %v1578_v58 = vshrl.u32 %v1514_v45, 16  ;;  %v1584_v59 = vshll.u32 %v1515_v51, 16  ;;  %v1235_v0 = vld [vmem:[#allocation2 + $0x4c] sm:$0xf]  ;;  %2119 = vst.msk [vmem:[#allocation3 + $0x180] sm:$0xff] %vm861_vm1, %v7126_v54 }
  0xec   : > { %v2641_v60 = vld [vmem:[#allocation3 + $0x8] sm:$0xff]  ;;  %v2646_v34 = vld [vmem:[#allocation3 + $0x30] sm:$0xff]  ;;  %v1553_v42 = vsel %vm7636_vm11, %v1548_v35, %v1552_v20  ;;  %v6258_v50 = vcombine.low %v1317_v36, %v1320_v43  ;;  %v1567_v62 = vrot.slane %v1565_v52, 4  ;;  %v1570_v63 = vrot.slane %v1568_v53, 5  ;;  %v1236_v3 = vld [vmem:[#allocation2 + $0x50] sm:$0x1] }
  0xed   : > { %3040 = vmatprep.mubr.bf16.mxu0 %v2641_v60  ;;  %v1563_v49 = vsel %vm7636_vm11, %v1558_v39, %v1562_v22  ;;  %v1234_v60 = vld [vmem:[#allocation2 + $0x48] sm:$0xe]  ;;  %v1576_v4 = vrot.slane %v1574_v57, 5  ;;  %v1580_v5 = vrot.slane %v1578_v58, 4  ;;  %v1586_v12 = vrot.slane %v1584_v59, 5  ;;  %v7123_v17 = vld [vmem:[%s9006_s1 + $0x118] sm:$0xff]  }
  0xee   : > { %v6273_v56 = vcombine.low %v1553_v42, %v1563_v49  ;;  %1394 = vst.msk [vmem:[#allocation3 + $0xd0] sm:$0xff] %vm861_vm1, %v6258_v50  ;;  %v6249_v6 = vrot.slane %v1234_v60, 9  ;;  %v1571_v10 = vor.u32 %v1570_v63, %v1567_v62  ;;  %v1323_v13 = vrot.slane %v1235_v0, 5  ;;  %v1516_v23 = vld [vmem:[#allocation2 + $0x24] sm:$0xf] }
  0xef   : > { %v1326_v14 = vrot.slane %v1236_v3, 5  ;;  %v1581_v16 = vor.u32 %v1580_v5, %v1576_v4  ;;  %v1517_v24 = vld [vmem:[#allocation2 + $0x28] sm:$0xf]  ;;  %v1518_v27 = vld [vmem:[#allocation2 + $0x2c] sm:$0x1]  ;;  %v1589_v28 = vshrl.u32 %v1516_v23, 16 }
  0xf0   : > { %1820 = vst.msk [vmem:[#allocation3 + $0x10] sm:$0xff] %vm861_vm1, %v6273_v56  ;;  %v1572_v18 = vrot.slane %v1571_v10, 4  ;;  %v1324_v19 = vsel %vm7680_vm14, %v6249_v6, %v1323_v13  ;;  %v1325_v20 = vrot.slane %v1323_v13, 4  ;;  %v1592_v29 = vshll.u32 %v1516_v23, 16  ;;  %v1237_v35 = vld [vmem:[#allocation2 + $0x54] sm:$0xe] }
  0xf1   : > { %v1176_v15 = vpop.permute.xlu0 %1175  ;;  %v1582_v22 = vrot.slane %v1581_v16, 4  ;;  %v1598_v33 = vshll.u32 %v1517_v24, 16  ;;  %v1238_v36 = vld [vmem:[#allocation2 + $0x58] sm:$0xf]  ;;  %v1608_v41 = vshll.u32 %v1518_v27, 16  ;;  %v6250_v45 = vrot.slane %v1237_v35, 9 }
  0xf2   : > { %1206 = vst.msk [vmem:[#allocation3] sm:$0xff] %vm1205_vm15, %v1176_v15  ;;  %v1327_v26 = vsel %vm7680_vm14, %v1325_v20, %v1326_v14  ;;  %v1594_v39 = vrot.slane %v1592_v29, 5  ;;  %v1239_v42 = vld [vmem:[#allocation2 + $0x5c] sm:$0x1]  ;;  %v1519_v58 = vld [vmem:[#allocation2 + $0x30] sm:$0xf] }
  0xf3   : > { %v1587_v31 = vsel %vm7636_vm11, %v1582_v22, %v1586_v12  ;;  %v6259_v32 = vcombine.low %v1324_v19, %v1327_v26  ;;  %v1600_v43 = vrot.slane %v1598_v33, 5  ;;  %v1610_v52 = vrot.slane %v1608_v41, 5  ;;  %v1520_v59 = vld [vmem:[#allocation2 + $0x34] sm:$0xf]  ;;  %v1521_v0 = vld [vmem:[#allocation2 + $0x38] sm:$0x1] }
  0xf4   : > { %v1178_v25 = vpop.permute.xlu1 %1177  ;;  %v1613_v3 = vshrl.u32 %v1519_v58, 16  ;;  %v1241_v10 = vld [vmem:[#allocation2 + $0x64] sm:$0xf]  ;;  %v1632_v16 = vshll.u32 %v1521_v0, 16 }
  0xf5   : > { %1207 = vst.msk [vmem:[#allocation3 + $0x28] sm:$0xff] %vm1205_vm15, %v1178_v25  ;;  %v1475_v30 = vpop.permute.xlu0 %1474  ;;  %v1577_v25 = vsel %vm7636_vm11, %v1572_v18, %v1576_v4  ;;  %v1616_v4 = vshll.u32 %v1519_v58, 16 }
  0xf6   : > { %1502 = vst.msk [vmem:[#allocation3 + $0x58] sm:$0xff] %vm1205_vm15, %v1475_v30  ;;  %v6274_v37 = vcombine.low %v1577_v25, %v1587_v31  ;;  %v1615_v14 = vrot.slane %v1613_v3, 4  ;;  %v1337_v25 = vrot.slane %v1241_v10, 5 }
  0xf7   : > { %1395 = vst.msk [vmem:[#allocation3 + $0xf8] sm:$0xff] %vm861_vm1, %v6259_v32 }
  0xf8   : > { %v1180_v46 = vpop.permute.xlu1 %1179  ;;  %1821 = vst.msk [vmem:[#allocation3 + $0x38] sm:$0xff] %vm861_vm1, %v6274_v37  ;;  %v1339_v33 = vrot.slane %v1337_v25, 4  ;;  %v1523_v37 = vld [vmem:[#allocation2 + $0x40] sm:$0xf] }
  0xf9   : > { %v1477_v47 = vpop.permute.xlu0 %1476  ;;  %v2640_v48 = vld [vmem:[#allocation3] sm:$0xff]  ;;  %1208 = vst.msk [vmem:[#allocation3 + $0x50] sm:$0xff] %vm1205_vm15, %v1180_v46  ;;  %v1330_v46 = vrot.slane %v1238_v36, 5  ;;  %v1522_v36 = vld [vmem:[#allocation2 + $0x3c] sm:$0xf] }
  0xfa   : > { %1503 = vst.msk [vmem:[#allocation3 + $0x80] sm:$0xff] %vm1205_vm15, %v1477_v47  ;;  %3041 = vmatmul.mubr.bf16.vlgmr.msra.gmra.mrb[0].mxu0 %v2640_v48  ;;  %v1333_v48 = vrot.slane %v1239_v42, 5 }
  0xfb   : > { %6931 = vmatpush3.bf16.msra.mxu0 %v7820_v61  ;;  %3048 = vmatprep.mubr.bf16.mxu0 %v2646_v34  ;;  %v1602_v34 = vshrl.u32 %v1517_v24, 16  ;;  %v1331_v53 = vsel %vm7680_vm14, %v6250_v45, %v1330_v46  ;;  %v1332_v54 = vrot.slane %v1330_v46, 4  ;;  %v1634_v24 = vrot.slane %v1632_v16, 5  ;;  %v1243_v46 = vld [vmem:[#allocation2 + $0x6c] sm:$0xe] }
  0xfc   : > { %6932 = vmatprep.subr.bf16.mxu0 %v7112_v38  ;;  %v2645_v9 = vld [vmem:[#allocation3 + $0x28] sm:$0xff]  ;;  %v1640_v45 = vshll.u32 %v1522_v36, 16 }
  0xfd   : > { %v1479_v61 = vpop.permute.xlu0 %1478  ;;  %v2651_v21 = vld [vmem:[#allocation3 + $0x58] sm:$0xff]  ;;  %v1604_v44 = vrot.slane %v1602_v34, 4  ;;  %v1334_v63 = vsel %vm7680_vm14, %v1332_v54, %v1333_v48 }
  0xfe   : > { %v1182_v15 = vpop.permute.xlu1 %1181  ;;  %1504 = vst.msk [vmem:[#allocation3 + $0xa8] sm:$0xff] %vm1205_vm15, %v1479_v61  ;;  %v6260_v6 = vcombine.low %v1331_v53, %v1334_v63  ;;  %v1626_v61 = vshrl.u32 %v1520_v59, 16 }
  0xff   : > { %1209 = vst.msk [vmem:[#allocation3 + $0x78] sm:$0xff] %vm1205_vm15, %v1182_v15  ;;  %6933 = vmatpush3.bf16.msra.mxu0 %v7112_v38  ;;  %v1591_v38 = vrot.slane %v1589_v28, 4  ;;  %v1605_v51 = vor.u32 %v1604_v44, %v1600_v43  ;;  %v1618_v15 = vrot.slane %v1616_v4, 5  ;;  %v1637_v44 = vshrl.u32 %v1522_v36, 16  ;;  %v1530_v36 = vld [vmem:[#allocation2 + $0x5c] sm:$0x1] }
 0x100   : > { %6934 = vmatprep.subr.bf16.mxu0 %v7119_v8  ;;  %v2650_v56 = vld [vmem:[#allocation3 + $0x50] sm:$0xff]  ;;  %1396 = vst.msk [vmem:[#allocation3 + $0x120] sm:$0xff] %vm861_vm1, %v6260_v6  ;;  %v1628_v20 = vrot.slane %v1626_v61, 4 }
 0x101   : > { %v1595_v47 = vor.u32 %v1594_v39, %v1591_v38  ;;  %v2656_v60 = vld [vmem:[#allocation3 + $0x80] sm:$0xff]  ;;  %v1606_v62 = vrot.slane %v1605_v51, 4  ;;  %v1619_v23 = vor.u32 %v1618_v15, %v1615_v14  ;;  %v1639_v54 = vrot.slane %v1637_v44, 4 }
 0x102   : > { %v1184_v30 = vpop.permute.xlu1 %1183  ;;  %3049 = vmatmul.mubr.bf16.gmra.mrb[4].mxu0 %v2645_v9  ;;  %v1240_v9 = vld [vmem:[#allocation2 + $0x60] sm:$0xe]  ;;  %v1244_v51 = vld [vmem:[#allocation2 + $0x70] sm:$0xf] }
 0x103   : > { %1210 = vst.msk [vmem:[#allocation3 + $0xa0] sm:$0xff] %vm1205_vm15, %v1184_v30  ;;  %3056 = vmatprep.mubr.bf16.mxu0 %v2651_v21  ;;  %6935 = vmatpush3.bf16.msra.mxu0 %v7119_v8  ;;  %v1596_v57 = vrot.slane %v1595_v47, 4  ;;  %v1622_v8 = vshll.u32 %v1520_v59, 16  ;;  %v1611_v13 = vsel %vm7636_vm11, %v1606_v62, %v1610_v52  ;;  %v6251_v21 = vrot.slane %v1240_v9, 9  ;;  %v1245_v52 = vld [vmem:[#allocation2 + $0x74] sm:$0x1] }
 0x104   : > { %6936 = vmatprep.subr.bf16.mxu0 %v7123_v17  ;;  %v1620_v31 = vrot.slane %v1619_v23, 4  ;;  %v1344_v62 = vrot.slane %v1244_v51, 5  ;;  %v1347_v3 = vrot.slane %v1245_v52, 5  ;;  %v1525_v9 = vld [vmem:[#allocation2 + $0x48] sm:$0xf] }
 0x105   : > { %v2421_v49 = vpop.permute.xlu0 %2420  ;;  %v1601_v5 = vsel %vm7636_vm11, %v1596_v57, %v1600_v43  ;;  %v1624_v19 = vrot.slane %v1622_v8, 5  ;;  %v1338_v32 = vsel %vm7680_vm14, %v6251_v21, %v1337_v25  ;;  %v2661_v34 = vld [vmem:[#allocation3 + $0xa8] sm:$0xff]  ;;  %v1524_v43 = vld [vmem:[#allocation2 + $0x44] sm:$0x1]  ;;  %v1661_v14 = vshrl.u32 %v1525_v9, 16 }
 0x106   : > { %v1991_v50 = vpop.permute.xlu1 %1990  ;;  %2450 = vst.msk [vmem:[#allocation3 + $0x18] sm:$0xff] %vm1205_vm15, %v2421_v49  ;;  %v6275_v18 = vcombine.low %v1601_v5, %v1611_v13  ;;  %v2655_v27 = vld [vmem:[#allocation3 + $0x78] sm:$0xff]  ;;  %v1646_v49 = vshll.u32 %v1523_v37, 16  ;;  %v1656_v57 = vshll.u32 %v1524_v43, 16  ;;  %v1346_v61 = vrot.slane %v1344_v62, 4 }
 0x107   : > { %2020 = vst.msk [vmem:[#allocation3 + $0x10] sm:$0xff] %vm1205_vm15, %v1991_v50  ;;  %6937 = vmatpush3.bf16.msra.mxu0 %v7123_v17  ;;  %v1242_v17 = vld [vmem:[#allocation2 + $0x68] sm:$0x1]  ;;  %v1629_v28 = vor.u32 %v1628_v20, %v1624_v19  ;;  %v1625_v41 = vsel %vm7636_vm11, %v1620_v31, %v1624_v19  ;;  %v1650_v50 = vshrl.u32 %v1523_v37, 16  ;;  %v1527_v13 = vld [vmem:[#allocation2 + $0x50] sm:$0x1] }
 0x108   : > { %v1340_v26 = vrot.slane %v1242_v17, 5  ;;  %1822 = vst.msk [vmem:[#allocation3 + $0x60] sm:$0xff] %vm861_vm1, %v6275_v18  ;;  %v1648_v58 = vrot.slane %v1646_v49, 5  ;;  %v1658_v6 = vrot.slane %v1656_v57, 5  ;;  %v1348_v18 = vsel %vm7680_vm14, %v1346_v61, %v1347_v3  ;;  %v1528_v31 = vld [vmem:[#allocation2 + $0x54] sm:$0xf] }
 0x109   : > { %v1481_v12 = vpop.permute.xlu0 %1480  ;;  %v1630_v35 = vrot.slane %v1629_v28, 4  ;;  %v1652_v59 = vrot.slane %v1650_v50, 4  ;;  %v1664_v19 = vshll.u32 %v1525_v9, 16  ;;  %v1663_v25 = vrot.slane %v1661_v14, 4  ;;  %v1533_v3 = vld [vmem:[#allocation2 + $0x68] sm:$0x1] }
 0x10a   : > { %3057 = vmatmul.mubr.bf16.gmra.mrb[8].mxu0 %v2650_v56  ;;  %1505 = vst.msk [vmem:[#allocation3 + $0xd0] sm:$0xff] %vm1205_vm15, %v1481_v12  ;;  %v1341_v42 = vsel %vm7680_vm14, %v1339_v33, %v1340_v26  ;;  %v1642_v56 = vrot.slane %v1640_v45, 5  ;;  %v2660_v4 = vld [vmem:[#allocation3 + $0xa0] sm:$0xff]  ;;  %v1526_v12 = vld [vmem:[#allocation2 + $0x4c] sm:$0xf]  ;;  %v1685_v37 = vshrl.u32 %v1528_v31, 16 }
 0x10b   : > { %3064 = vmatprep.mubr.bf16.mxu0 %v2656_v60  ;;  %v1635_v47 = vsel %vm7636_vm11, %v1630_v35, %v1634_v24  ;;  %v6261_v48 = vcombine.low %v1338_v32, %v1341_v42  ;;  %v6252_v60 = vrot.slane %v1243_v46, 9  ;;  %v1653_v5 = vor.u32 %v1652_v59, %v1648_v58  ;;  %v1529_v35 = vld [vmem:[#allocation2 + $0x58] sm:$0xf] }
 0x10c   : > { %v1186_v22 = vpop.permute.xlu1 %1185  ;;  %v6276_v53 = vcombine.low %v1625_v41, %v1635_v47  ;;  %v1643_v0 = vor.u32 %v1642_v56, %v1639_v54  ;;  %v1670_v20 = vshll.u32 %v1526_v12, 16  ;;  %v1674_v26 = vshrl.u32 %v1526_v12, 16 }
 0x10d   : > { %1211 = vst.msk [vmem:[#allocation3 + $0xc8] sm:$0xff] %vm1205_vm15, %v1186_v22  ;;  %v2643_v29 = vld [vmem:[#allocation3 + $0x18] sm:$0xff]  ;;  %v1345_v8 = vsel %vm7680_vm14, %v6252_v60, %v1344_v62  ;;  %v1654_v17 = vrot.slane %v1653_v5, 4  ;;  %v1666_v28 = vrot.slane %v1664_v19, 5  ;;  %v1688_v42 = vshll.u32 %v1528_v31, 16 }
 0x10e   : > { %v2642_v30 = vld [vmem:[#allocation3 + $0x10] sm:$0xff]  ;;  %3153 = vmatprep.mubr.bf16.mxu1 %v2643_v29  ;;  %1397 = vst.msk [vmem:[#allocation3 + $0x148] sm:$0xff] %vm861_vm1, %v6261_v48  ;;  %1823 = vst.msk [vmem:[#allocation3 + $0x88] sm:$0xff] %vm861_vm1, %v6276_v53  ;;  %v1644_v10 = vrot.slane %v1643_v0, 4  ;;  %v6262_v24 = vcombine.low %v1345_v8, %v1348_v18  ;;  %v1672_v29 = vrot.slane %v1670_v20, 5  ;;  %v1694_v43 = vshll.u32 %v1529_v35, 16 }
 0x10f   : > { %v2423_v38 = vpop.permute.xlu0 %2422  ;;  %3154 = vmatmul.mubr.bf16.vlgmr.msra.gmra.mrb[0].mxu1 %v2642_v30  ;;  %v1680_v30 = vshll.u32 %v1527_v13, 16  ;;  %v1687_v45 = vrot.slane %v1685_v37, 4  ;;  %v1698_v46 = vshrl.u32 %v1529_v35, 16  ;;  %v1704_v47 = vshll.u32 %v1530_v36, 16  ;;  %v1531_v60 = vld [vmem:[#allocation2 + $0x60] sm:$0xf] }
 0x110   : > { %v1993_v39 = vpop.permute.xlu1 %1992  ;;  %2451 = vst.msk [vmem:[#allocation3 + $0x40] sm:$0xff] %vm1205_vm15, %v2423_v38  ;;  %v1649_v23 = vsel %vm7636_vm11, %v1644_v10, %v1648_v58  ;;  %v1690_v49 = vrot.slane %v1688_v42, 5  ;;  %v1696_v50 = vrot.slane %v1694_v43, 5  ;;  %v1532_v62 = vld [vmem:[#allocation2 + $0x64] sm:$0xf]  ;;  %v1712_v5 = vshll.u32 %v1531_v60, 16 }
 0x111   : > { %2021 = vst.msk [vmem:[#allocation3 + $0x38] sm:$0xff] %vm1205_vm15, %v1993_v39  ;;  %v2666_v16 = vld [vmem:[#allocation3 + $0xd0] sm:$0xff]  ;;  %v1667_v39 = vor.u32 %v1666_v28, %v1663_v25  ;;  %v1682_v41 = vrot.slane %v1680_v30, 5  ;;  %v1700_v54 = vrot.slane %v1698_v46, 4  ;;  %v1706_v59 = vrot.slane %v1704_v47, 5 }
 0x112   : > { %3065 = vmatmul.mubr.bf16.gmra.mrb[12].mxu0 %v2655_v27  ;;  %v1659_v27 = vsel %vm7636_vm11, %v1654_v17, %v1658_v6  ;;  %1398 = vst.msk [vmem:[#allocation3 + $0x170] sm:$0xff] %vm861_vm1, %v6262_v24  ;;  %v1691_v58 = vor.u32 %v1690_v49, %v1687_v45  ;;  %v1718_v9 = vshll.u32 %v1532_v62, 16  ;;  %v1722_v10 = vshrl.u32 %v1532_v62, 16  ;;  %v1535_v25 = vld [vmem:[#allocation2 + $0x70] sm:$0xf] }
 0x113   : > { %3072 = vmatprep.mubr.bf16.mxu0 %v2661_v34  ;;  %v1483_v63 = vpop.permute.xlu0 %1482  ;;  %v6277_v33 = vcombine.low %v1649_v23, %v1659_v27  ;;  %v1676_v34 = vrot.slane %v1674_v26, 4  ;;  %v1668_v48 = vrot.slane %v1667_v39, 4  ;;  %v1701_v0 = vor.u32 %v1700_v54, %v1696_v50  ;;  %v1536_v26 = vld [vmem:[#allocation2 + $0x74] sm:$0x1]  ;;  %v2462_v49 = vld [vmem:[#allocation2 + $0x20] sm:$0x1] }
 0x114   : > { %1506 = vst.msk [vmem:[#allocation3 + $0xf8] sm:$0xff] %vm1205_vm15, %v1483_v63  ;;  %v2665_v52 = vld [vmem:[#allocation3 + $0xc8] sm:$0xff]  ;;  %v1692_v61 = vrot.slane %v1691_v58, 4  ;;  %v1720_v19 = vrot.slane %v1718_v9, 5  ;;  %v1724_v20 = vrot.slane %v1722_v10, 4  ;;  %v1746_v37 = vshrl.u32 %v1535_v25, 16 }
 0x115   : > { %1824 = vst.msk [vmem:[#allocation3 + $0xb0] sm:$0xff] %vm861_vm1, %v6277_v33  ;;  %v1677_v44 = vor.u32 %v1676_v34, %v1672_v29  ;;  %v1673_v57 = vsel %vm7636_vm11, %v1668_v48, %v1672_v29  ;;  %v1702_v13 = vrot.slane %v1701_v0, 4  ;;  %v1742_v33 = vshll.u32 %v1535_v25, 16  ;;  %v2461_v48 = vld [vmem:[#allocation2 + $0x1c] sm:$0xf] }
 0x116   : > { %v1188_v15 = vpop.permute.xlu1 %1187  ;;  %v1697_v18 = vsel %vm7636_vm11, %v1692_v61, %v1696_v50  ;;  %v1725_v31 = vor.u32 %v1724_v20, %v1720_v19  ;;  %v1748_v46 = vrot.slane %v1746_v37, 4  ;;  %v2522_v54 = vrot.slane %v2461_v48, 5  ;;  %v1539_v62 = vld [vmem:[#allocation2 + $0x80] sm:$0x1] }
 0x117   : > { %1212 = vst.msk [vmem:[#allocation3 + $0xf0] sm:$0xff] %vm1205_vm15, %v1188_v15  ;;  %v2648_v21 = vld [vmem:[#allocation3 + $0x40] sm:$0xff]  ;;  %v1678_v53 = vrot.slane %v1677_v44, 4  ;;  %v1714_v15 = vrot.slane %v1712_v5, 5  ;;  %v1744_v43 = vrot.slane %v1742_v33, 5  ;;  %v1776_v20 = vshll.u32 %v1539_v62, 16 }
 0x118   : > { %v2647_v22 = vld [vmem:[#allocation3 + $0x38] sm:$0xff]  ;;  %3161 = vmatprep.mubr.bf16.mxu1 %v2648_v21  ;;  %v2460_v44 = vld [vmem:[#allocation2 + $0x18] sm:$0xe]  ;;  %v2468_v33 = vld [vmem:[#allocation2 + $0x38] sm:$0x1] }
 0x119   : > { %3162 = vmatmul.mubr.bf16.gmra.mrb[4].mxu1 %v2647_v22  ;;  %v1683_v63 = vsel %vm7636_vm11, %v1678_v53, %v1682_v41  ;;  %v1534_v21 = vld [vmem:[#allocation2 + $0x6c] sm:$0xf]  ;;  %v1707_v22 = vsel %vm7636_vm11, %v1702_v13, %v1706_v59  ;;  %v1726_v41 = vrot.slane %v1725_v31, 4  ;;  %v6323_v53 = vrot.slane %v2460_v44, 9  ;;  %v2464_v13 = vld [vmem:[#allocation2 + $0x28] sm:$0xf] }
 0x11a   : > { %v2425_v32 = vpop.permute.xlu0 %2424  ;;  %3073 = vmatmul.mubr.bf16.gmra.mrb[16].mxu0 %v2660_v4  ;;  %v1995_v38 = vpop.permute.xlu1 %1994  ;;  %v1709_v4 = vshrl.u32 %v1531_v60, 16  ;;  %v6278_v8 = vcombine.low %v1673_v57, %v1683_v63  ;;  %v1733_v27 = vshrl.u32 %v1534_v21, 16  ;;  %v6279_v30 = vcombine.low %v1697_v18, %v1707_v22  ;;  %v1538_v60 = vld [vmem:[#allocation2 + $0x7c] sm:$0xf] }
 0x11b   : > { %2452 = vst.msk [vmem:[#allocation3 + $0x68] sm:$0xff] %vm1205_vm15, %v2425_v32  ;;  %3080 = vmatprep.mubr.bf16.mxu0 %v2666_v16  ;;  %2022 = vst.msk [vmem:[#allocation3 + $0x60] sm:$0xff] %vm1205_vm15, %v1995_v38  ;;  %v2671_v56 = vld [vmem:[#allocation3 + $0xf8] sm:$0xff]  ;;  %v1728_v16 = vshll.u32 %v1533_v3, 16  ;;  %v1736_v32 = vshll.u32 %v1534_v21, 16  ;;  %v1752_v38 = vshll.u32 %v1536_v26, 16  ;;  %v1749_v58 = vor.u32 %v1748_v46, %v1744_v43 }
 0x11c   : > { %v1711_v14 = vrot.slane %v1709_v4, 4  ;;  %1825 = vst.msk [vmem:[#allocation3 + $0xd8] sm:$0xff] %vm861_vm1, %v6278_v8  ;;  %v1735_v36 = vrot.slane %v1733_v27, 4  ;;  %1826 = vst.msk [vmem:[#allocation3 + $0x100] sm:$0xff] %vm861_vm1, %v6279_v30  ;;  %v2525_v59 = vrot.slane %v2462_v49, 5  ;;  %v2523_v3 = vsel %vm7680_vm14, %v6323_v53, %v2522_v54 }
 0x11d   : > { %v1730_v24 = vrot.slane %v1728_v16, 5  ;;  %v1738_v42 = vrot.slane %v1736_v32, 5  ;;  %v1754_v47 = vrot.slane %v1752_v38, 5  ;;  %v2524_v4 = vrot.slane %v2522_v54, 4  ;;  %v2465_v21 = vld [vmem:[#allocation2 + $0x2c] sm:$0x1] }
 0x11e   : > { %v1485_v51 = vpop.permute.xlu0 %1484  ;;  %v1715_v23 = vor.u32 %v1714_v15, %v1711_v14  ;;  %v2670_v34 = vld [vmem:[#allocation3 + $0xf0] sm:$0xff]  ;;  %v1750_v61 = vrot.slane %v1749_v58, 4  ;;  %v1766_v10 = vshll.u32 %v1538_v60, 16  ;;  %v2466_v26 = vld [vmem:[#allocation2 + $0x30] sm:$0xe]  ;;  %v1778_v31 = vrot.slane %v1776_v20, 5 }
 0x11f   : > { %1507 = vst.msk [vmem:[#allocation3 + $0x120] sm:$0xff] %vm1205_vm15, %v1485_v51  ;;  %v1731_v51 = vsel %vm7636_vm11, %v1726_v41, %v1730_v24  ;;  %v2526_v18 = vsel %vm7680_vm14, %v2524_v4, %v2525_v59  ;;  %v2467_v27 = vld [vmem:[#allocation2 + $0x34] sm:$0xf]  ;;  %v2529_v37 = vrot.slane %v2464_v13, 5  ;;  %v2532_v38 = vrot.slane %v2465_v21, 5 }
 0x120   : > { %v1190_v6 = vpop.permute.xlu1 %1189  ;;  %v1716_v35 = vrot.slane %v1715_v23, 4  ;;  %v1755_v22 = vsel %vm7636_vm11, %v1750_v61, %v1754_v47  ;;  %v6333_v23 = vcombine.low %v2523_v3, %v2526_v18  ;;  %v1768_v24 = vrot.slane %v1766_v10, 5  ;;  %v2470_v41 = vld [vmem:[#allocation2 + $0x40] sm:$0xf]  ;;  %v2471_v46 = vld [vmem:[#allocation2 + $0x44] sm:$0x1] }
 0x121   : > { %1213 = vst.msk [vmem:[#allocation3 + $0x118] sm:$0xff] %vm1205_vm15, %v1190_v6  ;;  %v2463_v6 = vld [vmem:[#allocation2 + $0x24] sm:$0xe]  ;;  %v2536_v44 = vrot.slane %v2467_v27, 5  ;;  %v2531_v49 = vrot.slane %v2529_v37, 4 }
 0x122   : > { %v2653_v12 = vld [vmem:[#allocation3 + $0x68] sm:$0xff]  ;;  %3081 = vmatmul.mubr.bf16.gmra.mrb[20].mxu0 %v2665_v52  ;;  %v2652_v17 = vld [vmem:[#allocation3 + $0x60] sm:$0xff]  ;;  %v1721_v45 = vsel %vm7636_vm11, %v1716_v35, %v1720_v19  ;;  %v1739_v52 = vor.u32 %v1738_v42, %v1735_v36  ;;  %v6324_v32 = vrot.slane %v2463_v6, 9  ;;  %2630 = vst.msk [vmem:[#allocation3 + $0x20] sm:$0xff] %vm861_vm1, %v6333_v23  ;;  %v2473_v58 = vld [vmem:[#allocation2 + $0x4c] sm:$0xf] }
 0x123   : > { %3169 = vmatprep.mubr.bf16.mxu1 %v2653_v12  ;;  %3088 = vmatprep.mubr.bf16.mxu0 %v2671_v56  ;;  %v1537_v56 = vld [vmem:[#allocation2 + $0x78] sm:$0xf]  ;;  %v6280_v57 = vcombine.low %v1721_v45, %v1731_v51  ;;  %v1770_v12 = vshrl.u32 %v1538_v60, 16  ;;  %v2539_v45 = vrot.slane %v2468_v33, 5  ;;  %v2472_v51 = vld [vmem:[#allocation2 + $0x48] sm:$0xe]  ;;  %v2533_v62 = vsel %vm7680_vm14, %v2531_v49, %v2532_v38 }
 0x124   : > { %3170 = vmatmul.mubr.bf16.gmra.mrb[8].mxu1 %v2652_v17  ;;  %v2427_v28 = vpop.permute.xlu0 %2426  ;;  %v1997_v29 = vpop.permute.xlu1 %1996  ;;  %v1757_v63 = vshrl.u32 %v1537_v56, 16  ;;  %v1740_v0 = vrot.slane %v1739_v52, 4  ;;  %v1760_v5 = vshll.u32 %v1537_v56, 16  ;;  %v2530_v48 = vsel %vm7680_vm14, %v6324_v32, %v2529_v37  ;;  %v2474_v59 = vld [vmem:[#allocation2 + $0x50] sm:$0x1] }
 0x125   : > { %2453 = vst.msk [vmem:[#allocation3 + $0x90] sm:$0xff] %vm1205_vm15, %v2427_v28  ;;  %2023 = vst.msk [vmem:[#allocation3 + $0x88] sm:$0xff] %vm1205_vm15, %v1997_v29  ;;  %v1772_v25 = vrot.slane %v1770_v12, 4  ;;  %v2538_v56 = vrot.slane %v2536_v44, 4  ;;  %v2475_v3 = vld [vmem:[#allocation2 + $0x54] sm:$0xe] }
 0x126   : > { %v2676_v39 = vld [vmem:[#allocation3 + $0x120] sm:$0xff]  ;;  %1827 = vst.msk [vmem:[#allocation3 + $0x128] sm:$0xff] %vm861_vm1, %v6280_v57  ;;  %v1759_v9 = vrot.slane %v1757_v63, 4  ;;  %v1745_v17 = vsel %vm7636_vm11, %v1740_v0, %v1744_v43  ;;  %v1762_v19 = vrot.slane %v1760_v5, 5  ;;  %v2543_v57 = vrot.slane %v2470_v41, 5 }
 0x127   : > { %v6281_v29 = vcombine.low %v1745_v17, %v1755_v22  ;;  %v1773_v36 = vor.u32 %v1772_v25, %v1768_v24  ;;  %v2546_v63 = vrot.slane %v2471_v46, 5  ;;  %v6327_v0 = vrot.slane %v2472_v51, 9  ;;  %v2476_v61 = vld [vmem:[#allocation2 + $0x58] sm:$0xf]  ;;  %v2478_v10 = vld [vmem:[#allocation2 + $0x60] sm:$0xe] }
 0x128   : > { %v1487_v50 = vpop.permute.xlu0 %1486  ;;  %v2675_v16 = vld [vmem:[#allocation3 + $0x118] sm:$0xff]  ;;  %v1763_v30 = vor.u32 %v1762_v19, %v1759_v9  ;;  %v6334_v5 = vcombine.low %v2530_v48, %v2533_v62  ;;  %v2540_v6 = vsel %vm7680_vm14, %v2538_v56, %v2539_v45  ;;  %v2477_v9 = vld [vmem:[#allocation2 + $0x5c] sm:$0x1]  ;;  %v2545_v13 = vrot.slane %v2543_v57, 4  ;;  %v2483_v41 = vld [vmem:[#allocation2 + $0x74] sm:$0x1] }
 0x129   : > { %1508 = vst.msk [vmem:[#allocation3 + $0x148] sm:$0xff] %vm1205_vm15, %v1487_v50  ;;  %v1774_v47 = vrot.slane %v1773_v36, 4  ;;  %v6328_v20 = vrot.slane %v2475_v3, 9  ;;  %v2557_v21 = vrot.slane %v2476_v61, 5  ;;  %v2560_v22 = vrot.slane %v2477_v9, 5 }
 0x12a   : > { %3089 = vmatmul.mubr.bf16.gmra.mrb[24].mxu0 %v2670_v34  ;;  %v2469_v34 = vld [vmem:[#allocation2 + $0x3c] sm:$0xe]  ;;  %1828 = vst.msk [vmem:[#allocation3 + $0x150] sm:$0xff] %vm861_vm1, %v6281_v29  ;;  %v1764_v43 = vrot.slane %v1763_v30, 4  ;;  %2631 = vst.msk [vmem:[#allocation3 + $0x48] sm:$0xff] %vm861_vm1, %v6334_v5  ;;  %v6329_v23 = vrot.slane %v2478_v10, 9  ;;  %v2547_v25 = vsel %vm7680_vm14, %v2545_v13, %v2546_v63 }
 0x12b   : > { %3096 = vmatprep.mubr.bf16.mxu0 %v2676_v39  ;;  %v1192_v8 = vpop.permute.xlu1 %1191  ;;  %v6325_v39 = vrot.slane %v2466_v26, 9  ;;  %v6326_v50 = vrot.slane %v2469_v34, 9  ;;  %v1779_v60 = vsel %vm7636_vm11, %v1774_v47, %v1778_v31  ;;  %v2558_v32 = vsel %vm7680_vm14, %v6328_v20, %v2557_v21  ;;  %v2482_v36 = vld [vmem:[#allocation2 + $0x70] sm:$0xf]  ;;  %v2488_v63 = vld [vmem:[#allocation2 + $0x88] sm:$0xf] }
 0x12c   : > { %1214 = vst.msk [vmem:[#allocation3 + $0x140] sm:$0xff] %vm1205_vm15, %v1192_v8  ;;  %v2658_v14 = vld [vmem:[#allocation3 + $0x90] sm:$0xff]  ;;  %v2657_v15 = vld [vmem:[#allocation3 + $0x88] sm:$0xff]  ;;  %v1769_v53 = vsel %vm7636_vm11, %v1764_v43, %v1768_v24  ;;  %v2559_v33 = vrot.slane %v2557_v21, 4  ;;  %v2571_v48 = vrot.slane %v2482_v36, 5  ;;  %v2574_v49 = vrot.slane %v2483_v41, 5 }
 0x12d   : > { %3177 = vmatprep.mubr.bf16.mxu1 %v2658_v14  ;;  %v2537_v54 = vsel %vm7680_vm14, %v6325_v39, %v2536_v44  ;;  %v6282_v4 = vcombine.low %v1769_v53, %v1779_v60  ;;  %v2544_v8 = vsel %vm7680_vm14, %v6326_v50, %v2543_v57  ;;  %v2550_v14 = vrot.slane %v2473_v58, 5  ;;  %v2484_v43 = vld [vmem:[#allocation2 + $0x78] sm:$0xe]  ;;  %v2485_v50 = vld [vmem:[#allocation2 + $0x7c] sm:$0xf]  ;;  %v2644_v13 = vld [vmem:[#allocation3 + $0x20] sm:$0xff] }
 0x12e   : > { %3178 = vmatmul.mubr.bf16.gmra.mrb[12].mxu1 %v2657_v15  ;;  %v6335_v12 = vcombine.low %v2537_v54, %v2540_v6  ;;  %v2553_v15 = vrot.slane %v2474_v59, 5  ;;  %v6336_v31 = vcombine.low %v2544_v8, %v2547_v25  ;;  %v2561_v47 = vsel %vm7680_vm14, %v2559_v33, %v2560_v22  ;;  %v2486_v53 = vld [vmem:[#allocation2 + $0x80] sm:$0x1]  ;;  %v2487_v57 = vld [vmem:[#allocation2 + $0x84] sm:$0xe] }
 0x12f   : > { %v2429_v28 = vpop.permute.xlu0 %2428  ;;  %v1999_v35 = vpop.permute.xlu1 %1998  ;;  %1829 = vst.msk [vmem:[#allocation3 + $0x178] sm:$0xff] %vm861_vm1, %v6282_v4  ;;  %v2551_v26 = vsel %vm7680_vm14, %v6327_v0, %v2550_v14  ;;  %v2552_v27 = vrot.slane %v2550_v14, 4  ;;  %v6338_v51 = vcombine.low %v2558_v32, %v2561_v47  ;;  %v6331_v54 = vrot.slane %v2484_v43, 9  ;;  %v2489_v0 = vld [vmem:[#allocation2 + $0x8c] sm:$0x1] }
 0x130   : > { %2454 = vst.msk [vmem:[#allocation3 + $0xb8] sm:$0xff] %vm1205_vm15, %v2429_v28  ;;  %2024 = vst.msk [vmem:[#allocation3 + $0xb0] sm:$0xff] %vm1205_vm15, %v1999_v35  ;;  %v2681_v42 = vld [vmem:[#allocation3 + $0x148] sm:$0xff]  ;;  %v2480_v28 = vld [vmem:[#allocation2 + $0x68] sm:$0x1]  ;;  %v2578_v56 = vrot.slane %v2485_v50, 5 }
 0x131   : > { %2632 = vst.msk [vmem:[#allocation3 + $0x70] sm:$0xff] %vm861_vm1, %v6335_v12  ;;  %v2567_v34 = vrot.slane %v2480_v28, 5  ;;  %v2481_v35 = vld [vmem:[#allocation2 + $0x6c] sm:$0xe]  ;;  %v2554_v37 = vsel %vm7680_vm14, %v2552_v27, %v2553_v15  ;;  %2633 = vst.msk [vmem:[#allocation3 + $0x98] sm:$0xff] %vm861_vm1, %v6336_v31  ;;  %v2573_v60 = vrot.slane %v2571_v48, 4 }
 0x132   : > { %3097 = vmatmul.mubr.bf16.gmra.mrb[28].mxu0 %v2675_v16  ;;  %v2479_v16 = vld [vmem:[#allocation2 + $0x64] sm:$0xf]  ;;  %v6337_v46 = vcombine.low %v2551_v26, %v2554_v37  ;;  %v2581_v62 = vrot.slane %v2486_v53, 5  ;;  %2635 = vst.msk [vmem:[#allocation3 + $0xe8] sm:$0xff] %vm861_vm1, %v6338_v51  ;;  %v2579_v3 = vsel %vm7680_vm14, %v6331_v54, %v2578_v56  ;;  %v2580_v4 = vrot.slane %v2578_v56, 4  ;;  %v2649_v26 = vld [vmem:[#allocation3 + $0x48] sm:$0xff] }
 0x133   : > { %v1489_v52 = vpop.permute.xlu0 %1488  ;;  %3104 = vmatprep.mubr.bf16.mxu0 %v2681_v42  ;;  %v2680_v19 = vld [vmem:[#allocation3 + $0x140] sm:$0xff]  ;;  %v2564_v29 = vrot.slane %v2479_v16, 5  ;;  %v6330_v42 = vrot.slane %v2481_v35, 9  ;;  %v6332_v5 = vrot.slane %v2487_v57, 9  ;;  %v2585_v6 = vrot.slane %v2488_v63, 5 }
 0x134   : > { %1509 = vst.msk [vmem:[#allocation3 + $0x170] sm:$0xff] %vm1205_vm15, %v1489_v52  ;;  %v2575_v10 = vsel %vm7680_vm14, %v2573_v60, %v2574_v49  ;;  %v2588_v12 = vrot.slane %v2489_v0, 5  ;;  %v2582_v15 = vsel %vm7680_vm14, %v2580_v4, %v2581_v62  ;;  %v3424_v47 = vld [vmem:[#allocation4 + $0xc] sm:$0x1]  ;;  %v3421_v49 = vld [vmem:[#allocation4] sm:$0x1] }
 0x135   : > { %v2565_v38 = vsel %vm7680_vm14, %v6329_v23, %v2564_v29  ;;  %v2566_v39 = vrot.slane %v2564_v29, 4  ;;  %2634 = vst.msk [vmem:[#allocation3 + $0xc0] sm:$0xff] %vm861_vm1, %v6337_v46  ;;  %v2572_v59 = vsel %vm7680_vm14, %v6330_v42, %v2571_v48  ;;  %v2586_v16 = vsel %vm7680_vm14, %v6332_v5, %v2585_v6  ;;  %v3454_v51 = vld [vmem:[#allocation4 + $0x14] sm:$0x1]  ;;  %v3430_v56 = vld [vmem:[#allocation4 + $0x24] sm:$0x1] }
 0x136   : > { %v1194_v17 = vpop.permute.xlu1 %1193  ;;  %v6340_v14 = vcombine.low %v2572_v59, %v2575_v10  ;;  %v3425_v48 = vsel %vm7406_vm2, 0, %v3424_v47  ;;  %v3422_v50 = vsel %vm7406_vm2, 0, %v3421_v49  ;;  %v3455_v53 = vsel %vm7424_vm4, 0, %v3454_v51  ;;  %v3460_v60 = vld [vmem:[#allocation4 + $0x2c] sm:$0x1] }
 0x137   : > { %v2663_v18 = vld [vmem:[#allocation3 + $0xb8] sm:$0xff]  ;;  %1215 = vst.msk [vmem:[#allocation3 + $0x168] sm:$0xff] %vm1205_vm15, %v1194_v17  ;;  %v2662_v24 = vld [vmem:[#allocation3 + $0xb0] sm:$0xff]  ;;  %v2568_v52 = vsel %vm7680_vm14, %v2566_v39, %v2567_v34  ;;  %v2587_v17 = vrot.slane %v2585_v6, 4  ;;  %3426 = vst [vmem:[#allocation4 + $0xc] sm:$0x1] %v3425_v48 }
 0x138   : > { %3185 = vmatprep.mubr.bf16.mxu1 %v2663_v18  ;;  %v6339_v58 = vcombine.low %v2565_v38, %v2568_v52  ;;  %2637 = vst.msk [vmem:[#allocation3 + $0x138] sm:$0xff] %vm861_vm1, %v6340_v14  ;;  %v2654_v27 = vld [vmem:[#allocation3 + $0x70] sm:$0xff]  ;;  %v2659_v32 = vld [vmem:[#allocation3 + $0x98] sm:$0xff]  ;;  %3423 = vst [vmem:[#allocation4] sm:$0x1] %v3422_v50  ;;  %v3431_v57 = vsel %vm7406_vm2, 0, %v3430_v56 }
 0x139   : > { %v2431_v30 = vpop.permute.xlu0 %2430  ;;  %3186 = vmatmul.mubr.bf16.gmra.mrb[16].mxu1 %v2662_v24  ;;  %v2589_v20 = vsel %vm7680_vm14, %v2587_v17, %v2588_v12  ;;  %v2669_v38 = vld [vmem:[#allocation3 + $0xe8] sm:$0xff]  ;;  %v3451_v52 = vld [vmem:[#allocation4 + $0x8] sm:$0x1]  ;;  %3456 = vst [vmem:[#allocation4 + $0x14] sm:$0x1] %v3455_v53  ;;  %v3461_v62 = vsel %vm7424_vm4, 0, %v3460_v60 }
 0x13a   : > { %2455 = vst.msk [vmem:[#allocation3 + $0xe0] sm:$0xff] %vm1205_vm15, %v2431_v30  ;;  %3105 = vmatmul.mubr.bf16.gmra.mrb[32].mxu0 %v2680_v19  ;;  %v2001_v44 = vpop.permute.xlu1 %2000  ;;  %v6341_v19 = vcombine.low %v2579_v3, %v2582_v15  ;;  %v6342_v22 = vcombine.low %v2586_v16, %v2589_v20  ;;  %v3452_v54 = vsel %vm7424_vm4, 0, %v3451_v52  ;;  %3432 = vst [vmem:[#allocation4 + $0x24] sm:$0x1] %v3431_v57  ;;  %v3457_v63 = vld [vmem:[#allocation4 + $0x20] sm:$0x1] }
 0x13b   : > { %v2686_v45 = vld [vmem:[#allocation3 + $0x170] sm:$0xff]  ;;  %2025 = vst.msk [vmem:[#allocation3 + $0xd8] sm:$0xff] %vm1205_vm15, %v2001_v44  ;;  %3453 = vst [vmem:[#allocation4 + $0x8] sm:$0x1] %v3452_v54  ;;  %v3458_v0 = vsel %vm7424_vm4, 0, %v3457_v63 }
 0x13c   : > { %3112 = vmatprep.mubr.bf16.mxu0 %v2686_v45  ;;  %2636 = vst.msk [vmem:[#allocation3 + $0x110] sm:$0xff] %vm861_vm1, %v6339_v58  ;;  %2638 = vst.msk [vmem:[#allocation3 + $0x160] sm:$0xff] %vm861_vm1, %v6341_v19  ;;  %v2664_v33 = vld [vmem:[#allocation3 + $0xc0] sm:$0xff]  ;;  %v3427_v58 = vld [vmem:[#allocation4 + $0x18] sm:$0x1] }
 0x13d   : > { %2639 = vst.msk [vmem:[#allocation3 + $0x188] sm:$0xff] %vm861_vm1, %v6342_v22  ;;  %v3428_v59 = vsel %vm7406_vm2, 0, %v3427_v58  ;;  %3462 = vst [vmem:[#allocation4 + $0x2c] sm:$0x1] %v3461_v62  ;;  %v3436_v3 = vld [vmem:[#allocation4 + $0x3c] sm:$0x1] }
 0x13e   : > { %v2433_v8 = vpop.permute.xlu0 %2432  ;;  %v2003_v61 = vpop.permute.xlu1 %2002  ;;  %v2685_v9 = vld [vmem:[#allocation3 + $0x168] sm:$0xff]  ;;  %3429 = vst [vmem:[#allocation4 + $0x18] sm:$0x1] %v3428_v59  ;;  %3459 = vst [vmem:[#allocation4 + $0x20] sm:$0x1] %v3458_v0  ;;  %v3437_v4 = vsel %vm7406_vm2, 0, %v3436_v3 }
 0x13f   : > { %2456 = vst.msk [vmem:[#allocation3 + $0x108] sm:$0xff] %vm1205_vm15, %v2433_v8  ;;  %2026 = vst.msk [vmem:[#allocation3 + $0x100] sm:$0xff] %vm1205_vm15, %v2003_v61  ;;  %v2679_v43 = vld [vmem:[#allocation3 + $0x138] sm:$0xff]  ;;  %v3433_v5 = vld [vmem:[#allocation4 + $0x30] sm:$0x1] }
 0x140   : > { %3438 = vst [vmem:[#allocation4 + $0x3c] sm:$0x1] %v3437_v4  ;;  %v3434_v6 = vsel %vm7406_vm2, 0, %v3433_v5  ;;  %v3466_v8 = vld [vmem:[#allocation4 + $0x44] sm:$0x1] }
 0x141   : > { %v2668_v18 = vld [vmem:[#allocation3 + $0xe0] sm:$0xff]  ;;  %3435 = vst [vmem:[#allocation4 + $0x30] sm:$0x1] %v3434_v6  ;;  %v3467_v61 = vsel %vm7424_vm4, 0, %v3466_v8  ;;  %v3439_v20 = vld [vmem:[#allocation4 + $0x48] sm:$0x1] }
 0x142   : > { %3193 = vmatprep.mubr.bf16.mxu1 %v2668_v18  ;;  %3113 = vmatmul.mubr.bf16.gmra.mrb[36].mxu0 %v2685_v9  ;;  %v2667_v21 = vld [vmem:[#allocation3 + $0xd8] sm:$0xff]  ;;  %3468 = vst [vmem:[#allocation4 + $0x44] sm:$0x1] %v3467_v61  ;;  %v3463_v9 = vld [vmem:[#allocation4 + $0x38] sm:$0x1] }
 0x143   : > { %6938 = vmatprep.mubr.msk.bf16.mxu0 %vm861_vm1, %v2644_v13  ;;  %3194 = vmatmul.mubr.bf16.gmra.mrb[20].mxu1 %v2667_v21  ;;  %v2674_v39 = vld [vmem:[#allocation3 + $0x110] sm:$0xff]  ;;  %v2684_v44 = vld [vmem:[#allocation3 + $0x160] sm:$0xff]  ;;  %v3464_v10 = vsel %vm7424_vm4, 0, %v3463_v9  ;;  %v3440_v21 = vsel %vm7406_vm2, 0, %v3439_v20  ;;  %v3475_v52 = vld [vmem:[#allocation4 + $0x68] sm:$0x1] }
 0x144   : > { %v2005_v23 = vpop.permute.xlu1 %2004  ;;  %v2689_v46 = vld [vmem:[#allocation3 + $0x188] sm:$0xff]  ;;  %3465 = vst [vmem:[#allocation4 + $0x38] sm:$0x1] %v3464_v10  ;;  %v3442_v16 = vld [vmem:[#allocation4 + $0x54] sm:$0x1]  ;;  %v3476_v58 = vsel %vm7424_vm4, 0, %v3475_v52 }
 0x145   : > { %v2435_v24 = vpop.permute.xlu0 %2434  ;;  %2027 = vst.msk [vmem:[#allocation3 + $0x128] sm:$0xff] %vm1205_vm15, %v2005_v23  ;;  %v3443_v18 = vsel %vm7406_vm2, 0, %v3442_v16  ;;  %3441 = vst [vmem:[#allocation4 + $0x48] sm:$0x1] %v3440_v21 }
 0x146   : > { %2457 = vst.msk [vmem:[#allocation3 + $0x130] sm:$0xff] %vm1205_vm15, %v2435_v24  ;;  %v2673_v25 = vld [vmem:[#allocation3 + $0x108] sm:$0xff]  ;;  %v2672_v28 = vld [vmem:[#allocation3 + $0x100] sm:$0xff]  ;;  %3444 = vst [vmem:[#allocation4 + $0x54] sm:$0x1] %v3443_v18 }
 0x147   : > { %3201 = vmatprep.mubr.bf16.mxu1 %v2673_v25  ;;  %v3472_v24 = vld [vmem:[#allocation4 + $0x5c] sm:$0x1]  ;;  %3477 = vst [vmem:[#allocation4 + $0x68] sm:$0x1] %v3476_v58 }
 0x14a   : > { %v2007_v29 = vpop.permute.xlu1 %2006  ;;  %6939 = vmatmul.mubr.msk.bf16.vlgmr.msra.gmra.mrb[40].mxu0 %vm861_vm1, %v2649_v26  ;;  %v2437_v30 = vpop.permute.xlu0 %2436 }
 0x14b   : > { %2028 = vst.msk [vmem:[#allocation3 + $0x150] sm:$0xff] %vm1205_vm15, %v2007_v29  ;;  %6942 = vmatprep.mubr.msk.bf16.mxu0 %vm861_vm1, %v2654_v27  ;;  %3202 = vmatmul.mubr.bf16.gmra.mrb[24].mxu1 %v2672_v28  ;;  %2458 = vst.msk [vmem:[#allocation3 + $0x158] sm:$0xff] %vm1205_vm15, %v2437_v30  ;;  %v3473_v27 = vsel %vm7424_vm4, 0, %v3472_v24  ;;  %v3469_v29 = vld [vmem:[#allocation4 + $0x50] sm:$0x1] }
 0x14c   : > { %v2677_v34 = vld [vmem:[#allocation3 + $0x128] sm:$0xff]  ;;  %3474 = vst [vmem:[#allocation4 + $0x5c] sm:$0x1] %v3473_v27 }
 0x14d   : > { %v2678_v31 = vld [vmem:[#allocation3 + $0x130] sm:$0xff] }
 0x14e   : > { %3209 = vmatprep.mubr.bf16.mxu1 %v2678_v31  ;;  %v3470_v31 = vsel %vm7424_vm4, 0, %v3469_v29 }
 0x14f   : > { %3471 = vst [vmem:[#allocation4 + $0x50] sm:$0x1] %v3470_v31 }
 0x150   : > { %v2009_v35 = vpop.permute.xlu1 %2008 }
 0x151   : > { %v2439_v36 = vpop.permute.xlu0 %2438  ;;  %2029 = vst.msk [vmem:[#allocation3 + $0x178] sm:$0xff] %vm1205_vm15, %v2009_v35 }
 0x152   : > { %6943 = vmatmul.mubr.msk.bf16.gmra.mrb[44].mxu0 %vm861_vm1, %v2659_v32  ;;  %2459 = vst.msk [vmem:[#allocation3 + $0x180] sm:$0xff] %vm1205_vm15, %v2439_v36  ;;  %v2683_v37 = vld [vmem:[#allocation3 + $0x158] sm:$0xff]  ;;  %v2682_v41 = vld [vmem:[#allocation3 + $0x150] sm:$0xff] }
 0x153   : > { %6946 = vmatprep.mubr.msk.bf16.mxu0 %vm861_vm1, %v2664_v33  ;;  %3210 = vmatmul.mubr.bf16.gmra.mrb[28].mxu1 %v2677_v34  ;;  %v3448_v32 = vld [vmem:[#allocation4 + $0x6c] sm:$0x1]  ;;  %v3445_v34 = vld [vmem:[#allocation4 + $0x60] sm:$0x1] }
 0x154   : > { %3217 = vmatprep.mubr.bf16.mxu1 %v2683_v37  ;;  %v3449_v33 = vsel %vm7406_vm2, 0, %v3448_v32  ;;  %v3446_v35 = vsel %vm7406_vm2, 0, %v3445_v34 }
 0x155   : > { %3450 = vst [vmem:[#allocation4 + $0x6c] sm:$0x1] %v3449_v33  ;;  %3447 = vst [vmem:[#allocation4 + $0x60] sm:$0x1] %v3446_v35 }
 0x158   : > { %v2687_v45 = vld [vmem:[#allocation3 + $0x178] sm:$0xff] }
 0x159   : > { %v2688_v42 = vld [vmem:[#allocation3 + $0x180] sm:$0xff] }
 0x15a   : > { %6947 = vmatmul.mubr.msk.bf16.gmra.mrb[48].mxu0 %vm861_vm1, %v2669_v38 }
 0x15b   : > { %6950 = vmatprep.mubr.msk.bf16.mxu0 %vm861_vm1, %v2674_v39  ;;  %3218 = vmatmul.mubr.bf16.gmra.mrb[32].mxu1 %v2682_v41  ;;  %v3478_v41 = vld [vmem:[#allocation4 + $0x74] sm:$0x1] }
 0x15c   : > { %3225 = vmatprep.mubr.bf16.mxu1 %v2688_v42 }
 0x162   : > { %6951 = vmatmul.mubr.msk.bf16.gmra.mrb[52].mxu0 %vm861_vm1, %v2679_v43  ;;  %v3479_v43 = vsel %vm7424_vm4, 0, %v3478_v41 }
 0x163   : > { %6954 = vmatprep.mubr.msk.bf16.mxu0 %vm861_vm1, %v2684_v44  ;;  %3226 = vmatmul.mubr.bf16.gmra.mrb[36].mxu1 %v2687_v45  ;;  %3480 = vst [vmem:[#allocation4 + $0x74] sm:$0x1] %v3479_v43 }
 0x16a   : > { %6955 = vmatmul.mubr.msk.bf16.gmra.mrb[56].mxu0 %vm861_vm1, %v2689_v46 }
 0x1cd   : > { %v6640_v12 = vpop.f32.mrb[0].mxu0 }
 0x1ce   : > { %v6641_v13 = vpop.f32.mrb[1].mxu0 }
 0x1cf   : > { %v6642_v14 = vadd.f32 %v6641_v13, %v6640_v12  ;;  %v6643_v15 = vpop.f32.mrb[2].mxu0 }
 0x1d0   : > { %v6644_v17 = vpop.f32.mrb[3].mxu0 }
 0x1d1   : > { %v6645_v19 = vadd.f32 %v6644_v17, %v6643_v15 }
 0x1d5   : > { %v6646_v22 = vpop.f32.mrb[4].mxu0 }
 0x1d6   : > { %v6647_v23 = vpop.f32.mrb[5].mxu0 }
 0x1d7   : > { %v6648_v25 = vadd.f32 %v6647_v23, %v6646_v22  ;;  %v6649_v26 = vpop.f32.mrb[6].mxu0 }
 0x1d8   : > { %v6650_v28 = vpop.f32.mrb[7].mxu0 }
 0x1d9   : > { %v6651_v30 = vadd.f32 %v6650_v28, %v6649_v26 }
 0x1dd   : > { %v6652_v36 = vpop.f32.mrb[8].mxu0 }
 0x1de   : > { %v6653_v37 = vpop.f32.mrb[9].mxu0 }
 0x1df   : > { %v6654_v38 = vadd.f32 %v6653_v37, %v6652_v36  ;;  %v6655_v39 = vpop.f32.mrb[10].mxu0 }
 0x1e0   : > { %v6656_v42 = vpop.f32.mrb[11].mxu0 }
 0x1e1   : > { %v6657_v44 = vadd.f32 %v6656_v42, %v6655_v39 }
 0x1e2   : > { %v6716_v45 = vpop.f32.mrb[0].mxu1 }
 0x1e3   : > { %v6717_v46 = vpop.f32.mrb[1].mxu1 }
 0x1e4   : > { %v6718_v47 = vadd.f32 %v6717_v46, %v6716_v45  ;;  %v6719_v48 = vpop.f32.mrb[2].mxu1 }
 0x1e5   : > { %v6658_v49 = vpop.f32.mrb[12].mxu0  ;;  %v6720_v50 = vpop.f32.mrb[3].mxu1 }
 0x1e6   : > { %v6659_v51 = vpop.f32.mrb[13].mxu0  ;;  %v6721_v53 = vadd.f32 %v6720_v50, %v6719_v48  ;;  %v8176_v57 = vadd.f32 %v6718_v47, %v6642_v14 }
 0x1e7   : > { %v6660_v54 = vadd.f32 %v6659_v51, %v6658_v49  ;;  %v6661_v56 = vpop.f32.mrb[14].mxu0 }
 0x1e8   : > { %v6662_v59 = vpop.f32.mrb[15].mxu0  ;;  %v8180_v62 = vadd.f32 %v6721_v53, %v6645_v19 }
 0x1e9   : > { %v6663_v60 = vadd.f32 %v6662_v59, %v6661_v56 }
 0x1ec   : > { %v6722_v63 = vpop.f32.mrb[4].mxu1 }
 0x1ed   : > { %v6664_v0 = vpop.f32.mrb[16].mxu0  ;;  %v6723_v3 = vpop.f32.mrb[5].mxu1 }
 0x1ee   : > { %v6665_v4 = vpop.f32.mrb[17].mxu0  ;;  %v6724_v5 = vadd.f32 %v6723_v3, %v6722_v63  ;;  %v6725_v6 = vpop.f32.mrb[6].mxu1 }
 0x1ef   : > { %v6666_v8 = vadd.f32 %v6665_v4, %v6664_v0  ;;  %v6667_v61 = vpop.f32.mrb[18].mxu0  ;;  %v6726_v9 = vpop.f32.mrb[7].mxu1 }
 0x1f0   : > { %v6668_v10 = vpop.f32.mrb[19].mxu0  ;;  %v6727_v12 = vadd.f32 %v6726_v9, %v6725_v6  ;;  %v8182_v14 = vadd.f32 %v6724_v5, %v6648_v25 }
 0x1f1   : > { %v6669_v13 = vadd.f32 %v6668_v10, %v6667_v61 }
 0x1f2   : > { %v8184_v11 = vadd.f32 %v6727_v12, %v6651_v30 }
 0x1f5   : > { %v6670_v15 = vpop.f32.mrb[20].mxu0 }
 0x1f6   : > { %v6671_v16 = vpop.f32.mrb[21].mxu0 }
 0x1f7   : > { %v6728_v17 = vpop.f32.mrb[8].mxu1  ;;  %v6672_v18 = vadd.f32 %v6671_v16, %v6670_v15  ;;  %v6673_v19 = vpop.f32.mrb[22].mxu0 }
 0x1f8   : > { %v6729_v20 = vpop.f32.mrb[9].mxu1  ;;  %v6674_v21 = vpop.f32.mrb[23].mxu0 }
 0x1f9   : > { %v6730_v22 = vadd.f32 %v6729_v20, %v6728_v17  ;;  %v6731_v23 = vpop.f32.mrb[10].mxu1  ;;  %v6675_v24 = vadd.f32 %v6674_v21, %v6673_v19 }
 0x1fa   : > { %v6732_v26 = vpop.f32.mrb[11].mxu1 }
 0x1fb   : > { %v6733_v27 = vadd.f32 %v6732_v26, %v6731_v23  ;;  %v8186_v28 = vadd.f32 %v6730_v22, %v6654_v38 }
 0x1fd   : > { %v6676_v29 = vpop.f32.mrb[24].mxu0  ;;  %v8188_v31 = vadd.f32 %v6733_v27, %v6657_v44 }
 0x1fe   : > { %v6677_v25 = vpop.f32.mrb[25].mxu0 }
 0x1ff   : > { %v8190_v30 = vadd.f32 %v6677_v25, %v6676_v29  ;;  %v6679_v32 = vpop.f32.mrb[26].mxu0 }
 0x200   : > { %v6680_v33 = vpop.f32.mrb[27].mxu0 }
 0x201   : > { %v8192_v34 = vadd.f32 %v6680_v33, %v6679_v32  ;;  %v6734_v35 = vpop.f32.mrb[12].mxu1  ;;  %v8227_v32 = vld [vmem:[%s9008_s3] ss:$0 sm:$0xff] }
 0x202   : > { %v6735_v36 = vpop.f32.mrb[13].mxu1 }
 0x203   : > { %v6736_v37 = vadd.f32 %v6735_v36, %v6734_v35  ;;  %v6737_v39 = vpop.f32.mrb[14].mxu1 }
 0x204   : > { %v6738_v41 = vpop.f32.mrb[15].mxu1 }
 0x205   : > { %v6682_v42 = vpop.f32.mrb[28].mxu0  ;;  %v6739_v43 = vadd.f32 %v6738_v41, %v6737_v39  ;;  %v8194_v38 = vadd.f32 %v6736_v37, %v6660_v54 }
 0x206   : > { %v6683_v45 = vpop.f32.mrb[29].mxu0 }
 0x207   : > { %v8196_v46 = vadd.f32 %v6683_v45, %v6682_v42  ;;  %v6685_v44 = vpop.f32.mrb[30].mxu0  ;;  %v8198_v48 = vadd.f32 %v6739_v43, %v6663_v60 }
 0x208   : > { %v6686_v47 = vpop.f32.mrb[31].mxu0 }
 0x209   : > { %v8200_v49 = vadd.f32 %v6686_v47, %v6685_v44 }
 0x20c   : > { %v6740_v50 = vpop.f32.mrb[16].mxu1 }
 0x20d   : > { %v6741_v51 = vpop.f32.mrb[17].mxu1  ;;  %v6688_v52 = vpop.f32.mrb[32].mxu0 }
 0x20e   : > { %v6742_v53 = vadd.f32 %v6741_v51, %v6740_v50  ;;  %v6743_v56 = vpop.f32.mrb[18].mxu1  ;;  %v6689_v58 = vpop.f32.mrb[33].mxu0 }
 0x20f   : > { %v6744_v59 = vpop.f32.mrb[19].mxu1  ;;  %v8202_v63 = vadd.f32 %v6689_v58, %v6688_v52  ;;  %v6691_v0 = vpop.f32.mrb[34].mxu0 }
 0x210   : > { %v6745_v54 = vadd.f32 %v6744_v59, %v6743_v56  ;;  %v6692_v3 = vpop.f32.mrb[35].mxu0  ;;  %v8204_v4 = vadd.f32 %v6742_v53, %v6666_v8 }
 0x211   : > { %v8206_v5 = vadd.f32 %v6692_v3, %v6691_v0 }
 0x212   : > { %v8208_v60 = vadd.f32 %v6745_v54, %v6669_v13  ;;  %v8219_v13 = vld [vmem:[%s9007_s2] ss:$0 sm:$0xff] }
 0x215   : > { %v6694_v6 = vpop.f32.mrb[36].mxu0 }
 0x216   : > { %v6695_v61 = vpop.f32.mrb[37].mxu0  ;;  %v6746_v9 = vpop.f32.mrb[20].mxu1 }
 0x217   : > { %v8210_v10 = vadd.f32 %v6695_v61, %v6694_v6  ;;  %v6697_v12 = vpop.f32.mrb[38].mxu0  ;;  %v6747_v15 = vpop.f32.mrb[21].mxu1 }
 0x218   : > { %v6698_v16 = vpop.f32.mrb[39].mxu0  ;;  %v6748_v17 = vadd.f32 %v6747_v15, %v6746_v9  ;;  %v6749_v19 = vpop.f32.mrb[22].mxu1 }
 0x219   : > { %v8212_v20 = vadd.f32 %v6698_v16, %v6697_v12  ;;  %v6750_v21 = vpop.f32.mrb[23].mxu1 }
 0x21a   : > { %v6751_v22 = vadd.f32 %v6750_v21, %v6749_v19  ;;  %v8214_v8 = vadd.f32 %v6748_v17, %v6672_v18 }
 0x21c   : > { %v8221_v26 = vadd.f32 %v6751_v22, %v6675_v24 }
 0x21d   : > { %v6940_v23 = vpop.f32.mrb[40].mxu0 }
 0x21e   : > { %v3277_v27 = vadd.f32 %v6940_v23, %v8182_v14  ;;  %v3268_v29 = vpop.f32.mrb[41].mxu0  ;;  %v6752_v25 = vpop.f32.mrb[24].mxu1 }
 0x21f   : > { %v3269_v18 = vadd.f32 %v3268_v29, %v8176_v57  ;;  %v6941_v33 = vpop.f32.mrb[42].mxu0  ;;  %v6753_v35 = vpop.f32.mrb[25].mxu1 }
 0x220   : > { %v3356_v36 = vmul.f32 %v8219_v13, %v3277_v27  ;;  %v3280_v37 = vadd.f32 %v6941_v33, %v8184_v11  ;;  %v3271_v39 = vpop.f32.mrb[43].mxu0  ;;  %v6754_v24 = vadd.f32 %v6753_v35, %v6752_v25  ;;  %v6755_v41 = vpop.f32.mrb[26].mxu1 }
 0x221   : > { %v3354_v14 = vmul.f32 %v8219_v13, %v3269_v18  ;;  %v3272_v42 = vadd.f32 %v3271_v39, %v8180_v62  ;;  %v6756_v43 = vpop.f32.mrb[27].mxu1 }
 0x222   : > { %v3383_v45 = vadd.f32 %v8227_v32, %v3356_v36  ;;  %v3357_v44 = vmul.f32 %v8219_v13, %v3280_v37  ;;  %v6757_v47 = vadd.f32 %v6756_v43, %v6755_v41  ;;  %v8239_v51 = vadd.f32 %v6754_v24, %v8190_v30  ;;  %v3748_v37 = vld [vmem:[#allocation4 + $0xc] sm:$0xf]  ;;  %v3741_v43 = vld [vmem:[#allocation4] sm:$0xf] }
 0x223   : > { %v3381_v57 = vadd.f32 %v8227_v32, %v3354_v14  ;;  %v3355_v50 = vmul.f32 %v8219_v13, %v3272_v42 }
 0x224   : > { %v3403_v11 = vmax.f32 %v3383_v45, 0.0  ;;  %v3384_v52 = vadd.f32 %v8227_v32, %v3357_v44  ;;  %v8244_v58 = vadd.f32 %v6757_v47, %v8192_v34 }
 0x225   : > { %v3401_v53 = vmax.f32 %v3381_v57, 0.0  ;;  %v3382_v56 = vadd.f32 %v8227_v32, %v3355_v50  ;;  %v6944_v62 = vpop.f32.mrb[44].mxu0  ;;  %v3752_v50 = vld [vmem:[#allocation4 + $0x14] sm:$0x1] }
 0x226   : > { %v6567_v59 = vpack.c.bf16 %v3403_v11, %v3403_v11  ;;  %v3404_v0 = vmax.f32 %v3384_v52, 0.0  ;;  %v3293_v54 = vadd.f32 %v6944_v62, %v8194_v38  ;;  %v3284_v3 = vpop.f32.mrb[45].mxu0  ;;  %v6758_v6 = vpop.f32.mrb[28].mxu1 }
 0x227   : > { %v6565_v61 = vpack.c.bf16 %v3401_v53, %v3401_v53  ;;  %v3402_v9 = vmax.f32 %v3382_v56, 0.0  ;;  %v3285_v30 = vadd.f32 %v3284_v3, %v8186_v28  ;;  %v8248_v12 = vpop.f32.mrb[46].mxu0  ;;  %v6759_v15 = vpop.f32.mrb[29].mxu1 }
 0x228   : > { %v3559_v16 = vshrl.u32 %v6567_v59, 16  ;;  %v3562_v17 = vshll.u32 %v6567_v59, 16  ;;  %v6568_v19 = vpack.c.bf16 %v3404_v0, %v3404_v0  ;;  %v3360_v21 = vmul.f32 %v8219_v13, %v3293_v54  ;;  %v3287_v34 = vpop.f32.mrb[47].mxu0  ;;  %v6761_v23 = vpop.f32.mrb[30].mxu1  ;;  %v3745_v0 = vld [vmem:[#allocation4 + $0x8] sm:$0x1] }
 0x229   : > { %v8251_v22 = vadd.f32 %v6759_v15, %v6758_v6  ;;  %v3542_v27 = vshrl.u32 %v6565_v61, 16  ;;  %v3545_v38 = vshll.u32 %v6565_v61, 16  ;;  %v6566_v29 = vpack.c.bf16 %v3402_v9, %v3402_v9  ;;  %v6762_v25 = vpop.f32.mrb[31].mxu1 }
 0x22a   : > { %v3561_v18 = vrot.slane %v3559_v16, 7  ;;  %v3567_v33 = vshrl.u32 %v6568_v19, 16  ;;  %v3570_v35 = vshll.u32 %v6568_v19, 16  ;;  %v3387_v28 = vadd.f32 %v8227_v32, %v3360_v21 }
 0x22b   : > { %v8254_v36 = vadd.f32 %v6762_v25, %v6761_v23  ;;  %v3544_v39 = vrot.slane %v3542_v27, 7  ;;  %v3550_v24 = vshrl.u32 %v6566_v29, 16  ;;  %v3553_v41 = vshll.u32 %v6566_v29, 16 }
 0x22c   : > { %v3564_v14 = vor.u32 %v3562_v17, %v3561_v18  ;;  %v3565_v42 = vrot.slane %v3561_v18, 4  ;;  %v3569_v45 = vrot.slane %v3567_v33, 7  ;;  %v3407_v44 = vmax.f32 %v3387_v28, 0.0 }
 0x22d   : > { %v3547_v47 = vor.u32 %v3545_v38, %v3544_v39  ;;  %v3548_v57 = vrot.slane %v3544_v39, 4  ;;  %v3552_v11 = vrot.slane %v3550_v24, 7  ;;  %v3358_v52 = vmul.f32 %v8219_v13, %v3285_v30  ;;  %v6948_v53 = vpop.f32.mrb[48].mxu0 }
 0x22e   : > { %v3749_v56 = vsel %vm7489_vm7, %v3564_v14, %v3748_v37  ;;  %v3572_v62 = vor.u32 %v3570_v35, %v3569_v45  ;;  %v3574_v59 = vrot.slane %v3569_v45, 4  ;;  %v6571_v54 = vpack.c.bf16 %v3407_v44, %v3407_v44  ;;  %v3300_v3 = vpop.f32.mrb[49].mxu0  ;;  %v6764_v6 = vpop.f32.mrb[32].mxu1 }
 0x22f   : > { %3750 = vst [vmem:[#allocation4 + $0xc] sm:$0xf] %v3749_v56  ;;  %v3742_v61 = vsel %vm7489_vm7, %v3547_v47, %v3741_v43  ;;  %v3555_v9 = vor.u32 %v3553_v41, %v3552_v11  ;;  %v3557_v15 = vrot.slane %v3552_v11, 4  ;;  %v3385_v16 = vadd.f32 %v8227_v32, %v3358_v52  ;;  %v6949_v17 = vpop.f32.mrb[50].mxu0  ;;  %v6765_v30 = vpop.f32.mrb[33].mxu1 }
 0x230   : > { %3743 = vst [vmem:[#allocation4] sm:$0xf] %v3742_v61  ;;  %v3573_v19 = vsel %vm7496_vm8, %v3565_v42, %v3572_v62  ;;  %v3753_v21 = vsel %vm7406_vm2, %v3574_v59, %v3752_v50  ;;  %v3593_v23 = vshrl.u32 %v6571_v54, 16  ;;  %v3596_v27 = vshll.u32 %v6571_v54, 16  ;;  %v3303_v38 = vpop.f32.mrb[51].mxu0  ;;  %v6767_v25 = vpop.f32.mrb[34].mxu1 }
 0x231   : > { %v8266_v29 = vadd.f32 %v6765_v30, %v6764_v6  ;;  %3751 = vst.msk [vmem:[#allocation4 + $0x10] sm:$0xf] %vm552_vm5, %v3573_v19  ;;  %3754 = vst [vmem:[#allocation4 + $0x14] sm:$0x1] %v3753_v21  ;;  %v3556_v18 = vsel %vm7496_vm8, %v3548_v57, %v3555_v9  ;;  %v3746_v33 = vsel %vm7406_vm2, %v3557_v15, %v3745_v0  ;;  %v3405_v35 = vmax.f32 %v3385_v16, 0.0  ;;  %v6768_v28 = vpop.f32.mrb[35].mxu1 }
 0x232   : > { %3744 = vst.msk [vmem:[#allocation4 + $0x4] sm:$0xf] %vm552_vm5, %v3556_v18  ;;  %3747 = vst [vmem:[#allocation4 + $0x8] sm:$0x1] %v3746_v33  ;;  %v8274_v37 = vrot.slane %v3593_v23, 7  ;;  %v3296_v39 = vadd.f32 %v8248_v12, %v8198_v48  ;;  %v3288_v24 = vadd.f32 %v3287_v34, %v8188_v31  ;;  %v3309_v41 = vadd.f32 %v6948_v53, %v8214_v8 }
 0x233   : > { %v8280_v14 = vadd.f32 %v6768_v28, %v6767_v25  ;;  %v3762_v42 = vld [vmem:[#allocation4 + $0x24] sm:$0xf]  ;;  %v6569_v43 = vpack.c.bf16 %v3405_v35, %v3405_v35  ;;  %v3301_v45 = vadd.f32 %v3300_v3, %v8204_v4  ;;  %v3312_v44 = vadd.f32 %v6949_v17, %v8221_v26  ;;  %v3755_v61 = vld [vmem:[#allocation4 + $0x18] sm:$0xf] }
 0x234   : > { %v3598_v47 = vor.u32 %v3596_v27, %v8274_v37  ;;  %v3599_v57 = vrot.slane %v8274_v37, 4  ;;  %v3361_v50 = vmul.f32 %v8219_v13, %v3296_v39  ;;  %v3359_v48 = vmul.f32 %v8219_v13, %v3288_v24 }
 0x235   : > { %v3576_v12 = vshrl.u32 %v6569_v43, 16  ;;  %v3579_v31 = vshll.u32 %v6569_v43, 16  ;;  %v3364_v8 = vmul.f32 %v8219_v13, %v3309_v41  ;;  %v3362_v34 = vmul.f32 %v8219_v13, %v3301_v45  ;;  %v6952_v11 = vpop.f32.mrb[52].mxu0 }
 0x236   : > { %v3763_v4 = vsel %vm7489_vm7, %v3598_v47, %v3762_v42  ;;  %v3388_v26 = vadd.f32 %v8227_v32, %v3361_v50  ;;  %v3386_v52 = vadd.f32 %v8227_v32, %v3359_v48  ;;  %v3365_v53 = vmul.f32 %v8219_v13, %v3312_v44  ;;  %v8295_v56 = vpop.f32.mrb[53].mxu0  ;;  %v6770_v62 = vpop.f32.mrb[36].mxu1  ;;  %v3766_v44 = vld [vmem:[#allocation4 + $0x2c] sm:$0x1] }
 0x237   : > { %3764 = vst [vmem:[#allocation4 + $0x24] sm:$0xf] %v3763_v4  ;;  %v3578_v59 = vrot.slane %v3576_v12, 7  ;;  %v3391_v0 = vadd.f32 %v8227_v32, %v3364_v8  ;;  %v3389_v54 = vadd.f32 %v8227_v32, %v3362_v34  ;;  %v3304_v3 = vadd.f32 %v3303_v38, %v8208_v60  ;;  %v8300_v6 = vpop.f32.mrb[54].mxu0  ;;  %v6771_v9 = vpop.f32.mrb[37].mxu1 }
 0x238   : > { %v3408_v15 = vmax.f32 %v3388_v26, 0.0  ;;  %v3406_v16 = vmax.f32 %v3386_v52, 0.0  ;;  %v3392_v17 = vadd.f32 %v8227_v32, %v3365_v53  ;;  %v3212_v30 = vadd.f32 %v8251_v22, %v8196_v46  ;;  %v8305_v19 = vpop.f32.mrb[55].mxu0  ;;  %v6773_v25 = vpop.f32.mrb[38].mxu1  ;;  %v3759_v4 = vld [vmem:[#allocation4 + $0x20] sm:$0x1] }
 0x239   : > { %v3581_v21 = vor.u32 %v3579_v31, %v3578_v59  ;;  %v3582_v23 = vrot.slane %v3578_v59, 4  ;;  %v8307_v27 = vadd.f32 %v6771_v9, %v6770_v62  ;;  %v3411_v18 = vmax.f32 %v3391_v0, 0.0  ;;  %v6774_v33 = vpop.f32.mrb[39].mxu1 }
 0x23a   : > { %v6572_v60 = vpack.c.bf16 %v3408_v15, %v3408_v15  ;;  %v6570_v38 = vpack.c.bf16 %v3406_v16, %v3406_v16  ;;  %v3409_v35 = vmax.f32 %v3389_v54, 0.0  ;;  %v3412_v28 = vmax.f32 %v3392_v17, 0.0  ;;  %v3776_v17 = vld [vmem:[#allocation4 + $0x3c] sm:$0xf] }
 0x23b   : > { %v3756_v39 = vsel %vm7489_vm7, %v3581_v21, %v3755_v61  ;;  %v8311_v24 = vadd.f32 %v6774_v33, %v6773_v25  ;;  %v6575_v41 = vpack.c.bf16 %v3411_v18, %v3411_v18  ;;  %v3363_v46 = vmul.f32 %v8219_v13, %v3304_v3 }
 0x23c   : > { %3757 = vst [vmem:[#allocation4 + $0x18] sm:$0xf] %v3756_v39  ;;  %v3601_v22 = vshrl.u32 %v6572_v60, 16  ;;  %v3604_v42 = vshll.u32 %v6572_v60, 16  ;;  %v3584_v43 = vshrl.u32 %v6570_v38, 16  ;;  %v3587_v45 = vshll.u32 %v6570_v38, 16 }
 0x23d   : > { %v3627_v47 = vshrl.u32 %v6575_v41, 16  ;;  %v3630_v50 = vshll.u32 %v6575_v41, 16  ;;  %v6573_v48 = vpack.c.bf16 %v3409_v35, %v3409_v35  ;;  %v6576_v12 = vpack.c.bf16 %v3412_v28, %v3412_v28  ;;  %v6956_v31 = vpop.f32.mrb[56].mxu0  ;;  %v3769_v28 = vld [vmem:[#allocation4 + $0x30] sm:$0xf] }
 0x23e   : > { %v3603_v8 = vrot.slane %v3601_v22, 7  ;;  %v3586_v34 = vrot.slane %v3584_v43, 7  ;;  %v3390_v26 = vadd.f32 %v8227_v32, %v3363_v46  ;;  %v3325_v52 = vadd.f32 %v6952_v11, %v3212_v30  ;;  %v8315_v53 = vpop.f32.mrb[57].mxu0  ;;  %v3780_v46 = vld [vmem:[#allocation4 + $0x44] sm:$0x1] }
 0x23f   : > { %v3629_v62 = vrot.slane %v3627_v47, 7  ;;  %v3610_v59 = vshrl.u32 %v6573_v48, 16  ;;  %v3613_v0 = vshll.u32 %v6573_v48, 16  ;;  %v3635_v54 = vshrl.u32 %v6576_v12, 16  ;;  %v8317_v3 = vpop.f32.mrb[58].mxu0 }
 0x240   : > { %v3606_v61 = vor.u32 %v3604_v42, %v3603_v8  ;;  %v3608_v9 = vrot.slane %v3603_v8, 4  ;;  %v3589_v15 = vor.u32 %v3587_v45, %v3586_v34  ;;  %v3591_v16 = vrot.slane %v3586_v34, 4  ;;  %v8319_v21 = vpop.f32.mrb[59].mxu0 }
 0x241   : > { %v3632_v25 = vor.u32 %v3630_v50, %v3629_v62  ;;  %v3633_v18 = vrot.slane %v3629_v62, 4  ;;  %v8321_v60 = vrot.slane %v3610_v59, 7  ;;  %v3637_v11 = vrot.slane %v3635_v54, 7 }
 0x242   : > { %v3607_v30 = vsel %vm7496_vm8, %v3599_v57, %v3606_v61  ;;  %v3767_v38 = vsel %vm7406_vm2, %v3608_v9, %v3766_v44  ;;  %v3590_v33 = vsel %vm7496_vm8, %v3582_v23, %v3589_v15  ;;  %v3760_v35 = vsel %vm7406_vm2, %v3591_v16, %v3759_v4 }
 0x243   : > { %3765 = vst.msk [vmem:[#allocation4 + $0x28] sm:$0xf] %vm552_vm5, %v3607_v30  ;;  %3768 = vst [vmem:[#allocation4 + $0x2c] sm:$0x1] %v3767_v38  ;;  %v3777_v37 = vsel %vm7489_vm7, %v3632_v25, %v3776_v17  ;;  %v3615_v57 = vor.u32 %v3613_v0, %v8321_v60  ;;  %v3616_v39 = vrot.slane %v8321_v60, 4  ;;  %v3638_v41 = vshll.u32 %v6576_v12, 16 }
 0x244   : > { %3758 = vst.msk [vmem:[#allocation4 + $0x1c] sm:$0xf] %vm552_vm5, %v3590_v33  ;;  %3761 = vst [vmem:[#allocation4 + $0x20] sm:$0x1] %v3760_v35  ;;  %v3642_v23 = vrot.slane %v3637_v11, 4  ;;  %v3410_v22 = vmax.f32 %v3390_v26, 0.0  ;;  %v3368_v42 = vmul.f32 %v8219_v13, %v3325_v52  ;;  %v3317_v43 = vadd.f32 %v8295_v56, %v8239_v51 }
 0x245   : > { %3778 = vst [vmem:[#allocation4 + $0x3c] sm:$0xf] %v3777_v37  ;;  %v3770_v45 = vsel %vm7489_vm7, %v3615_v57, %v3769_v28  ;;  %v3640_v44 = vor.u32 %v3638_v41, %v3637_v11  ;;  %v3215_v47 = vadd.f32 %v8254_v36, %v8200_v49  ;;  %v3320_v50 = vadd.f32 %v8305_v19, %v8244_v58 }
 0x246   : > { %3771 = vst [vmem:[#allocation4 + $0x30] sm:$0xf] %v3770_v45  ;;  %v3781_v48 = vsel %vm7406_vm2, %v3642_v23, %v3780_v46  ;;  %v6574_v12 = vpack.c.bf16 %v3410_v22, %v3410_v22  ;;  %v3395_v8 = vadd.f32 %v8227_v32, %v3368_v42  ;;  %v3366_v34 = vmul.f32 %v8219_v13, %v3317_v43 }
 0x247   : > { %v3641_v51 = vsel %vm7496_vm8, %v3633_v18, %v3640_v44  ;;  %3782 = vst [vmem:[#allocation4 + $0x44] sm:$0x1] %v3781_v48  ;;  %v3328_v56 = vadd.f32 %v8300_v6, %v3215_v47  ;;  %v3367_v49 = vmul.f32 %v8219_v13, %v3320_v50  ;;  %v3228_v58 = vadd.f32 %v8307_v27, %v8210_v10  ;;  %v3773_v27 = vld [vmem:[#allocation4 + $0x38] sm:$0x1]  ;;  %v3783_v47 = vld [vmem:[#allocation4 + $0x48] sm:$0xf] }
 0x248   : > { %3779 = vst.msk [vmem:[#allocation4 + $0x40] sm:$0xf] %vm552_vm5, %v3641_v51  ;;  %v3618_v36 = vshrl.u32 %v6574_v12, 16  ;;  %v3621_v19 = vshll.u32 %v6574_v12, 16  ;;  %v3415_v4 = vmax.f32 %v3395_v8, 0.0  ;;  %v3393_v26 = vadd.f32 %v8227_v32, %v3366_v34 }
 0x249   : > { %v3369_v52 = vmul.f32 %v8219_v13, %v3328_v56  ;;  %v3394_v62 = vadd.f32 %v8227_v32, %v3367_v49  ;;  %v3341_v59 = vadd.f32 %v6956_v31, %v3228_v58  ;;  %v3220_v6 = vadd.f32 %v8266_v29, %v8202_v63  ;;  %v3787_v49 = vld [vmem:[#allocation4 + $0x50] sm:$0x1]  ;;  %v3794_v58 = vld [vmem:[#allocation4 + $0x5c] sm:$0x1] }
 0x24a   : > { %v3620_v0 = vrot.slane %v3618_v36, 7  ;;  %v6579_v54 = vpack.c.bf16 %v3415_v4, %v3415_v4  ;;  %v3413_v61 = vmax.f32 %v3393_v26, 0.0  ;;  %v3231_v10 = vadd.f32 %v8311_v24, %v8212_v20 }
 0x24b   : > { %v3396_v9 = vadd.f32 %v8227_v32, %v3369_v52  ;;  %v3414_v15 = vmax.f32 %v3394_v62, 0.0  ;;  %v3372_v16 = vmul.f32 %v8219_v13, %v3341_v59  ;;  %v3333_v17 = vadd.f32 %v8315_v53, %v3220_v6  ;;  %v3790_v53 = vld [vmem:[#allocation4 + $0x54] sm:$0xf] }
 0x24c   : > { %v3623_v25 = vor.u32 %v3621_v19, %v3620_v0  ;;  %v3625_v18 = vrot.slane %v3620_v0, 4  ;;  %v3661_v31 = vshrl.u32 %v6579_v54, 16  ;;  %v3664_v60 = vshll.u32 %v6579_v54, 16 }
 0x24d   : > { %v6577_v11 = vpack.c.bf16 %v3413_v61, %v3413_v61  ;;  %v3416_v63 = vmax.f32 %v3396_v9, 0.0  ;;  %v6578_v29 = vpack.c.bf16 %v3414_v15, %v3414_v15  ;;  %v3399_v30 = vadd.f32 %v8227_v32, %v3372_v16  ;;  %v3804_v9 = vld [vmem:[#allocation4 + $0x6c] sm:$0xf] }
 0x24e   : > { %v3624_v20 = vsel %vm7496_vm8, %v3616_v39, %v3623_v25  ;;  %v3774_v24 = vsel %vm7406_vm2, %v3625_v18, %v3773_v27  ;;  %v3663_v38 = vrot.slane %v3661_v31, 7  ;;  %v3370_v33 = vmul.f32 %v8219_v13, %v3333_v17 }
 0x24f   : > { %3772 = vst.msk [vmem:[#allocation4 + $0x34] sm:$0xf] %vm552_vm5, %v3624_v20  ;;  %3775 = vst [vmem:[#allocation4 + $0x38] sm:$0x1] %v3774_v24  ;;  %v3644_v35 = vshrl.u32 %v6577_v11, 16  ;;  %v3647_v28 = vshll.u32 %v6577_v11, 16  ;;  %v6580_v37 = vpack.c.bf16 %v3416_v63, %v3416_v63  ;;  %v3344_v12 = vadd.f32 %v8317_v3, %v3231_v10 }
 0x250   : > { %v3652_v57 = vshrl.u32 %v6578_v29, 16  ;;  %v3666_v41 = vor.u32 %v3664_v60, %v3663_v38  ;;  %v3667_v46 = vrot.slane %v3663_v38, 4  ;;  %v3655_v23 = vshll.u32 %v6578_v29, 16  ;;  %v3797_v63 = vld [vmem:[#allocation4 + $0x60] sm:$0xf] }
 0x251   : > { %v3419_v22 = vmax.f32 %v3399_v30, 0.0  ;;  %v3646_v42 = vrot.slane %v3644_v35, 7  ;;  %v3669_v39 = vshrl.u32 %v6580_v37, 16  ;;  %v3672_v43 = vshll.u32 %v6580_v37, 16 }
 0x252   : > { %v3654_v45 = vrot.slane %v3652_v57, 7  ;;  %v3791_v44 = vsel %vm7489_vm7, %v3666_v41, %v3790_v53  ;;  %v3397_v48 = vadd.f32 %v8227_v32, %v3370_v33  ;;  %v3373_v61 = vmul.f32 %v8219_v13, %v3344_v12 }
 0x253   : > { %v6583_v50 = vpack.c.bf16 %v3419_v22, %v3419_v22  ;;  %3792 = vst [vmem:[#allocation4 + $0x54] sm:$0xf] %v3791_v44  ;;  %v3649_v8 = vor.u32 %v3647_v28, %v3646_v42  ;;  %v3650_v34 = vrot.slane %v3646_v42, 4  ;;  %v3671_v51 = vrot.slane %v3669_v39, 7  ;;  %v3808_v28 = vld [vmem:[#allocation4 + $0x74] sm:$0x1] }
 0x254   : > { %v3657_v56 = vor.u32 %v3655_v23, %v3654_v45  ;;  %v3659_v36 = vrot.slane %v3654_v45, 4  ;;  %v3417_v26 = vmax.f32 %v3397_v48, 0.0  ;;  %v3223_v15 = vadd.f32 %v8280_v14, %v8206_v5  ;;  %v3801_v22 = vld [vmem:[#allocation4 + $0x68] sm:$0x1] }
 0x255   : > { %v3695_v19 = vshrl.u32 %v6583_v50, 16  ;;  %v3698_v4 = vshll.u32 %v6583_v50, 16  ;;  %v3784_v52 = vsel %vm7489_vm7, %v3649_v8, %v3783_v47  ;;  %v3674_v62 = vor.u32 %v3672_v43, %v3671_v51 }
 0x256   : > { %v3676_v59 = vrot.slane %v3671_v51, 4  ;;  %v3658_v6 = vsel %vm7496_vm8, %v3650_v34, %v3657_v56  ;;  %3785 = vst [vmem:[#allocation4 + $0x48] sm:$0xf] %v3784_v52  ;;  %v3788_v3 = vsel %vm7406_vm2, %v3659_v36, %v3787_v49  ;;  %v6581_v54 = vpack.c.bf16 %v3417_v26, %v3417_v26 }
 0x257   : > { %3786 = vst.msk [vmem:[#allocation4 + $0x4c] sm:$0xf] %vm552_vm5, %v3658_v6  ;;  %v3697_v0 = vrot.slane %v3695_v19, 7  ;;  %v3675_v10 = vsel %vm7496_vm8, %v3667_v46, %v3674_v62  ;;  %3789 = vst [vmem:[#allocation4 + $0x50] sm:$0x1] %v3788_v3  ;;  %v3400_v25 = vadd.f32 %v8227_v32, %v3373_v61  ;;  %v3336_v18 = vadd.f32 %v8319_v21, %v3223_v15 }
 0x258   : > { %v3795_v27 = vsel %vm7406_vm2, %v3676_v59, %v3794_v58  ;;  %3793 = vst.msk [vmem:[#allocation4 + $0x58] sm:$0xf] %vm552_vm5, %v3675_v10  ;;  %v3678_v17 = vshrl.u32 %v6581_v54, 16  ;;  %v3681_v11 = vshll.u32 %v6581_v54, 16  ;;  %v7286_v47 = vmov (!%p6210_p13), 0  }
 0x259   : > { %3796 = vst [vmem:[#allocation4 + $0x5c] sm:$0x1] %v3795_v27  ;;  %v3700_v16 = vor.u32 %v3698_v4, %v3697_v0  ;;  %v3420_v29 = vmax.f32 %v3400_v25, 0.0  ;;  %v3371_v30 = vmul.f32 %v8219_v13, %v3336_v18  ;;  %v3701_v37 = vrot.slane %v3697_v0, 4  ;;  %3814 = vst.msk [vmem:[#allocation4] sm:$0xf] (!%p6210_p13), %vm552_vm5, %v7286_v47 }
 0x25a   : > { %v3680_v60 = vrot.slane %v3678_v17, 7  ;;  %3815 = vst.msk [vmem:[#allocation4 + $0x4] sm:$0xf] (!%p6210_p13), %vm552_vm5, %v7286_v47 }
 0x25b   : > { %v3805_v31 = vsel %vm7489_vm7, %v3700_v16, %v3804_v9  ;;  %v6584_v14 = vpack.c.bf16 %v3420_v29, %v3420_v29  ;;  %v3398_v20 = vadd.f32 %v8227_v32, %v3371_v30  ;;  %3817 = vst.msk [vmem:[#allocation4 + $0x8] sm:$0x1] (!%p6210_p13), %vm293_vm0, %v7286_v47 }
 0x25c   : > { %3806 = vst [vmem:[#allocation4 + $0x6c] sm:$0xf] %v3805_v31  ;;  %v3683_v5 = vor.u32 %v3681_v11, %v3680_v60  ;;  %v3684_v42 = vrot.slane %v3680_v60, 4 }
 0x25d   : > { %v3703_v38 = vshrl.u32 %v6584_v14, 16  ;;  %v3418_v21 = vmax.f32 %v3398_v20, 0.0  ;;  %v3706_v53 = vshll.u32 %v6584_v14, 16 }
 0x25e   : > { %v3798_v24 = vsel %vm7489_vm7, %v3683_v5, %v3797_v63 }
 0x25f   : > { %3799 = vst [vmem:[#allocation4 + $0x60] sm:$0xf] %v3798_v24  ;;  %v3705_v33 = vrot.slane %v3703_v38, 7  ;;  %v6582_v35 = vpack.c.bf16 %v3418_v21, %v3418_v21 }
 0x261   : > { %v3708_v57 = vor.u32 %v3706_v53, %v3705_v33  ;;  %v3710_v41 = vrot.slane %v3705_v33, 4  ;;  %v3686_v46 = vshrl.u32 %v6582_v35, 16  ;;  %v3689_v2 = vshll.u32 %v6582_v35, 16 }
 0x262   : > { %3813 = sbr.rel (%p6210_p13) target bundleno = 617 (0x269), region = 68 }
 0x263   : > { %v3709_v13 = vsel %vm7496_vm8, %v3701_v37, %v3708_v57  ;;  %v3809_v32 = vsel %vm7406_vm2, %v3710_v41, %v3808_v28  ;;  %v3688_v23 = vrot.slane %v3686_v46, 7 }
 0x264   : > { %3807 = vst.msk [vmem:[#allocation4 + $0x70] sm:$0xf] %vm552_vm5, %v3709_v13  ;;  %3810 = vst [vmem:[#allocation4 + $0x74] sm:$0x1] %v3809_v32 }
 0x265   : > { %v3691_v39 = vor.u32 %v3689_v2, %v3688_v23  ;;  %v3693_v43 = vrot.slane %v3688_v23, 4 }
 0x267   : > { %v3692_v45 = vsel %vm7496_vm8, %v3684_v42, %v3691_v39  ;;  %v3802_v44 = vsel %vm7406_vm2, %v3693_v43, %v3801_v22 }
 0x268   : > { %3800 = vst.msk [vmem:[#allocation4 + $0x64] sm:$0xf] %vm552_vm5, %v3692_v45  ;;  %3803 = vst [vmem:[#allocation4 + $0x68] sm:$0x1] %v3802_v44 }
 0x269 PF: > { %3820 = sbr.rel (%p6215_p1) target bundleno = 624 (0x270), region = 72  ;;  %v7287_v7 = vmov (!%p6215_p1), 0  }
 0x26a   : > { %3822 = vst.msk [vmem:[#allocation4 + $0x6c] sm:$0xf] (!%p6215_p1), %vm552_vm5, %v7287_v7  ;;  %3823 = vst.msk [vmem:[#allocation4 + $0x70] sm:$0xf] (!%p6215_p1), %vm552_vm5, %v7287_v7 }
 0x26b   : > { %3825 = vst.msk [vmem:[#allocation4 + $0x74] sm:$0x1] (!%p6215_p1), %vm293_vm0, %v7287_v7 }
 0x270 PF: > { %v7127_v1 = vld [vmem:[#allocation4 + $0x18] sm:$0xff]   ;;  %v7128_v50 = vld [vmem:[#allocation4 + $0xc] sm:$0xff]   ;;  %v3903_v8 = vld [vmem:[#allocation4 + $0x14] sm:$0x1]  ;;  %s6116_s13 = sshll.u32 %s7567_s23, 4  ;;  %s7288_s10 = smov [#allocation6]   ;;  %s8943_s13 = int_to_ptr.vmem [resolvable:$true] %s6116_s13 }
 0x271   : > { %4373 = vrot.lane.b32.xlu1 %v7127_v1, %s7285_s22  ;;  %v3901_v48 = vld [vmem:[#allocation4 + $0xc] sm:$0xf]  ;;  %v3902_v12 = vld [vmem:[#allocation4 + $0x10] sm:$0xf]  ;;  %4371 = vrot.lane.b32.xlu0 %v7128_v50, %s7285_s22  ;;  %v3898_v58 = vld [vmem:[#allocation4] sm:$0xf] }
 0x272   : > { %v3947_v34 = vshrl.u32 %v3901_v48, 16  ;;  %v3950_v51 = vshll.u32 %v3901_v48, 16  ;;  %v3956_v56 = vshll.u32 %v3902_v12, 16  ;;  %v3960_v49 = vshrl.u32 %v3902_v12, 16  ;;  %v3899_v19 = vld [vmem:[#allocation4 + $0x4] sm:$0xf] }
 0x273   : > { %v3966_v36 = vshll.u32 %v3903_v8, 16  ;;  %v3900_v4 = vld [vmem:[#allocation4 + $0x8] sm:$0x1]  ;;  %v3923_v26 = vshrl.u32 %v3898_v58, 16  ;;  %v3904_v3 = vld [vmem:[#allocation4 + $0x18] sm:$0xf] }
 0x274   : > { %v3949_v52 = vrot.slane %v3947_v34, 4  ;;  %v3952_v62 = vrot.slane %v3950_v51, 5  ;;  %v3958_v59 = vrot.slane %v3956_v56, 5  ;;  %v3962_v6 = vrot.slane %v3960_v49, 4  ;;  %v3905_v17 = vld [vmem:[#allocation4 + $0x1c] sm:$0xf] }
 0x275   : > { %v3968_v0 = vrot.slane %v3966_v36, 5  ;;  %v3925_v54 = vrot.slane %v3923_v26, 4  ;;  %v3926_v61 = vshll.u32 %v3898_v58, 16  ;;  %v3932_v10 = vshll.u32 %v3899_v19, 16  ;;  %v3906_v5 = vld [vmem:[#allocation4 + $0x20] sm:$0x1] }
 0x276   : > { %v3953_v27 = vor.u32 %v3952_v62, %v3949_v52  ;;  %v3963_v9 = vor.u32 %v3962_v6, %v3958_v59  ;;  %v3936_v15 = vshrl.u32 %v3899_v19, 16  ;;  %v3942_v16 = vshll.u32 %v3900_v4, 16  ;;  %v3907_v21 = vld [vmem:[#allocation4 + $0x24] sm:$0xf]  ;;  %v3908_v37 = vld [vmem:[#allocation4 + $0x28] sm:$0xf] }
 0x277   : > { %v3928_v25 = vrot.slane %v3926_v61, 5  ;;  %v3934_v18 = vrot.slane %v3932_v10, 5  ;;  %v3971_v31 = vshrl.u32 %v3904_v3, 16  ;;  %v3974_v60 = vshll.u32 %v3904_v3, 16  ;;  %v3909_v22 = vld [vmem:[#allocation4 + $0x2c] sm:$0x1] }
 0x278   : > { %v3954_v11 = vrot.slane %v3953_v27, 4  ;;  %v3964_v63 = vrot.slane %v3963_v9, 4  ;;  %v3938_v29 = vrot.slane %v3936_v15, 4  ;;  %v3944_v30 = vrot.slane %v3942_v16, 5  ;;  %v4892_v47 = vld [vmem:[#allocation4 + $0x18] sm:$0xf] }
 0x279   : > { %v3929_v14 = vor.u32 %v3928_v25, %v3925_v54  ;;  %v3973_v20 = vrot.slane %v3971_v31, 4  ;;  %v3976_v24 = vrot.slane %v3974_v60, 5  ;;  %v3980_v38 = vshll.u32 %v3905_v17, 16  ;;  %v4893_v12 = vld [vmem:[#allocation4 + $0x1c] sm:$0xf]  ;;  %v7129_v52 = vld [vmem:[#allocation4 + $0x24] sm:$0xff]  }
 0x27a   : > { %v3959_v33 = vsel %vm7636_vm11, %v3954_v11, %v3958_v59  ;;  %v3969_v53 = vsel %vm7636_vm11, %v3964_v63, %v3968_v0  ;;  %v3939_v35 = vor.u32 %v3938_v29, %v3934_v18  ;;  %v3984_v28 = vshrl.u32 %v3905_v17, 16  ;;  %v4894_v49 = vld [vmem:[#allocation4 + $0x20] sm:$0x1]  ;;  %v4659_v26 = vld [vmem:[#allocation4 + $0xc] sm:$0xe] }
 0x27b   : > { %v6422_v57 = vcombine.low %v3959_v33, %v3969_v53  ;;  %v3930_v41 = vrot.slane %v3929_v14, 4  ;;  %v3977_v46 = vor.u32 %v3976_v24, %v3973_v20  ;;  %v3982_v13 = vrot.slane %v3980_v38, 5  ;;  %v4660_v0 = vld [vmem:[#allocation4 + $0x10] sm:$0xf]  ;;  %v4661_v9 = vld [vmem:[#allocation4 + $0x14] sm:$0x1] }
 0x27c   : > { %v3940_v32 = vrot.slane %v3939_v35, 4  ;;  %v3986_v23 = vrot.slane %v3984_v28, 4  ;;  %v3990_v2 = vshll.u32 %v3906_v5, 16  ;;  %v3995_v42 = vshrl.u32 %v3907_v21, 16  ;;  %v7135_v15 = vld [vmem:[%s9009_s4 + $0x40] sm:$0xff]   ;;  %v7137_v5 = vld [vmem:[%s9009_s4 + $0x48] sm:$0xff]  }
 0x27d   : > { %4140 = vrot.lane.b32.xlu1 %v6422_v57, %s7285_s22  ;;  %v3935_v39 = vsel %vm7636_vm11, %v3930_v41, %v3934_v18  ;;  %v3978_v43 = vrot.slane %v3977_v46, 4  ;;  %v3998_v45 = vshll.u32 %v3907_v21, 16  ;;  %v4004_v44 = vshll.u32 %v3908_v37, 16  ;;  %v3910_v31 = vld [vmem:[#allocation4 + $0x30] sm:$0xf]  ;;  %v7136_v60 = vld [vmem:[%s9009_s4] sm:$0xff]   ;;  %6790 = vmatprep.subr.bf16.mxu1 %v7135_v15 }
 0x27e   : > { %v3945_v7 = vsel %vm7636_vm11, %v3940_v32, %v3944_v30  ;;  %v3987_v1 = vor.u32 %v3986_v23, %v3982_v13  ;;  %v3992_v50 = vrot.slane %v3990_v2, 5  ;;  %v3997_v48 = vrot.slane %v3995_v42, 4  ;;  %v7130_v20 = vld [vmem:[#allocation4 + $0x30] sm:$0xff]   ;;  %v4895_v41 = vld [vmem:[#allocation4 + $0x24] sm:$0xf]  ;;  %6791 = vmatpush3.bf16.msra.mxu1 %v7136_v60  ;;  %v7138_v46 = vld [vmem:[%s9009_s4 + $0x8] sm:$0xff]  }
 0x27f   : > { %v6421_v8 = vcombine.low %v3935_v39, %v3945_v7  ;;  %v3983_v34 = vsel %vm7636_vm11, %v3978_v43, %v3982_v13  ;;  %v4000_v51 = vrot.slane %v3998_v45, 5  ;;  %v4006_v56 = vrot.slane %v4004_v44, 5  ;;  %v3911_v33 = vld [vmem:[#allocation4 + $0x34] sm:$0xf]  ;;  %6792 = vmatprep.subr.bf16.mxu1 %v7137_v5  ;;  %v7131_v7 = vld [vmem:[#allocation4 + $0x3c] sm:$0xff]  }
 0x280   : > { %v3988_v58 = vrot.slane %v3987_v1, 4  ;;  %v4008_v36 = vshrl.u32 %v3908_v37, 16  ;;  %v4014_v19 = vshll.u32 %v3909_v22, 16  ;;  %v4917_v4 = vshrl.u32 %v4892_v47, 16  ;;  %v3912_v37 = vld [vmem:[#allocation4 + $0x38] sm:$0x1] }
 0x281   : > { %4138 = vrot.lane.b32.xlu0 %v6421_v8, %s7285_s22  ;;  %v4001_v62 = vor.u32 %v4000_v51, %v3997_v48  ;;  %v4920_v59 = vshll.u32 %v4892_v47, 16  ;;  %v4926_v6 = vshll.u32 %v4893_v12, 16  ;;  %v4930_v3 = vshrl.u32 %v4893_v12, 16  ;;  %v7139_v22 = vld [vmem:[%s9009_s4 + $0x50] sm:$0xff]   ;;  %v4896_v48 = vld [vmem:[#allocation4 + $0x28] sm:$0xf] }
 0x282   : > { %v3993_v54 = vsel %vm7636_vm11, %v3988_v58, %v3992_v50  ;;  %v4010_v61 = vrot.slane %v4008_v36, 4  ;;  %v4016_v10 = vrot.slane %v4014_v19, 5  ;;  %v4919_v27 = vrot.slane %v4917_v4, 4  ;;  %v4897_v12 = vld [vmem:[#allocation4 + $0x2c] sm:$0x1]  ;;  %6793 = vmatpush3.bf16.msra.mxu1 %v7138_v46  ;;  %v7140_v58 = vld [vmem:[%s9009_s4 + $0x10] sm:$0xff]  }
 0x283   : > { %v6423_v16 = vcombine.low %v3983_v34, %v3993_v54  ;;  %v4002_v17 = vrot.slane %v4001_v62, 4  ;;  %v4922_v25 = vrot.slane %v4920_v59, 5  ;;  %v4928_v18 = vrot.slane %v4926_v6, 5  ;;  %6794 = vmatprep.subr.bf16.mxu1 %v7139_v22  ;;  %v7141_v62 = vld [vmem:[%s9009_s4 + $0x58] sm:$0xff]   ;;  %v4664_v54 = vld [vmem:[#allocation4 + $0x20] sm:$0x1] }
 0x284   : > { %v4011_v11 = vor.u32 %v4010_v61, %v4006_v56  ;;  %v4932_v63 = vrot.slane %v4930_v3, 4  ;;  %v4936_v29 = vshll.u32 %v4894_v49, 16  ;;  %v6461_v30 = vrot.slane %v4659_v26, 9  ;;  %v4662_v49 = vld [vmem:[#allocation4 + $0x18] sm:$0xe]  ;;  %v7143_v5 = vld [vmem:[%s9009_s4 + $0x60] sm:$0xff]  }
 0x285   : > { %4142 = vrot.lane.b32.xlu1 %v6423_v16, %s7285_s22  ;;  %4375 = vrot.lane.b32.xlu0 %v7129_v52, %s7285_s22  ;;  %v4007_v14 = vsel %vm7636_vm11, %v4002_v17, %v4006_v56  ;;  %v4923_v24 = vor.u32 %v4922_v25, %v4919_v27  ;;  %v4709_v38 = vrot.slane %v4660_v0, 5  ;;  %v4712_v21 = vrot.slane %v4661_v9, 5  ;;  %v4663_v52 = vld [vmem:[#allocation4 + $0x1c] sm:$0xf] }
 0x286   : > { %v4012_v53 = vrot.slane %v4011_v11, 4  ;;  %v4933_v35 = vor.u32 %v4932_v63, %v4928_v18  ;;  %v4938_v28 = vrot.slane %v4936_v29, 5  ;;  %v4019_v57 = vshrl.u32 %v3910_v31, 16  ;;  %v3913_v15 = vld [vmem:[#allocation4 + $0x3c] sm:$0xf]  ;;  %6795 = vmatpush3.bf16.msra.mxu1 %v7140_v58 }
 0x287   : > { %v4924_v13 = vrot.slane %v4923_v24, 4  ;;  %v8457_v32 = vsel %vm7680_vm14, %v6461_v30, %v4709_v38  ;;  %v4711_v23 = vrot.slane %v4709_v38, 4  ;;  %v4022_v2 = vshll.u32 %v3910_v31, 16  ;;  %v3914_v31 = vld [vmem:[#allocation4 + $0x40] sm:$0xf]  ;;  %v7142_v60 = vld [vmem:[%s9009_s4 + $0x18] sm:$0xff]   ;;  %6796 = vmatprep.subr.bf16.mxu1 %v7141_v62 }
 0x288   : > { %v4017_v42 = vsel %vm7636_vm11, %v4012_v53, %v4016_v10  ;;  %v4934_v39 = vrot.slane %v4933_v35, 4  ;;  %v4021_v43 = vrot.slane %v4019_v57, 4  ;;  %v4028_v45 = vshll.u32 %v3911_v33, 16  ;;  %v3915_v53 = vld [vmem:[#allocation4 + $0x44] sm:$0x1] }
 0x289   : > { %v6424_v44 = vcombine.low %v4007_v14, %v4017_v42  ;;  %4377 = vrot.lane.b32.xlu0 %v7130_v20, %s7285_s22  ;;  %v4929_v47 = vsel %vm7636_vm11, %v4924_v13, %v4928_v18  ;;  %v4713_v1 = vsel %vm7680_vm14, %v4711_v23, %v4712_v21  ;;  %v4024_v50 = vrot.slane %v4022_v2, 5  ;;  %v7144_v13 = vld [vmem:[%s9009_s4 + $0x20] sm:$0xff]   ;;  %v7132_v2 = vld [vmem:[#allocation4 + $0x48] sm:$0xff]  }
 0x28a   : > { %v4939_v8 = vsel %vm7636_vm11, %v4934_v39, %v4938_v28  ;;  %v6469_v34 = vcombine.low %v8457_v32, %v4713_v1  ;;  %v4030_v51 = vrot.slane %v4028_v45, 5  ;;  %v4032_v56 = vshrl.u32 %v3911_v33, 16  ;;  %6797 = vmatpush3.bf16.msra.mxu1 %v7142_v60  ;;  %v7145_v32 = vld [vmem:[%s9009_s4 + $0xc0] sm:$0xff]   ;;  %v4899_v45 = vld [vmem:[#allocation4 + $0x34] sm:$0xf] }
 0x28b   : > { %4144 = vrot.lane.b32.xlu1 %v6424_v44, %s7285_s22  ;;  %v6485_v36 = vcombine.low %v4929_v47, %v4939_v8  ;;  %v4025_v19 = vor.u32 %v4024_v50, %v4021_v43  ;;  %v4038_v4 = vshll.u32 %v3912_v37, 16  ;;  %v4941_v26 = vshrl.u32 %v4895_v41, 16  ;;  %v4898_v43 = vld [vmem:[#allocation4 + $0x30] sm:$0xf]  ;;  %6798 = vmatprep.subr.bf16.mxu1 %v7143_v5  ;;  %v4900_v50 = vld [vmem:[#allocation4 + $0x38] sm:$0x1] }
 0x28c   : > { %v4034_v59 = vrot.slane %v4032_v56, 4  ;;  %v4944_v6 = vshll.u32 %v4895_v41, 16  ;;  %v4950_v3 = vshll.u32 %v4896_v48, 16  ;;  %v4954_v0 = vshrl.u32 %v4896_v48, 16  ;;  %v4665_v48 = vld [vmem:[#allocation4 + $0x24] sm:$0xe]  ;;  %6854 = vmatprep.subr.bf16.mxu0 %v7145_v32 }
 0x28d   : > { %4379 = vrot.lane.b32.xlu0 %v7131_v7, %s7285_s22  ;;  %v4026_v61 = vrot.slane %v4025_v19, 4  ;;  %v4040_v10 = vrot.slane %v4038_v4, 5  ;;  %v4943_v27 = vrot.slane %v4941_v26, 4  ;;  %v4960_v9 = vshll.u32 %v4897_v12, 16  ;;  %v7146_v12 = vld [vmem:[%s9009_s4 + $0x80] sm:$0xff]  }
 0x28e   : > { %v4035_v16 = vor.u32 %v4034_v59, %v4030_v51  ;;  %v4946_v17 = vrot.slane %v4944_v6, 5  ;;  %v4952_v25 = vrot.slane %v4950_v3, 5  ;;  %v4956_v18 = vrot.slane %v4954_v0, 4  ;;  %v4667_v58 = vld [vmem:[#allocation4 + $0x2c] sm:$0x1]  ;;  %6799 = vmatpush3.bf16.msra.mxu1 %v7144_v13  ;;  %6855 = vmatpush3.bf16.msra.mxu0 %v7146_v12 }
 0x28f   : > { %5132 = vrot.lane.b32.xlu1 %v6485_v36, %s7285_s22  ;;  %v4031_v11 = vsel %vm7636_vm11, %v4026_v61, %v4030_v51  ;;  %v4962_v63 = vrot.slane %v4960_v9, 5  ;;  %v6462_v29 = vrot.slane %v4662_v49, 9  ;;  %v4716_v30 = vrot.slane %v4663_v52, 5  ;;  %v4666_v49 = vld [vmem:[#allocation4 + $0x28] sm:$0xf] }
 0x290   : > { %v4036_v14 = vrot.slane %v4035_v16, 4  ;;  %v4947_v20 = vor.u32 %v4946_v17, %v4943_v27  ;;  %v4957_v24 = vor.u32 %v4956_v18, %v4952_v25  ;;  %v4719_v38 = vrot.slane %v4664_v54, 5  ;;  %v3916_v52 = vld [vmem:[#allocation4 + $0x48] sm:$0xf]  ;;  %v3917_v27 = vld [vmem:[#allocation4 + $0x4c] sm:$0xf] }
 0x291   : > { %v4717_v21 = vsel %vm7680_vm14, %v6462_v29, %v4716_v30  ;;  %v4718_v33 = vrot.slane %v4716_v30, 4  ;;  %v4043_v35 = vshrl.u32 %v3913_v15, 16  ;;  %v4046_v28 = vshll.u32 %v3913_v15, 16  ;;  %v4669_v12 = vld [vmem:[#allocation4 + $0x34] sm:$0xf] }
 0x292   : > { %v4041_v37 = vsel %vm7636_vm11, %v4036_v14, %v4040_v10  ;;  %v4948_v57 = vrot.slane %v4947_v20, 4  ;;  %v4958_v41 = vrot.slane %v4957_v24, 4  ;;  %v4052_v46 = vshll.u32 %v3914_v31, 16 }
 0x293   : > { %4787 = vrot.lane.b32.xlu1 %v6469_v34, %s7285_s22  ;;  %v6425_v23 = vcombine.low %v4031_v11, %v4041_v37  ;;  %v4720_v22 = vsel %vm7680_vm14, %v4718_v33, %v4719_v38  ;;  %v4045_v42 = vrot.slane %v4043_v35, 4  ;;  %v4048_v39 = vrot.slane %v4046_v28, 5  ;;  %v7147_v33 = vld [vmem:[%s9009_s4 + $0x68] sm:$0xff]  }
 0x294   : > { %v4953_v44 = vsel %vm7636_vm11, %v4948_v57, %v4952_v25  ;;  %v4963_v47 = vsel %vm7636_vm11, %v4958_v41, %v4962_v63  ;;  %v6470_v7 = vcombine.low %v4717_v21, %v4720_v22  ;;  %v4054_v1 = vrot.slane %v4052_v46, 5  ;;  %v3918_v63 = vld [vmem:[#allocation4 + $0x50] sm:$0x1]  ;;  %v4901_v21 = vld [vmem:[#allocation4 + $0x3c] sm:$0xf]  ;;  %v7148_v41 = vld [vmem:[%s9009_s4 + $0x28] sm:$0xff]   ;;  %6800 = vmatprep.subr.bf16.mxu1 %v7147_v33 }
 0x295   : > { %4146 = vrot.lane.b32.xlu0 %v6425_v23, %s7285_s22  ;;  %v6486_v8 = vcombine.low %v4953_v44, %v4963_v47  ;;  %v4049_v34 = vor.u32 %v4048_v39, %v4045_v42  ;;  %v4056_v51 = vshrl.u32 %v3914_v31, 16  ;;  %v4062_v56 = vshll.u32 %v3915_v53, 16  ;;  %v4902_v57 = vld [vmem:[#allocation4 + $0x40] sm:$0xf]  ;;  %v7133_v42 = vld [vmem:[#allocation4 + $0x54] sm:$0xff]   ;;  %6801 = vmatpush3.bf16.msra.mxu1 %v7148_v41  ;;  %v7149_v47 = vld [vmem:[%s9009_s4 + $0xc8] sm:$0xff]  }
 0x296   : > { %v4965_v36 = vshrl.u32 %v4898_v43, 16  ;;  %v4968_v19 = vshll.u32 %v4898_v43, 16  ;;  %v4974_v4 = vshll.u32 %v4899_v45, 16  ;;  %v4978_v26 = vshrl.u32 %v4899_v45, 16  ;;  %v4668_v44 = vld [vmem:[#allocation4 + $0x30] sm:$0xe]  ;;  %6856 = vmatprep.subr.bf16.mxu0 %v7149_v47 }
 0x297   : > { %5134 = vrot.lane.b32.xlu1 %v6486_v8, %s7285_s22  ;;  %v4050_v62 = vrot.slane %v4049_v34, 4  ;;  %v4058_v59 = vrot.slane %v4056_v51, 4  ;;  %v4064_v6 = vrot.slane %v4062_v56, 5  ;;  %v4984_v3 = vshll.u32 %v4900_v50, 16  ;;  %v7156_v47 = vld [vmem:[%s9009_s4 + $0x90] sm:$0xff]  }
 0x298   : > { %v4967_v0 = vrot.slane %v4965_v36, 4  ;;  %v4970_v54 = vrot.slane %v4968_v19, 5  ;;  %v4976_v61 = vrot.slane %v4974_v4, 5  ;;  %v4980_v10 = vrot.slane %v4978_v26, 4  ;;  %v3919_v26 = vld [vmem:[#allocation4 + $0x54] sm:$0xf] }
 0x299   : > { %4381 = vrot.lane.b32.xlu0 %v7132_v2, %s7285_s22  ;;  %v4055_v9 = vsel %vm7636_vm11, %v4050_v62, %v4054_v1  ;;  %v4059_v15 = vor.u32 %v4058_v59, %v4054_v1  ;;  %v4986_v16 = vrot.slane %v4984_v3, 5  ;;  %v6463_v17 = vrot.slane %v4665_v48, 9  ;;  %v4903_v2 = vld [vmem:[#allocation4 + $0x44] sm:$0x1]  ;;  %v3920_v3 = vld [vmem:[#allocation4 + $0x58] sm:$0xf] }
 0x29a   : > { %v4971_v25 = vor.u32 %v4970_v54, %v4967_v0  ;;  %v4981_v18 = vor.u32 %v4980_v10, %v4976_v61  ;;  %v4723_v31 = vrot.slane %v4666_v49, 5  ;;  %v4726_v60 = vrot.slane %v4667_v58, 5  ;;  %v4670_v49 = vld [vmem:[#allocation4 + $0x38] sm:$0x1] }
 0x29b   : > { %4789 = vrot.lane.b32.xlu1 %v6470_v7, %s7285_s22  ;;  %v4060_v11 = vrot.slane %v4059_v15, 4  ;;  %v4067_v29 = vshrl.u32 %v3916_v52, 16  ;;  %v4070_v30 = vshll.u32 %v3916_v52, 16  ;;  %v4076_v5 = vshll.u32 %v3917_v27, 16 }
 0x29c   : > { %v4972_v14 = vrot.slane %v4971_v25, 4  ;;  %v4982_v20 = vrot.slane %v4981_v18, 4  ;;  %v4724_v24 = vsel %vm7680_vm14, %v6463_v17, %v4723_v31  ;;  %v4725_v38 = vrot.slane %v4723_v31, 4  ;;  %v7151_v25 = vld [vmem:[%s9009_s4 + $0x70] sm:$0xff]  }
 0x29d   : > { %v4065_v53 = vsel %vm7636_vm11, %v4060_v11, %v4064_v6  ;;  %v4069_v35 = vrot.slane %v4067_v29, 4  ;;  %v4072_v28 = vrot.slane %v4070_v30, 5  ;;  %v8522_v37 = vrot.slane %v4076_v5, 5  ;;  %v3921_v11 = vld [vmem:[#allocation4 + $0x5c] sm:$0x1]  ;;  %v7152_v29 = vld [vmem:[#allocation4 + $0xc] sm:$0xff]   ;;  %6802 = vmatprep.subr.bf16.mxu1 %v7151_v25 }
 0x29e   : > { %v6426_v46 = vcombine.low %v4055_v9, %v4065_v53  ;;  %v4977_v13 = vsel %vm7636_vm11, %v4972_v14, %v4976_v61  ;;  %v4987_v32 = vsel %vm7636_vm11, %v4982_v20, %v4986_v16  ;;  %v4727_v23 = vsel %vm7680_vm14, %v4725_v38, %v4726_v60  ;;  %v7153_v38 = vld [vmem:[#allocation4] sm:$0xff]   ;;  %3891 = vst.msk [vmem:[#allocation5 + $0x28] sm:$0xff] %vm861_vm1, %v7152_v29 }
 0x29f   : > { %v6487_v22 = vcombine.low %v4977_v13, %v4987_v32  ;;  %v6471_v39 = vcombine.low %v4724_v24, %v4727_v23  ;;  %v4073_v43 = vor.u32 %v4072_v28, %v4069_v35  ;;  %v4080_v45 = vshrl.u32 %v3917_v27, 16  ;;  %v7150_v27 = vld [vmem:[%s9009_s4 + $0x88] sm:$0xff]   ;;  %v7134_v53 = vld [vmem:[#allocation4 + $0x60] sm:$0xff]   ;;  %v4906_v23 = vld [vmem:[#allocation4 + $0x50] sm:$0x1]  ;;  %3890 = vst.msk [vmem:[#allocation5] sm:$0xff] %vm861_vm1, %v7153_v38 }
 0x2a0   : > { %4148 = vrot.lane.b32.xlu0 %v6426_v46, %s7285_s22  ;;  %v4086_v7 = vshll.u32 %v3918_v63, 16  ;;  %v4989_v1 = vshrl.u32 %v4901_v21, 16  ;;  %v4992_v50 = vshll.u32 %v4901_v21, 16  ;;  %v4998_v48 = vshll.u32 %v4902_v57, 16  ;;  %6857 = vmatpush3.bf16.msra.mxu0 %v7150_v27  ;;  %v4904_v24 = vld [vmem:[#allocation4 + $0x48] sm:$0xf] }
 0x2a1   : > { %5136 = vrot.lane.b32.xlu1 %v6487_v22, %s7285_s22  ;;  %v4074_v8 = vrot.slane %v4073_v43, 4  ;;  %v4082_v34 = vrot.slane %v4080_v45, 4  ;;  %v5002_v51 = vshrl.u32 %v4902_v57, 16  ;;  %v5008_v56 = vshll.u32 %v4903_v2, 16  ;;  %v7154_v57 = vld [vmem:[%s9009_s4 + $0x30] sm:$0xff]  }
 0x2a2   : > { %v4088_v58 = vrot.slane %v4086_v7, 5  ;;  %v4991_v36 = vrot.slane %v4989_v1, 4  ;;  %v4994_v19 = vrot.slane %v4992_v50, 5  ;;  %v5000_v4 = vrot.slane %v4998_v48, 5  ;;  %v4671_v2 = vld [vmem:[#allocation4 + $0x3c] sm:$0xe]  ;;  %6803 = vmatpush3.bf16.msra.mxu1 %v7154_v57 }
 0x2a3   : > { %v4079_v52 = vsel %vm7636_vm11, %v4074_v8, %v8522_v37  ;;  %v4083_v62 = vor.u32 %v4082_v34, %v8522_v37  ;;  %v5004_v59 = vrot.slane %v5002_v51, 4  ;;  %v5010_v6 = vrot.slane %v5008_v56, 5  ;;  %v4905_v37 = vld [vmem:[#allocation4 + $0x4c] sm:$0xf]  ;;  %v7155_v22 = vld [vmem:[%s9009_s4 + $0xd0] sm:$0xff]  }
 0x2a4   : > { %4383 = vrot.lane.b32.xlu0 %v7133_v42, %s7285_s22  ;;  %v4995_v0 = vor.u32 %v4994_v19, %v4991_v36  ;;  %v6464_v54 = vrot.slane %v4668_v44, 9  ;;  %v4730_v61 = vrot.slane %v4669_v12, 5  ;;  %v4733_v10 = vrot.slane %v4670_v49, 5  ;;  %v4672_v44 = vld [vmem:[#allocation4 + $0x40] sm:$0xf]  ;;  %6858 = vmatprep.subr.bf16.mxu0 %v7155_v22 }
 0x2a5   : > { %4791 = vrot.lane.b32.xlu1 %v6471_v39, %s7285_s22  ;;  %v4084_v9 = vrot.slane %v4083_v62, 4  ;;  %v5005_v15 = vor.u32 %v5004_v59, %v5000_v4  ;;  %v4091_v16 = vshrl.u32 %v3919_v26, 16  ;;  %v4094_v17 = vshll.u32 %v3919_v26, 16  ;;  %v4673_v12 = vld [vmem:[#allocation4 + $0x44] sm:$0x1]  ;;  %6859 = vmatpush3.bf16.msra.mxu0 %v7156_v47 }
 0x2a6   : > { %v4996_v18 = vrot.slane %v4995_v0, 4  ;;  %v8552_v31 = vsel %vm7680_vm14, %v6464_v54, %v4730_v61  ;;  %v4732_v60 = vrot.slane %v4730_v61, 4  ;;  %v4100_v63 = vshll.u32 %v3920_v3, 16  ;;  %v4907_v49 = vld [vmem:[#allocation4 + $0x54] sm:$0xf] }
 0x2a7   : > { %v4089_v30 = vsel %vm7636_vm11, %v4084_v9, %v4088_v58  ;;  %v5006_v5 = vrot.slane %v5005_v15, 4  ;;  %v4093_v14 = vrot.slane %v4091_v16, 4  ;;  %v4096_v20 = vrot.slane %v4094_v17, 5  ;;  %v4908_v26 = vld [vmem:[#allocation4 + $0x58] sm:$0xf] }
 0x2a8   : > { %v6427_v21 = vcombine.low %v4079_v52, %v4089_v30  ;;  %v5001_v33 = vsel %vm7636_vm11, %v4996_v18, %v5000_v4  ;;  %v4734_v35 = vsel %vm7680_vm14, %v4732_v60, %v4733_v10  ;;  %v8560_v28 = vrot.slane %v4100_v63, 5  ;;  %v4909_v10 = vld [vmem:[#allocation4 + $0x5c] sm:$0x1]  ;;  %v4674_v9 = vld [vmem:[#allocation4 + $0x48] sm:$0xe] }
 0x2a9   : > { %v5011_v41 = vsel %vm7636_vm11, %v5006_v5, %v5010_v6  ;;  %v6472_v46 = vcombine.low %v8552_v31, %v4734_v35  ;;  %v4097_v13 = vor.u32 %v4096_v20, %v4093_v14  ;;  %v4104_v32 = vshrl.u32 %v3920_v3, 16  ;;  %v7157_v3 = vld [vmem:[%s9009_s4 + $0x78] sm:$0xff]   ;;  %v4675_v31 = vld [vmem:[#allocation4 + $0x4c] sm:$0xf]  ;;  %v4676_v60 = vld [vmem:[#allocation4 + $0x50] sm:$0x1] }
 0x2aa   : > { %4150 = vrot.lane.b32.xlu0 %v6427_v21, %s7285_s22  ;;  %v6488_v42 = vcombine.low %v5001_v33, %v5011_v41  ;;  %v4110_v39 = vshll.u32 %v3921_v11, 16  ;;  %v5013_v43 = vshrl.u32 %v4904_v24, 16  ;;  %v5016_v45 = vshll.u32 %v4904_v24, 16  ;;  %v7158_v15 = vld [vmem:[#allocation4 + $0x18] sm:$0xff]   ;;  %v4910_v11 = vld [vmem:[#allocation4 + $0x60] sm:$0xf]  ;;  %6804 = vmatprep.subr.bf16.mxu1 %v7157_v3 }
 0x2ab   : > { %v4098_v7 = vrot.slane %v4097_v13, 4  ;;  %v4106_v1 = vrot.slane %v4104_v32, 4  ;;  %v5022_v50 = vshll.u32 %v4905_v37, 16  ;;  %v5026_v48 = vshrl.u32 %v4905_v37, 16  ;;  %v7159_v63 = vld [vmem:[%s9009_s4 + $0x38] sm:$0xff]   ;;  %3892 = vst.msk [vmem:[#allocation5 + $0x50] sm:$0xff] %vm861_vm1, %v7158_v15 }
 0x2ac   : > { %5138 = vrot.lane.b32.xlu1 %v6488_v42, %s7285_s22  ;;  %v4112_v8 = vrot.slane %v4110_v39, 5  ;;  %v5015_v34 = vrot.slane %v5013_v43, 4  ;;  %v5018_v51 = vrot.slane %v5016_v45, 5  ;;  %v5032_v56 = vshll.u32 %v4906_v23, 16  ;;  %v4911_v20 = vld [vmem:[#allocation4 + $0x64] sm:$0xf]  ;;  %6805 = vmatpush3.bf16.msra.mxu1 %v7159_v63 }
 0x2ad   : > { %v4103_v58 = vsel %vm7636_vm11, %v4098_v7, %v8560_v28  ;;  %v4107_v36 = vor.u32 %v4106_v1, %v8560_v28  ;;  %v5024_v19 = vrot.slane %v5022_v50, 5  ;;  %v5028_v4 = vrot.slane %v5026_v48, 4  ;;  %v7160_v24 = vld [vmem:[%s9009_s4 + $0xd8] sm:$0xff]   ;;  %v4677_v22 = vld [vmem:[#allocation4 + $0x54] sm:$0xe] }
 0x2ae   : > { %4385 = vrot.lane.b32.xlu0 %v7134_v53, %s7285_s22  ;;  %v5019_v52 = vor.u32 %v5018_v51, %v5015_v34  ;;  %v5034_v62 = vrot.slane %v5032_v56, 5  ;;  %v6465_v59 = vrot.slane %v4671_v2, 9  ;;  %v4737_v6 = vrot.slane %v4672_v44, 5  ;;  %v7161_v35 = vld [vmem:[%s9009_s4 + $0x98] sm:$0xff]   ;;  %6860 = vmatprep.subr.bf16.mxu0 %v7160_v24  ;;  %v4912_v2 = vld [vmem:[#allocation4 + $0x68] sm:$0x1] }
 0x2af   : > { %v4108_v0 = vrot.slane %v4107_v36, 4  ;;  %v5029_v54 = vor.u32 %v5028_v4, %v5024_v19  ;;  %v4740_v61 = vrot.slane %v4673_v12, 5  ;;  %v5037_v27 = vshrl.u32 %v4907_v49, 16  ;;  %6861 = vmatpush3.bf16.msra.mxu0 %v7161_v35  ;;  %v4678_v44 = vld [vmem:[#allocation4 + $0x58] sm:$0xf] }
 0x2b0   : > { %4793 = vrot.lane.b32.xlu1 %v6472_v46, %s7285_s22  ;;  %v5020_v16 = vrot.slane %v5019_v52, 4  ;;  %v4738_v17 = vsel %vm7680_vm14, %v6465_v59, %v4737_v6  ;;  %v4739_v25 = vrot.slane %v4737_v6, 4  ;;  %v5040_v18 = vshll.u32 %v4907_v49, 16  ;;  %v4679_v48 = vld [vmem:[#allocation4 + $0x5c] sm:$0x1] }
 0x2b1   : > { %v4113_v29 = vsel %vm7636_vm11, %v4108_v0, %v4112_v8  ;;  %v5030_v30 = vrot.slane %v5029_v54, 4  ;;  %v5039_v5 = vrot.slane %v5037_v27, 4  ;;  %v5046_v14 = vshll.u32 %v4908_v26, 16  ;;  %v4913_v12 = vld [vmem:[#allocation4 + $0x6c] sm:$0xf]  ;;  %v7163_v0 = vld [vmem:[#allocation4 + $0x24] sm:$0xff]  }
 0x2b2   : > { %v6428_v38 = vcombine.low %v4103_v58, %v4113_v29  ;;  %v5025_v21 = vsel %vm7636_vm11, %v5020_v16, %v5024_v19  ;;  %v4741_v33 = vsel %vm7680_vm14, %v4739_v25, %v4740_v61  ;;  %v5042_v53 = vrot.slane %v5040_v18, 5  ;;  %v4914_v4 = vld [vmem:[#allocation4 + $0x70] sm:$0xf]  ;;  %v4915_v3 = vld [vmem:[#allocation4 + $0x74] sm:$0x1]  ;;  %3893 = vst.msk [vmem:[#allocation5 + $0x78] sm:$0xff] %vm861_vm1, %v7163_v0 }
 0x2b3   : > { %v5035_v28 = vsel %vm7636_vm11, %v5030_v30, %v5034_v62  ;;  %v6473_v37 = vcombine.low %v4738_v17, %v4741_v33  ;;  %v5048_v57 = vrot.slane %v5046_v14, 5  ;;  %v5050_v41 = vshrl.u32 %v4908_v26, 16  ;;  %v8617_v26 = vld [vmem:[%s9009_s4 + $0x100] sm:$0xff]   ;;  %v4682_v30 = vld [vmem:[#allocation4 + $0x68] sm:$0x1] }
 0x2b4   : > { %4152 = vrot.lane.b32.xlu0 %v6428_v38, %s7285_s22  ;;  %v6489_v46 = vcombine.low %v5025_v21, %v5035_v28  ;;  %v5043_v13 = vor.u32 %v5042_v53, %v5039_v5  ;;  %v5056_v32 = vshll.u32 %v4909_v10, 16  ;;  %v6466_v23 = vrot.slane %v4674_v9, 9  ;;  %v4680_v9 = vld [vmem:[#allocation4 + $0x60] sm:$0xe]  ;;  %6958 = vmatprep.subr.bf16.mxu1 %v8617_v26  ;;  %v4681_v29 = vld [vmem:[#allocation4 + $0x64] sm:$0xf] }
 0x2b5   : > { %4795 = vrot.lane.b32.xlu1 %v6473_v37, %s7285_s22  ;;  %v5052_v42 = vrot.slane %v5050_v41, 4  ;;  %v4744_v39 = vrot.slane %v4675_v31, 5  ;;  %v4747_v43 = vrot.slane %v4676_v60, 5  ;;  %v5061_v45 = vshrl.u32 %v4910_v11, 16  ;;  %v7164_v18 = vld [vmem:[%s9009_s4 + $0xe0] sm:$0xff]   ;;  %v7166_v28 = vld [vmem:[#allocation4 + $0x18] sm:$0xff]  }
 0x2b6   : > { %v5044_v47 = vrot.slane %v5043_v13, 4  ;;  %v5058_v7 = vrot.slane %v5056_v32, 5  ;;  %v5064_v1 = vshll.u32 %v4910_v11, 16  ;;  %v5070_v50 = vshll.u32 %v4911_v20, 16  ;;  %v7165_v5 = vld [vmem:[%s9009_s4 + $0xa0] sm:$0xff]   ;;  %6862 = vmatprep.subr.bf16.mxu0 %v7164_v18  ;;  %v7167_v13 = vld [vmem:[%s9009_s4 + $0xe8] sm:$0xff]  }
 0x2b7   : > { %v5053_v8 = vor.u32 %v5052_v42, %v5048_v57  ;;  %v4745_v34 = vsel %vm7680_vm14, %v6466_v23, %v4744_v39  ;;  %v4746_v51 = vrot.slane %v4744_v39, 4  ;;  %v5063_v56 = vrot.slane %v5061_v45, 4  ;;  %6863 = vmatpush3.bf16.msra.mxu0 %v7165_v5  ;;  %v4173_v42 = vld [vmem:[#allocation4 + $0xc] sm:$0xe]  ;;  %4884 = vst.msk [vmem:[#allocation5 + $0x18] sm:$0xff] %vm861_vm1, %v7166_v28 }
 0x2b8   : > { %5140 = vrot.lane.b32.xlu0 %v6489_v46, %s7285_s22  ;;  %v5049_v49 = vsel %vm7636_vm11, %v5044_v47, %v5048_v57  ;;  %v5066_v58 = vrot.slane %v5064_v1, 5  ;;  %v5072_v36 = vrot.slane %v5070_v50, 5  ;;  %v5074_v19 = vshrl.u32 %v4911_v20, 16  ;;  %v4174_v47 = vld [vmem:[#allocation4 + $0x10] sm:$0xf]  ;;  %6864 = vmatprep.subr.bf16.mxu0 %v7167_v13 }
 0x2b9   : > { %v5054_v52 = vrot.slane %v5053_v8, 4  ;;  %v4748_v62 = vsel %vm7680_vm14, %v4746_v51, %v4747_v43  ;;  %v5080_v59 = vshll.u32 %v4912_v2, 16  ;;  %v6467_v6 = vrot.slane %v4677_v22, 9  ;;  %v4170_v8 = vld [vmem:[#allocation4] sm:$0xe] }
 0x2ba   : > { %v6474_v54 = vcombine.low %v4745_v34, %v4748_v62  ;;  %v5067_v61 = vor.u32 %v5066_v58, %v5063_v56  ;;  %v5076_v10 = vrot.slane %v5074_v19, 4  ;;  %v4751_v27 = vrot.slane %v4678_v44, 5  ;;  %v7168_v34 = vld [vmem:[%s9009_s4 + $0xa8] sm:$0xff]   ;;  %v4171_v58 = vld [vmem:[#allocation4 + $0x4] sm:$0xf] }
 0x2bb   : > { %v5059_v15 = vsel %vm7636_vm11, %v5054_v52, %v5058_v7  ;;  %v5082_v16 = vrot.slane %v5080_v59, 5  ;;  %v4754_v17 = vrot.slane %v4679_v48, 5  ;;  %v5085_v25 = vshrl.u32 %v4913_v12, 16  ;;  %v4175_v7 = vld [vmem:[#allocation4 + $0x14] sm:$0x1]  ;;  %6865 = vmatpush3.bf16.msra.mxu0 %v7168_v34 }
 0x2bc   : > { %v6490_v31 = vcombine.low %v5049_v49, %v5059_v15  ;;  %4797 = vrot.lane.b32.xlu1 %v6474_v54, %s7285_s22  ;;  %v5068_v60 = vrot.slane %v5067_v61, 4  ;;  %v5077_v11 = vor.u32 %v5076_v10, %v5072_v36  ;;  %v4752_v63 = vsel %vm7680_vm14, %v6467_v6, %v4751_v27  ;;  %v7169_v59 = vld [vmem:[%s9009_s4 + $0xf0] sm:$0xff]  }
 0x2bd   : > { %v4753_v14 = vrot.slane %v4751_v27, 4  ;;  %v5087_v20 = vrot.slane %v5085_v25, 4  ;;  %v5088_v24 = vshll.u32 %v4913_v12, 16  ;;  %v5094_v38 = vshll.u32 %v4914_v4, 16  ;;  %6866 = vmatprep.subr.bf16.mxu0 %v7169_v59  ;;  %v7170_v25 = vld [vmem:[%s9009_s4 + $0xb0] sm:$0xff]  }
 0x2be   : > { %5142 = vrot.lane.b32.xlu0 %v6490_v31, %s7285_s22  ;;  %v5073_v21 = vsel %vm7636_vm11, %v5068_v60, %v5072_v36  ;;  %v5078_v33 = vrot.slane %v5077_v11, 4  ;;  %v5098_v53 = vshrl.u32 %v4914_v4, 16  ;;  %v5104_v35 = vshll.u32 %v4915_v3, 16  ;;  %v4172_v36 = vld [vmem:[#allocation4 + $0x8] sm:$0x1] }
 0x2bf   : > { %v4755_v37 = vsel %vm7680_vm14, %v4753_v14, %v4754_v17  ;;  %v5090_v57 = vrot.slane %v5088_v24, 5  ;;  %v5096_v41 = vrot.slane %v5094_v38, 5  ;;  %v6468_v46 = vrot.slane %v4680_v9, 9  ;;  %6867 = vmatpush3.bf16.msra.mxu0 %v7170_v25  ;;  %v4176_v60 = vld [vmem:[#allocation4 + $0x18] sm:$0xe]  ;;  %v7172_v38 = vld [vmem:[#allocation4 + $0x24] sm:$0xff]  }
 0x2c0   : > { %v5083_v32 = vsel %vm7636_vm11, %v5078_v33, %v5082_v16  ;;  %v6475_v23 = vcombine.low %v4752_v63, %v4755_v37  ;;  %v5100_v2 = vrot.slane %v5098_v53, 4  ;;  %v5106_v22 = vrot.slane %v5104_v35, 5  ;;  %v4177_v11 = vld [vmem:[#allocation4 + $0x1c] sm:$0xf]  ;;  %v4178_v63 = vld [vmem:[#allocation4 + $0x20] sm:$0x1] }
 0x2c1   : > { %v6491_v39 = vcombine.low %v5073_v21, %v5083_v32  ;;  %v5091_v43 = vor.u32 %v5090_v57, %v5087_v20  ;;  %v4758_v45 = vrot.slane %v4681_v29, 5  ;;  %v4761_v44 = vrot.slane %v4682_v30, 5  ;;  %v7171_v30 = vld [vmem:[#allocation4 + $0x30] sm:$0xff]   ;;  %v4179_v21 = vld [vmem:[#allocation4 + $0x24] sm:$0xe]  ;;  %4885 = vst.msk [vmem:[#allocation5 + $0x40] sm:$0xff] %vm861_vm1, %v7172_v38 }
 0x2c2   : > { %4799 = vrot.lane.b32.xlu1 %v6475_v23, %s7285_s22  ;;  %v5101_v1 = vor.u32 %v5100_v2, %v5096_v41  ;;  %v6430_v50 = vrot.slane %v4173_v42, 9  ;;  %v4227_v48 = vrot.slane %v4174_v47, 5  ;;  %v4230_v12 = vrot.slane %v4175_v7, 5  ;;  %3894 = vst.msk [vmem:[#allocation5 + $0xa0] sm:$0xff] %vm861_vm1, %v7171_v30  ;;  %v4180_v33 = vld [vmem:[#allocation4 + $0x28] sm:$0xf] }
 0x2c3   : > { %5144 = vrot.lane.b32.xlu0 %v6491_v39, %s7285_s22  ;;  %v5092_v51 = vrot.slane %v5091_v43, 4  ;;  %v4759_v56 = vsel %vm7680_vm14, %v6468_v46, %v4758_v45  ;;  %v4760_v49 = vrot.slane %v4758_v45, 4  ;;  %v6429_v62 = vrot.slane %v4170_v8, 9  ;;  %v4181_v35 = vld [vmem:[#allocation4 + $0x2c] sm:$0x1]  ;;  %v7173_v46 = vld [vmem:[%s9009_s4 + $0xf8] sm:$0xff]  }
 0x2c4   : > { %v5102_v19 = vrot.slane %v5101_v1, 4  ;;  %v4228_v4 = vsel %vm7680_vm14, %v6430_v50, %v4227_v48  ;;  %v4229_v52 = vrot.slane %v4227_v48, 4  ;;  %v4220_v0 = vrot.slane %v4171_v58, 5  ;;  %v7174_v23 = vld [vmem:[%s9009_s4 + $0xb8] sm:$0xff]   ;;  %v4182_v2 = vld [vmem:[#allocation4 + $0x30] sm:$0xe]  ;;  %6868 = vmatprep.subr.bf16.mxu0 %v7173_v46 }
 0x2c5   : > { %v5097_v6 = vsel %vm7636_vm11, %v5092_v51, %v5096_v41  ;;  %v4762_v3 = vsel %vm7680_vm14, %v4760_v49, %v4761_v44  ;;  %v4223_v54 = vrot.slane %v4172_v36, 5  ;;  %v6431_v29 = vrot.slane %v4176_v60, 9  ;;  %v4184_v39 = vld [vmem:[#allocation4 + $0x38] sm:$0x1]  ;;  %v4403_v44 = vld [vmem:[#allocation4 + $0xc] sm:$0xf]  ;;  %6869 = vmatpush3.bf16.msra.mxu0 %v7174_v23 }
 0x2c6   : > { %v5107_v61 = vsel %vm7636_vm11, %v5102_v19, %v5106_v22  ;;  %v6476_v10 = vcombine.low %v4759_v56, %v4762_v3  ;;  %v4231_v27 = vsel %vm7680_vm14, %v4229_v52, %v4230_v12  ;;  %v4221_v16 = vsel %vm7680_vm14, %v6429_v62, %v4220_v0  ;;  %v4183_v22 = vld [vmem:[#allocation4 + $0x34] sm:$0xf]  ;;  %v4404_v1 = vld [vmem:[#allocation4 + $0x10] sm:$0xf]  ;;  %v7176_v36 = vld [vmem:[#allocation4 + $0x3c] sm:$0xff]  }
 0x2c7   : > { %v6492_v9 = vcombine.low %v5097_v6, %v5107_v61  ;;  %v6438_v15 = vcombine.low %v4228_v4, %v4231_v27  ;;  %v4222_v17 = vrot.slane %v4220_v0, 4  ;;  %v4234_v5 = vrot.slane %v4177_v11, 5  ;;  %v4405_v50 = vld [vmem:[#allocation4 + $0x14] sm:$0x1]  ;;  %3895 = vst.msk [vmem:[#allocation5 + $0xc8] sm:$0xff] %vm861_vm1, %v7176_v36  ;;  %v7178_v25 = vld [vmem:[#allocation4 + $0x48] sm:$0xff]  }
 0x2c8   : > { %4801 = vrot.lane.b32.xlu1 %v6476_v10, %s7285_s22  ;;  %v4237_v14 = vrot.slane %v4178_v63, 5  ;;  %v6432_v28 = vrot.slane %v4179_v21, 9  ;;  %v4241_v37 = vrot.slane %v4180_v33, 5  ;;  %v4244_v41 = vrot.slane %v4181_v35, 5  ;;  %v4185_v61 = vld [vmem:[#allocation4 + $0x3c] sm:$0xe] }
 0x2c9   : > { %5146 = vrot.lane.b32.xlu0 %v6492_v9, %s7285_s22  ;;  %4307 = vst.msk [vmem:[#allocation5 + $0x30] sm:$0xff] %vm861_vm1, %v6438_v15  ;;  %v4224_v18 = vsel %vm7680_vm14, %v4222_v17, %v4223_v54  ;;  %v4235_v20 = vsel %vm7680_vm14, %v6431_v29, %v4234_v5  ;;  %v4236_v24 = vrot.slane %v4234_v5, 4  ;;  %v6433_v43 = vrot.slane %v4182_v2, 9  ;;  %v4186_v10 = vld [vmem:[#allocation4 + $0x40] sm:$0xf]  ;;  %v7177_v27 = vld [vmem:[#allocation4 + $0x30] sm:$0xff]  }
 0x2ca   : > { %v6437_v31 = vcombine.low %v4221_v16, %v4224_v18  ;;  %v4242_v13 = vsel %vm7680_vm14, %v6432_v28, %v4241_v37  ;;  %v4243_v32 = vrot.slane %v4241_v37, 4  ;;  %v4248_v45 = vrot.slane %v4183_v22, 5  ;;  %v4187_v15 = vld [vmem:[#allocation4 + $0x44] sm:$0x1]  ;;  %v4406_v60 = vld [vmem:[#allocation4 + $0x18] sm:$0xf] }
 0x2cb   : > { %v4238_v53 = vsel %vm7680_vm14, %v4236_v24, %v4237_v14  ;;  %v4251_v7 = vrot.slane %v4184_v39, 5  ;;  %v4428_v48 = vshrl.u32 %v4403_v44, 16  ;;  %v4431_v34 = vshll.u32 %v4403_v44, 16  ;;  %v4407_v11 = vld [vmem:[#allocation4 + $0x1c] sm:$0xf]  ;;  %4886 = vst.msk [vmem:[#allocation5 + $0x68] sm:$0xff] %vm861_vm1, %v7177_v27 }
 0x2cc   : > { %4306 = vst.msk [vmem:[#allocation5 + $0x8] sm:$0xff] %vm861_vm1, %v6437_v31  ;;  %v6439_v57 = vcombine.low %v4235_v20, %v4238_v53  ;;  %v4245_v42 = vsel %vm7680_vm14, %v4243_v32, %v4244_v41  ;;  %v4249_v12 = vsel %vm7680_vm14, %v6433_v43, %v4248_v45  ;;  %v4250_v8 = vrot.slane %v4248_v45, 4  ;;  %v7179_v63 = vld [vmem:[#allocation4 + $0x3c] sm:$0xff]   ;;  %3896 = vst.msk [vmem:[#allocation5 + $0xf0] sm:$0xff] %vm861_vm1, %v7178_v25  ;;  %v7181_v23 = vld [vmem:[#allocation4 + $0x54] sm:$0xff]  }
 0x2cd   : > { %v6440_v47 = vcombine.low %v4242_v13, %v4245_v42  ;;  %v4437_v51 = vshll.u32 %v4404_v1, 16  ;;  %v4430_v56 = vrot.slane %v4428_v48, 4  ;;  %v4441_v49 = vshrl.u32 %v4404_v1, 16  ;;  %v4408_v20 = vld [vmem:[#allocation4 + $0x20] sm:$0x1]  ;;  %4887 = vst.msk [vmem:[#allocation5 + $0x90] sm:$0xff] %vm861_vm1, %v7179_v63 }
 0x2ce   : > { %4308 = vst.msk [vmem:[#allocation5 + $0x58] sm:$0xff] %vm861_vm1, %v6439_v57  ;;  %v4447_v58 = vshll.u32 %v4405_v50, 16  ;;  %v4252_v19 = vsel %vm7680_vm14, %v4250_v8, %v4251_v7  ;;  %v4433_v4 = vrot.slane %v4431_v34, 5  ;;  %v6434_v16 = vrot.slane %v4185_v61, 9  ;;  %v4188_v22 = vld [vmem:[#allocation4 + $0x48] sm:$0xe] }
 0x2cf   : > { %4309 = vst.msk [vmem:[#allocation5 + $0x80] sm:$0xff] %vm861_vm1, %v6440_v47  ;;  %v4439_v52 = vrot.slane %v4437_v51, 5  ;;  %v6441_v62 = vcombine.low %v4249_v12, %v4252_v19  ;;  %v4443_v59 = vrot.slane %v4441_v49, 4  ;;  %v4255_v17 = vrot.slane %v4186_v10, 5  ;;  %v7182_v42 = vld [vmem:[#allocation4 + $0x48] sm:$0xff]   ;;  %3897 = vst.msk [vmem:[#allocation5 + $0x118] sm:$0xff] %vm861_vm1, %v7181_v23 }
 0x2d0   : > { %v4449_v6 = vrot.slane %v4447_v58, 5  ;;  %v4434_v3 = vor.u32 %v4433_v4, %v4430_v56  ;;  %v4258_v31 = vrot.slane %v4187_v15, 5  ;;  %v4452_v24 = vshrl.u32 %v4406_v60, 16  ;;  %v4189_v45 = vld [vmem:[#allocation4 + $0x4c] sm:$0xf]  ;;  %v7183_v7 = vld [vmem:[#allocation4 + $0x54] sm:$0xff]  }
 0x2d1   : > { %4310 = vst.msk [vmem:[#allocation5 + $0xa8] sm:$0xff] %vm861_vm1, %v6441_v62  ;;  %v4444_v0 = vor.u32 %v4443_v59, %v4439_v52  ;;  %v4256_v5 = vsel %vm7680_vm14, %v6434_v16, %v4255_v17  ;;  %v4257_v14 = vrot.slane %v4255_v17, 4  ;;  %v4455_v33 = vshll.u32 %v4406_v60, 16  ;;  %v4190_v44 = vld [vmem:[#allocation4 + $0x50] sm:$0x1]  ;;  %4888 = vst.msk [vmem:[#allocation5 + $0xb8] sm:$0xff] %vm861_vm1, %v7182_v42 }
 0x2d2   : > { %v4435_v54 = vrot.slane %v4434_v3, 4  ;;  %v4461_v53 = vshll.u32 %v4407_v11, 16  ;;  %v4465_v35 = vshrl.u32 %v4407_v11, 16  ;;  %v4454_v37 = vrot.slane %v4452_v24, 4  ;;  %v4409_v48 = vld [vmem:[#allocation4 + $0x24] sm:$0xf] }
 0x2d3   : > { %v4445_v9 = vrot.slane %v4444_v0, 4  ;;  %v4259_v28 = vsel %vm7680_vm14, %v4257_v14, %v4258_v31  ;;  %v4471_v57 = vshll.u32 %v4408_v20, 16  ;;  %v4457_v46 = vrot.slane %v4455_v33, 5  ;;  %v4410_v12 = vld [vmem:[#allocation4 + $0x28] sm:$0xf]  ;;  %4889 = vst.msk [vmem:[#allocation5 + $0xe0] sm:$0xff] %vm861_vm1, %v7183_v7 }
 0x2d4   : > { %v4440_v18 = vsel %vm7636_vm11, %v4435_v54, %v4439_v52  ;;  %v6442_v41 = vcombine.low %v4256_v5, %v4259_v28  ;;  %v4463_v13 = vrot.slane %v4461_v53, 5  ;;  %v4467_v32 = vrot.slane %v4465_v35, 4  ;;  %v4411_v51 = vld [vmem:[#allocation4 + $0x2c] sm:$0x1]  ;;  %v4191_v16 = vld [vmem:[#allocation4 + $0x54] sm:$0xe] }
 0x2d5   : > { %v4450_v30 = vsel %vm7636_vm11, %v4445_v9, %v4449_v6  ;;  %v4473_v2 = vrot.slane %v4471_v57, 5  ;;  %v4458_v39 = vor.u32 %v4457_v46, %v4454_v37  ;;  %v6435_v47 = vrot.slane %v4188_v22, 9  ;;  %v4192_v17 = vld [vmem:[#allocation4 + $0x58] sm:$0xf]  ;;  %v7185_v25 = vld [vmem:[#allocation4 + $0x60] sm:$0xff]   ;;  %v7186_v28 = vld [vmem:[#allocation4 + $0x6c] sm:$0xff]  }
 0x2d6   : > { %v6453_v21 = vcombine.low %v4440_v18, %v4450_v30  ;;  %4311 = vst.msk [vmem:[#allocation5 + $0xd0] sm:$0xff] %vm861_vm1, %v6442_v41  ;;  %v4468_v43 = vor.u32 %v4467_v32, %v4463_v13  ;;  %v4262_v1 = vrot.slane %v4189_v45, 5  ;;  %v4265_v50 = vrot.slane %v4190_v44, 5  ;;  %v4193_v60 = vld [vmem:[#allocation4 + $0x5c] sm:$0x1]  ;;  %4890 = vst.msk [vmem:[#allocation5 + $0x108] sm:$0xff] %vm861_vm1, %v7185_v25 }
 0x2d7   : > { %v4459_v8 = vrot.slane %v4458_v39, 4  ;;  %v4476_v56 = vshrl.u32 %v4409_v48, 16  ;;  %v4479_v49 = vshll.u32 %v4409_v48, 16  ;;  %v4485_v19 = vshll.u32 %v4410_v12, 16  ;;  %v4413_v20 = vld [vmem:[#allocation4 + $0x34] sm:$0xf] }
 0x2d8   : > { %4651 = vst.msk [vmem:[#allocation5 + $0x10] sm:$0xff] %vm861_vm1, %v6453_v21  ;;  %v4469_v34 = vrot.slane %v4468_v43, 4  ;;  %v4263_v58 = vsel %vm7680_vm14, %v6435_v47, %v4262_v1  ;;  %v4264_v36 = vrot.slane %v4262_v1, 4  ;;  %v4489_v4 = vshrl.u32 %v4410_v12, 16  ;;  %v4414_v53 = vld [vmem:[#allocation4 + $0x38] sm:$0x1] }
 0x2d9   : > { %v4464_v62 = vsel %vm7636_vm11, %v4459_v8, %v4463_v13  ;;  %v4478_v6 = vrot.slane %v4476_v56, 4  ;;  %v4481_v3 = vrot.slane %v4479_v49, 5  ;;  %v4487_v61 = vrot.slane %v4485_v19, 5  ;;  %4891 = vst.msk [vmem:[#allocation5 + $0x130] sm:$0xff] %vm861_vm1, %v7186_v28  ;;  %v4415_v7 = vld [vmem:[#allocation4 + $0x3c] sm:$0xf] }
 0x2da   : > { %v4474_v59 = vsel %vm7636_vm11, %v4469_v34, %v4473_v2  ;;  %v4266_v54 = vsel %vm7680_vm14, %v4264_v36, %v4265_v50  ;;  %v4491_v10 = vrot.slane %v4489_v4, 4  ;;  %v4495_v15 = vshll.u32 %v4411_v51, 16  ;;  %v4416_v50 = vld [vmem:[#allocation4 + $0x40] sm:$0xf]  ;;  %v4417_v48 = vld [vmem:[#allocation4 + $0x44] sm:$0x1] }
 0x2db   : > { %v6454_v0 = vcombine.low %v4464_v62, %v4474_v59  ;;  %v6443_v27 = vcombine.low %v4263_v58, %v4266_v54  ;;  %v4482_v9 = vor.u32 %v4481_v3, %v4478_v6  ;;  %v6436_v11 = vrot.slane %v4191_v16, 9  ;;  %v7175_v19 = vld [vmem:[%s9009_s4 + $0x108] sm:$0xff]  }
 0x2dc   : > { %v4492_v31 = vor.u32 %v4491_v10, %v4487_v61  ;;  %v4269_v63 = vrot.slane %v4192_v17, 5  ;;  %v4497_v5 = vrot.slane %v4495_v15, 5  ;;  %v4272_v14 = vrot.slane %v4193_v60, 5  ;;  %v4420_v15 = vld [vmem:[#allocation4 + $0x50] sm:$0x1] }
 0x2dd   : > { %4652 = vst.msk [vmem:[#allocation5 + $0x38] sm:$0xff] %vm861_vm1, %v6454_v0  ;;  %4312 = vst.msk [vmem:[#allocation5 + $0xf8] sm:$0xff] %vm861_vm1, %v6443_v27  ;;  %v4483_v30 = vrot.slane %v4482_v9, 4  ;;  %v4509_v41 = vshll.u32 %v4413_v20, 16  ;;  %v4513_v46 = vshrl.u32 %v4413_v20, 16  ;;  %v4519_v22 = vshll.u32 %v4414_v53, 16 }
 0x2de   : > { %v4270_v21 = vsel %vm7680_vm14, %v6436_v11, %v4269_v63  ;;  %v4271_v33 = vrot.slane %v4269_v63, 4  ;;  %v4524_v12 = vshrl.u32 %v4415_v7, 16  ;;  %v4527_v8 = vshll.u32 %v4415_v7, 16  ;;  %v4418_v27 = vld [vmem:[#allocation4 + $0x48] sm:$0xf] }
 0x2df   : > { %v4488_v37 = vsel %vm7636_vm11, %v4483_v30, %v4487_v61  ;;  %v4511_v43 = vrot.slane %v4509_v41, 5  ;;  %v4515_v45 = vrot.slane %v4513_v46, 4  ;;  %v4521_v47 = vrot.slane %v4519_v22, 5  ;;  %v4419_v9 = vld [vmem:[#allocation4 + $0x4c] sm:$0xf] }
 0x2e0   : > { %v4273_v23 = vsel %vm7680_vm14, %v4271_v33, %v4272_v14  ;;  %v4533_v49 = vshll.u32 %v4416_v50, 16  ;;  %v4537_v58 = vshrl.u32 %v4416_v50, 16  ;;  %v4543_v36 = vshll.u32 %v4417_v48, 16  ;;  %v4421_v41 = vld [vmem:[#allocation4 + $0x54] sm:$0xf] }
 0x2e1   : > { %v6444_v39 = vcombine.low %v4270_v21, %v4273_v23  ;;  %v4516_v1 = vor.u32 %v4515_v45, %v4511_v43  ;;  %v4529_v62 = vrot.slane %v4527_v8, 5  ;;  %v4551_v60 = vshll.u32 %v4418_v27, 16  ;;  %v4422_v23 = vld [vmem:[#allocation4 + $0x58] sm:$0xf] }
 0x2e2   : > { %v4535_v3 = vrot.slane %v4533_v49, 5  ;;  %v4539_v0 = vrot.slane %v4537_v58, 4  ;;  %v4545_v54 = vrot.slane %v4543_v36, 5  ;;  %v4557_v63 = vshll.u32 %v4419_v9, 16  ;;  %v4425_v36 = vld [vmem:[#allocation4 + $0x64] sm:$0xf] }
 0x2e3   : > { %v4374_v29 = vpop.permute.xlu1 %4373  ;;  %v4372_v38 = vpop.permute.xlu0 %4371  ;;  %4313 = vst.msk [vmem:[#allocation5 + $0x120] sm:$0xff] %vm861_vm1, %v6444_v39  ;;  %v4517_v4 = vrot.slane %v4516_v1, 4  ;;  %v4567_v30 = vshll.u32 %v4420_v15, 16  ;;  %v4572_v22 = vshrl.u32 %v4421_v41, 16  ;;  %v4581_v45 = vshll.u32 %v4422_v23, 16 }
 0x2e4   : > { %4396 = vst.msk [vmem:[#allocation5 + $0x30] sm:$0xff] %vm1205_vm15, %v4374_v29  ;;  %4395 = vst.msk [vmem:[#allocation5 + $0x8] sm:$0xff] %vm1205_vm15, %v4372_v38  ;;  %v4412_v29 = vld [vmem:[#allocation4 + $0x30] sm:$0xf]  ;;  %v4493_v38 = vrot.slane %v4492_v31, 4  ;;  %v4548_v31 = vshrl.u32 %v4418_v27, 16 }
 0x2e5   : > { %v4500_v24 = vshrl.u32 %v4412_v29, 16  ;;  %v4503_v35 = vshll.u32 %v4412_v29, 16  ;;  %v4522_v61 = vsel %vm7636_vm11, %v4517_v4, %v4521_v47  ;;  %v4561_v29 = vshrl.u32 %v4419_v9, 16  ;;  %v5165_v15 = vld [vmem:[#allocation4 + $0x1c] sm:$0xf] }
 0x2e6   : > { %v4498_v32 = vsel %vm7636_vm11, %v4493_v38, %v4497_v5  ;;  %v4550_v20 = vrot.slane %v4548_v31, 4  ;;  %v7180_v38 = vld [vmem:[%s9009_s4 + $0x110] sm:$0xff]   ;;  %v4559_v33 = vrot.slane %v4557_v63, 5  ;;  %v4574_v50 = vrot.slane %v4572_v22, 4  ;;  %v5166_v31 = vld [vmem:[#allocation4 + $0x20] sm:$0x1] }
 0x2e7   : > { %v4502_v57 = vrot.slane %v4500_v24, 4  ;;  %v4505_v2 = vrot.slane %v4503_v35, 5  ;;  %v6455_v42 = vcombine.low %v4488_v37, %v4498_v32  ;;  %v4553_v24 = vrot.slane %v4551_v60, 5  ;;  %v7184_v32 = vld [vmem:[%s9009_s4 + $0x118] sm:$0xff]  }
 0x2e8   : > { %v4563_v53 = vrot.slane %v4561_v29, 4  ;;  %v4583_v8 = vrot.slane %v4581_v45, 5 }
 0x2e9   : > { %v4506_v44 = vor.u32 %v4505_v2, %v4502_v57  ;;  %4653 = vst.msk [vmem:[#allocation5 + $0x60] sm:$0xff] %vm861_vm1, %v6455_v42  ;;  %v4554_v37 = vor.u32 %v4553_v24, %v4550_v20  ;;  %v4569_v57 = vrot.slane %v4567_v30, 5  ;;  %v4423_v2 = vld [vmem:[#allocation4 + $0x5c] sm:$0x1]  ;;  %v4575_v42 = vshll.u32 %v4421_v41, 16 }
 0x2ea   : > { %v4591_v47 = vshll.u32 %v4423_v2, 16  ;;  %v5167_v30 = vld [vmem:[#allocation4 + $0x24] sm:$0xe] }
 0x2eb   : > { %v5309_v52 = vld [vmem:[#allocation5 + $0x8] sm:$0xff]  ;;  %v4507_v56 = vrot.slane %v4506_v44, 4  ;;  %v5314_v59 = vld [vmem:[#allocation5 + $0x30] sm:$0xff]  ;;  %v4585_v44 = vshrl.u32 %v4422_v23, 16  ;;  %v4577_v48 = vrot.slane %v4575_v42, 5 }
 0x2ec   : > { %5692 = vmatprep.mubr.bf16.mxu1 %v5309_v52  ;;  %v4526_v52 = vrot.slane %v4524_v12, 4  ;;  %v5171_v42 = vld [vmem:[#allocation4 + $0x34] sm:$0xf] }
 0x2ed   : > { %v4512_v6 = vsel %vm7636_vm11, %v4507_v56, %v4511_v43  ;;  %v4555_v43 = vrot.slane %v4554_v37, 4  ;;  %v4424_v56 = vld [vmem:[#allocation4 + $0x60] sm:$0xf]  ;;  %v4578_v58 = vor.u32 %v4577_v48, %v4574_v50 }
 0x2ee   : > { %v4530_v10 = vor.u32 %v4529_v62, %v4526_v52  ;;  %v6456_v25 = vcombine.low %v4512_v6, %v4522_v61  ;;  %v4596_v4 = vshrl.u32 %v4424_v56, 16  ;;  %v4599_v52 = vshll.u32 %v4424_v56, 16 }
 0x2ef   : > { %v4141_v18 = vpop.permute.xlu1 %4140  ;;  %v4560_v12 = vsel %vm7636_vm11, %v4555_v43, %v4559_v33  ;;  %v4579_v61 = vrot.slane %v4578_v58, 4 }
 0x2f0   : > { %4163 = vst.msk [vmem:[#allocation5 + $0x28] sm:$0xff] %vm1205_vm15, %v4141_v18  ;;  %v4540_v18 = vor.u32 %v4539_v0, %v4535_v3  ;;  %v4531_v11 = vrot.slane %v4530_v10, 4  ;;  %v4609_v0 = vshrl.u32 %v4425_v36, 16  ;;  %v4598_v10 = vrot.slane %v4596_v4, 4  ;;  %v5176_v4 = vld [vmem:[#allocation4 + $0x48] sm:$0xe] }
 0x2f1   : > { %4654 = vst.msk [vmem:[#allocation5 + $0x88] sm:$0xff] %vm861_vm1, %v6456_v25  ;;  %v4601_v27 = vrot.slane %v4599_v52, 5  ;;  %v4584_v60 = vsel %vm7636_vm11, %v4579_v61, %v4583_v8  ;;  %v6497_v61 = vrot.slane %v5176_v4, 9 }
 0x2f2   : > { %v4541_v14 = vrot.slane %v4540_v18, 4  ;;  %v4536_v21 = vsel %vm7636_vm11, %v4531_v11, %v4535_v3  ;;  %v4605_v3 = vshll.u32 %v4425_v36, 16  ;;  %v4611_v18 = vrot.slane %v4609_v0, 4  ;;  %v5175_v36 = vld [vmem:[#allocation4 + $0x44] sm:$0x1] }
 0x2f3   : > { %v4139_v13 = vpop.permute.xlu0 %4138  ;;  %v4602_v11 = vor.u32 %v4601_v27, %v4598_v10  ;;  %v5238_v0 = vrot.slane %v5175_v36, 5 }
 0x2f4   : > { %4162 = vst.msk [vmem:[#allocation5] sm:$0xff] %vm1205_vm15, %v4139_v13  ;;  %v4546_v28 = vsel %vm7636_vm11, %v4541_v14, %v4545_v54  ;;  %v4564_v13 = vor.u32 %v4563_v53, %v4559_v33  ;;  %v5164_v54 = vld [vmem:[#allocation4 + $0x18] sm:$0xe]  ;;  %v4607_v25 = vrot.slane %v4605_v3, 5  ;;  %v5214_v33 = vrot.slane %v5165_v15, 5 }
 0x2f5   : > { %v6457_v46 = vcombine.low %v4536_v21, %v4546_v28  ;;  %v6493_v29 = vrot.slane %v5164_v54, 9  ;;  %v5217_v53 = vrot.slane %v5166_v31, 5  ;;  %v4603_v37 = vrot.slane %v4602_v11, 4  ;;  %v5178_v54 = vld [vmem:[#allocation4 + $0x50] sm:$0x1] }
 0x2f6   : > { %v4565_v1 = vrot.slane %v4564_v13, 4  ;;  %v4612_v21 = vor.u32 %v4611_v18, %v4607_v25  ;;  %v5216_v2 = vrot.slane %v5214_v33, 4  ;;  %v5179_v18 = vld [vmem:[#allocation4 + $0x54] sm:$0xe] }
 0x2f7   : > { %v4143_v34 = vpop.permute.xlu1 %4142  ;;  %v4376_v51 = vpop.permute.xlu0 %4375  ;;  %4655 = vst.msk [vmem:[#allocation5 + $0xb0] sm:$0xff] %vm861_vm1, %v6457_v46  ;;  %v5170_v46 = vld [vmem:[#allocation4 + $0x30] sm:$0xe] }
 0x2f8   : > { %4164 = vst.msk [vmem:[#allocation5 + $0x50] sm:$0xff] %vm1205_vm15, %v4143_v34  ;;  %4397 = vst.msk [vmem:[#allocation5 + $0x58] sm:$0xff] %vm1205_vm15, %v4376_v51  ;;  %v4587_v34 = vrot.slane %v4585_v44, 4  ;;  %v4593_v51 = vrot.slane %v4591_v47, 5  ;;  %v4570_v49 = vsel %vm7636_vm11, %v4565_v1, %v4569_v57  ;;  %v6494_v57 = vrot.slane %v5167_v30, 9 }
 0x2f9   : > { %v4613_v23 = vrot.slane %v4612_v21, 4  ;;  %v5172_v44 = vld [vmem:[#allocation4 + $0x38] sm:$0x1]  ;;  %v6495_v47 = vrot.slane %v5170_v46, 9  ;;  %v5181_v30 = vld [vmem:[#allocation4 + $0x5c] sm:$0x1] }
 0x2fa   : > { %v4588_v6 = vor.u32 %v4587_v34, %v4583_v8  ;;  %v5228_v8 = vrot.slane %v5171_v42, 5  ;;  %v5231_v34 = vrot.slane %v5172_v44, 5  ;;  %v5182_v21 = vld [vmem:[#allocation4 + $0x60] sm:$0xe]  ;;  %v5187_v42 = vld [vmem:[#allocation4 + $0x74] sm:$0x1] }
 0x2fb   : > { %v5308_v16 = vld [vmem:[#allocation5] sm:$0xff]  ;;  %v4378_v17 = vpop.permute.xlu0 %4377 }
 0x2fc   : > { %5693 = vmatmul.mubr.bf16.vlgmr.msra.gmra.mrb[40].mxu1 %v5308_v16  ;;  %4398 = vst.msk [vmem:[#allocation5 + $0x80] sm:$0xff] %vm1205_vm15, %v4378_v17  ;;  %v4589_v17 = vrot.slane %v4588_v6, 4  ;;  %v5229_v55 = vsel %vm7680_vm14, %v6495_v47, %v5228_v8  ;;  %v5177_v6 = vld [vmem:[#allocation4 + $0x4c] sm:$0xf] }
 0x2fd   : > { %v4145_v5 = vpop.permute.xlu1 %4144  ;;  %6959 = vmatpush3.bf16.msra.mxu1 %v8617_v26  ;;  %5700 = vmatprep.mubr.bf16.mxu1 %v5314_v59  ;;  %v5313_v26 = vld [vmem:[#allocation5 + $0x28] sm:$0xff]  ;;  %v6458_v59 = vcombine.low %v4560_v12, %v4570_v49  ;;  %v5218_v12 = vsel %vm7680_vm14, %v5216_v2, %v5217_v53  ;;  %v5242_v10 = vrot.slane %v5177_v6, 5 }
 0x2fe   : > { %4165 = vst.msk [vmem:[#allocation5 + $0x78] sm:$0xff] %vm1205_vm15, %v4145_v5  ;;  %6960 = vmatprep.subr.bf16.mxu1 %v7175_v19  ;;  %v5168_v5 = vld [vmem:[#allocation4 + $0x28] sm:$0xf] }
 0x2ff   : > { %v4380_v35 = vpop.permute.xlu0 %4379  ;;  %v5319_v7 = vld [vmem:[#allocation5 + $0x58] sm:$0xff]  ;;  %4656 = vst.msk [vmem:[#allocation5 + $0xd8] sm:$0xff] %vm861_vm1, %v6458_v59  ;;  %v5318_v24 = vld [vmem:[#allocation5 + $0x50] sm:$0xff]  ;;  %v5221_v41 = vrot.slane %v5168_v5, 5  ;;  %v5243_v11 = vsel %vm7680_vm14, %v6497_v61, %v5242_v10  ;;  %v6498_v5 = vrot.slane %v5179_v18, 9 }
 0x300   : > { %4399 = vst.msk [vmem:[#allocation5 + $0xa8] sm:$0xff] %vm1205_vm15, %v4380_v35  ;;  %v5169_v35 = vld [vmem:[#allocation4 + $0x2c] sm:$0x1] }
 0x301   : > { %v5133_v39 = vpop.permute.xlu1 %5132  ;;  %6961 = vmatpush3.bf16.msra.mxu1 %v7175_v19  ;;  %v4426_v19 = vld [vmem:[#allocation4 + $0x68] sm:$0x1]  ;;  %v5224_v22 = vrot.slane %v5169_v35, 5  ;;  %v5222_v43 = vsel %vm7680_vm14, %v6494_v57, %v5221_v41  ;;  %v5223_v45 = vrot.slane %v5221_v41, 4  ;;  %v5183_v35 = vld [vmem:[#allocation4 + $0x64] sm:$0xf] }
 0x302   : > { %5156 = vst.msk [vmem:[#allocation5 + $0x18] sm:$0xff] %vm1205_vm15, %v5133_v39  ;;  %6962 = vmatprep.subr.bf16.mxu1 %v7180_v38  ;;  %v4615_v9 = vshll.u32 %v4426_v19, 16  ;;  %v4608_v39 = vsel %vm7636_vm11, %v4603_v37, %v4607_v25  ;;  %v5245_v25 = vrot.slane %v5178_v54, 5 }
 0x303   : > { %v5225_v58 = vsel %vm7680_vm14, %v5223_v45, %v5224_v22  ;;  %v5186_v22 = vld [vmem:[#allocation4 + $0x70] sm:$0xf] }
 0x304   : > { %5701 = vmatmul.mubr.bf16.gmra.mrb[44].mxu1 %v5313_v26  ;;  %v4617_v63 = vrot.slane %v4615_v9, 5  ;;  %v5324_v26 = vld [vmem:[#allocation5 + $0x80] sm:$0xff]  ;;  %v6502_v52 = vcombine.low %v5222_v43, %v5225_v58 }
 0x305   : > { %v4788_v62 = vpop.permute.xlu1 %4787  ;;  %5708 = vmatprep.mubr.bf16.mxu1 %v5319_v7  ;;  %6963 = vmatpush3.bf16.msra.mxu1 %v7180_v38  ;;  %v4594_v38 = vsel %vm7636_vm11, %v4589_v17, %v4593_v51  ;;  %v5173_v7 = vld [vmem:[#allocation4 + $0x3c] sm:$0xe]  ;;  %v5174_v51 = vld [vmem:[#allocation4 + $0x40] sm:$0xf]  ;;  %v5323_v3 = vld [vmem:[#allocation5 + $0x78] sm:$0xff] }
 0x306   : > { %4811 = vst.msk [vmem:[#allocation5 + $0x10] sm:$0xff] %vm1205_vm15, %v4788_v62  ;;  %6964 = vmatprep.subr.bf16.mxu1 %v7184_v32  ;;  %v6459_v28 = vcombine.low %v4584_v60, %v4594_v38  ;;  %v4618_v48 = vsel %vm7636_vm11, %v4613_v23, %v4617_v63  ;;  %v6496_v19 = vrot.slane %v5173_v7, 9  ;;  %v5230_v62 = vrot.slane %v5228_v8, 4  ;;  %v5185_v23 = vld [vmem:[#allocation4 + $0x6c] sm:$0xe] }
 0x307   : > { %v4147_v16 = vpop.permute.xlu0 %4146  ;;  %v6460_v56 = vcombine.low %v4608_v39, %v4618_v48  ;;  %v5235_v59 = vrot.slane %v5174_v51, 5  ;;  %v5329_v9 = vld [vmem:[#allocation5 + $0xa8] sm:$0xff]  ;;  %5301 = vst.msk [vmem:[#allocation5 + $0x48] sm:$0xff] %vm861_vm1, %v6502_v52  ;;  %v5244_v63 = vrot.slane %v5242_v10, 4  ;;  %v5252_v38 = vrot.slane %v5181_v30, 5 }
 0x308   : > { %4166 = vst.msk [vmem:[#allocation5 + $0xa0] sm:$0xff] %vm1205_vm15, %v4147_v16  ;;  %v5232_v15 = vsel %vm7680_vm14, %v5230_v62, %v5231_v34  ;;  %v6500_v39 = vrot.slane %v5185_v23, 9  ;;  %v5263_v7 = vrot.slane %v5186_v22, 5 }
 0x309   : > { %v5135_v14 = vpop.permute.xlu1 %5134  ;;  %v5311_v20 = vld [vmem:[#allocation5 + $0x18] sm:$0xff]  ;;  %6965 = vmatpush3.bf16.msra.mxu1 %v7184_v32  ;;  %v5215_v32 = vsel %vm7680_vm14, %v6493_v29, %v5214_v33  ;;  %4657 = vst.msk [vmem:[#allocation5 + $0x100] sm:$0xff] %vm861_vm1, %v6459_v28  ;;  %4658 = vst.msk [vmem:[#allocation5 + $0x128] sm:$0xff] %vm861_vm1, %v6460_v56  ;;  %v5236_v16 = vsel %vm7680_vm14, %v6496_v19, %v5235_v59  ;;  %v5237_v17 = vrot.slane %v5235_v59, 4  ;;  %v5180_v29 = vld [vmem:[#allocation4 + $0x58] sm:$0xf] }
 0x30a   : > { %5157 = vst.msk [vmem:[#allocation5 + $0x40] sm:$0xff] %vm1205_vm15, %v5135_v14  ;;  %5789 = vmatprep.mubr.bf16.mxu0 %v5311_v20  ;;  %v6501_v49 = vcombine.low %v5215_v32, %v5218_v12  ;;  %v6503_v60 = vcombine.low %v5229_v55, %v5232_v15  ;;  %v5246_v53 = vsel %vm7680_vm14, %v5244_v63, %v5245_v25  ;;  %v6499_v28 = vrot.slane %v5182_v21, 9 }
 0x30b   : > { %v4382_v13 = vpop.permute.xlu0 %4381  ;;  %v5239_v20 = vsel %vm7680_vm14, %v5237_v17, %v5238_v0  ;;  %v6505_v57 = vcombine.low %v5243_v11, %v5246_v53  ;;  %v5264_v8 = vsel %vm7680_vm14, %v6500_v39, %v5263_v7  ;;  %v5265_v34 = vrot.slane %v5263_v7, 4 }
 0x30c   : > { %4400 = vst.msk [vmem:[#allocation5 + $0xd0] sm:$0xff] %vm1205_vm15, %v4382_v13  ;;  %5709 = vmatmul.mubr.bf16.gmra.mrb[48].mxu1 %v5318_v24  ;;  %v5249_v24 = vrot.slane %v5180_v29, 5  ;;  %v6504_v33 = vcombine.low %v5236_v16, %v5239_v20  ;;  %v5256_v13 = vrot.slane %v5183_v35, 5 }
 0x30d   : > { %v4790_v1 = vpop.permute.xlu1 %4789  ;;  %v5310_v50 = vld [vmem:[#allocation5 + $0x10] sm:$0xff]  ;;  %5716 = vmatprep.mubr.bf16.mxu1 %v5324_v26  ;;  %5300 = vst.msk [vmem:[#allocation5 + $0x20] sm:$0xff] %vm861_vm1, %v6501_v49  ;;  %5302 = vst.msk [vmem:[#allocation5 + $0x70] sm:$0xff] %vm861_vm1, %v6503_v60 }
 0x30e   : > { %4812 = vst.msk [vmem:[#allocation5 + $0x38] sm:$0xff] %vm1205_vm15, %v4790_v1  ;;  %5790 = vmatmul.mubr.bf16.vlgmr.msra.gmra.mrb[60].mxu0 %v5310_v50  ;;  %v5184_v26 = vld [vmem:[#allocation4 + $0x68] sm:$0x1]  ;;  %v5250_v41 = vsel %vm7680_vm14, %v6498_v5, %v5249_v24  ;;  %v5251_v46 = vrot.slane %v5249_v24, 4  ;;  %v5257_v44 = vsel %vm7680_vm14, %v6499_v28, %v5256_v13  ;;  %v5258_v47 = vrot.slane %v5256_v13, 4  ;;  %v5317_v29 = vld [vmem:[#allocation5 + $0x48] sm:$0xff] }
 0x30f   : > { %5303 = vst.msk [vmem:[#allocation5 + $0x98] sm:$0xff] %vm861_vm1, %v6504_v33  ;;  %v5259_v2 = vrot.slane %v5184_v26, 5  ;;  %5304 = vst.msk [vmem:[#allocation5 + $0xc0] sm:$0xff] %vm861_vm1, %v6505_v57  ;;  %v5266_v50 = vrot.slane %v5187_v42, 5  ;;  %v5328_v48 = vld [vmem:[#allocation5 + $0xa0] sm:$0xff] }
 0x310   : > { %v5253_v45 = vsel %vm7680_vm14, %v5251_v46, %v5252_v38 }
 0x311   : > { %v5316_v27 = vld [vmem:[#allocation5 + $0x40] sm:$0xff]  ;;  %v6506_v1 = vcombine.low %v5250_v41, %v5253_v45  ;;  %v5260_v12 = vsel %vm7680_vm14, %v5258_v47, %v5259_v2  ;;  %v5267_v58 = vsel %vm7680_vm14, %v5265_v34, %v5266_v50 }
 0x312   : > { %v4149_v31 = vpop.permute.xlu0 %4148  ;;  %5797 = vmatprep.mubr.bf16.mxu0 %v5316_v27  ;;  %v6507_v56 = vcombine.low %v5257_v44, %v5260_v12  ;;  %v6508_v19 = vcombine.low %v5264_v8, %v5267_v58 }
 0x313   : > { %4167 = vst.msk [vmem:[#allocation5 + $0xc8] sm:$0xff] %vm1205_vm15, %v4149_v31  ;;  %v5137_v14 = vpop.permute.xlu1 %5136  ;;  %v5334_v51 = vld [vmem:[#allocation5 + $0xd0] sm:$0xff] }
 0x314   : > { %5158 = vst.msk [vmem:[#allocation5 + $0x68] sm:$0xff] %vm1205_vm15, %v5137_v14  ;;  %5717 = vmatmul.mubr.bf16.gmra.mrb[52].mxu1 %v5323_v3  ;;  %v5312_v18 = vld [vmem:[#allocation5 + $0x20] sm:$0xff]  ;;  %v5322_v5 = vld [vmem:[#allocation5 + $0x70] sm:$0xff] }
 0x315   : > { %v5315_v37 = vld [vmem:[#allocation5 + $0x38] sm:$0xff]  ;;  %5724 = vmatprep.mubr.bf16.mxu1 %v5329_v9  ;;  %5305 = vst.msk [vmem:[#allocation5 + $0xe8] sm:$0xff] %vm861_vm1, %v6506_v1  ;;  %5306 = vst.msk [vmem:[#allocation5 + $0x110] sm:$0xff] %vm861_vm1, %v6507_v56 }
 0x316   : > { %v4384_v32 = vpop.permute.xlu0 %4383  ;;  %5798 = vmatmul.mubr.bf16.gmra.mrb[64].mxu0 %v5315_v37  ;;  %5307 = vst.msk [vmem:[#allocation5 + $0x138] sm:$0xff] %vm861_vm1, %v6508_v19  ;;  %v5327_v38 = vld [vmem:[#allocation5 + $0x98] sm:$0xff]  ;;  %v5332_v21 = vld [vmem:[#allocation5 + $0xc0] sm:$0xff] }
 0x317   : > { %4401 = vst.msk [vmem:[#allocation5 + $0xf8] sm:$0xff] %vm1205_vm15, %v4384_v32  ;;  %v4792_v43 = vpop.permute.xlu1 %4791 }
 0x318   : > { %4813 = vst.msk [vmem:[#allocation5 + $0x60] sm:$0xff] %vm1205_vm15, %v4792_v43 }
 0x31a   : > { %v5333_v40 = vld [vmem:[#allocation5 + $0xc8] sm:$0xff] }
 0x31b   : > { %v5321_v49 = vld [vmem:[#allocation5 + $0x68] sm:$0xff] }
 0x31c   : > { %v4151_v36 = vpop.permute.xlu0 %4150  ;;  %5805 = vmatprep.mubr.bf16.mxu0 %v5321_v49  ;;  %5725 = vmatmul.mubr.bf16.gmra.mrb[56].mxu1 %v5328_v48  ;;  %v5337_v35 = vld [vmem:[#allocation5 + $0xe8] sm:$0xff]  ;;  %v5342_v26 = vld [vmem:[#allocation5 + $0x110] sm:$0xff] }
 0x31d   : > { %4168 = vst.msk [vmem:[#allocation5 + $0xf0] sm:$0xff] %vm1205_vm15, %v4151_v36  ;;  %5732 = vmatprep.mubr.bf16.mxu1 %v5334_v51  ;;  %v5347_v28 = vld [vmem:[#allocation5 + $0x138] sm:$0xff] }
 0x31e   : > { %v5139_v4 = vpop.permute.xlu1 %5138  ;;  %v5339_v59 = vld [vmem:[#allocation5 + $0xf8] sm:$0xff] }
 0x31f   : > { %5159 = vst.msk [vmem:[#allocation5 + $0x90] sm:$0xff] %vm1205_vm15, %v5139_v4  ;;  %v5320_v52 = vld [vmem:[#allocation5 + $0x60] sm:$0xff] }
 0x320   : > { %v4386_v55 = vpop.permute.xlu0 %4385  ;;  %5806 = vmatmul.mubr.bf16.gmra.mrb[68].mxu0 %v5320_v52 }
 0x321   : > { %4402 = vst.msk [vmem:[#allocation5 + $0x120] sm:$0xff] %vm1205_vm15, %v4386_v55 }
 0x322   : > { %v4794_v62 = vpop.permute.xlu1 %4793 }
 0x323   : > { %4814 = vst.msk [vmem:[#allocation5 + $0x88] sm:$0xff] %vm1205_vm15, %v4794_v62 }
 0x324   : > { %5733 = vmatmul.mubr.bf16.gmra.mrb[60].mxu1 %v5333_v40  ;;  %v5338_v54 = vld [vmem:[#allocation5 + $0xf0] sm:$0xff] }
 0x325   : > { %5740 = vmatprep.mubr.bf16.mxu1 %v5339_v59 }
 0x326   : > { %v4153_v6 = vpop.permute.xlu0 %4152  ;;  %v5326_v3 = vld [vmem:[#allocation5 + $0x90] sm:$0xff] }
 0x327   : > { %4169 = vst.msk [vmem:[#allocation5 + $0x118] sm:$0xff] %vm1205_vm15, %v4153_v6  ;;  %5813 = vmatprep.mubr.bf16.mxu0 %v5326_v3  ;;  %v4796_v0 = vpop.permute.xlu1 %4795 }
 0x328   : > { %4815 = vst.msk [vmem:[#allocation5 + $0xb0] sm:$0xff] %vm1205_vm15, %v4796_v0  ;;  %v5344_v27 = vld [vmem:[#allocation5 + $0x120] sm:$0xff] }
 0x32a   : > { %v5141_v61 = vpop.permute.xlu0 %5140  ;;  %v5325_v10 = vld [vmem:[#allocation5 + $0x88] sm:$0xff] }
 0x32b   : > { %5160 = vst.msk [vmem:[#allocation5 + $0xb8] sm:$0xff] %vm1205_vm15, %v5141_v61  ;;  %5814 = vmatmul.mubr.bf16.gmra.mrb[72].mxu0 %v5325_v10 }
 0x32c   : > { %5741 = vmatmul.mubr.bf16.gmra.mrb[64].mxu1 %v5338_v54 }
 0x32d   : > { %5748 = vmatprep.mubr.bf16.mxu1 %v5344_v27 }
 0x32e   : > { %v4798_v9 = vpop.permute.xlu1 %4797  ;;  %v5343_v17 = vld [vmem:[#allocation5 + $0x118] sm:$0xff] }
 0x32f   : > { %4816 = vst.msk [vmem:[#allocation5 + $0xd8] sm:$0xff] %vm1205_vm15, %v4798_v9  ;;  %v5330_v16 = vld [vmem:[#allocation5 + $0xb0] sm:$0xff] }
 0x330   : > { %v5143_v15 = vpop.permute.xlu0 %5142 }
 0x331   : > { %5161 = vst.msk [vmem:[#allocation5 + $0xe0] sm:$0xff] %vm1205_vm15, %v5143_v15 }
 0x332   : > { %v5331_v25 = vld [vmem:[#allocation5 + $0xb8] sm:$0xff] }
 0x333   : > { %5821 = vmatprep.mubr.bf16.mxu0 %v5331_v25 }
 0x334   : > { %5822 = vmatmul.mubr.bf16.gmra.mrb[76].mxu0 %v5330_v16  ;;  %v4800_v31 = vpop.permute.xlu1 %4799  ;;  %5749 = vmatmul.mubr.bf16.gmra.mrb[68].mxu1 %v5343_v17 }
 0x335   : > { %v5145_v60 = vpop.permute.xlu0 %5144  ;;  %4817 = vst.msk [vmem:[#allocation5 + $0x100] sm:$0xff] %vm1205_vm15, %v4800_v31  ;;  %6966 = vmatprep.mubr.msk.bf16.mxu1 %vm861_vm1, %v5312_v18 }
 0x336   : > { %5162 = vst.msk [vmem:[#allocation5 + $0x108] sm:$0xff] %vm1205_vm15, %v5145_v60  ;;  %v5335_v63 = vld [vmem:[#allocation5 + $0xd8] sm:$0xff] }
 0x338   : > { %v5336_v11 = vld [vmem:[#allocation5 + $0xe0] sm:$0xff] }
 0x339   : > { %5829 = vmatprep.mubr.bf16.mxu0 %v5336_v11 }
 0x33a   : > { %v4802_v30 = vpop.permute.xlu1 %4801 }
 0x33b   : > { %v5147_v14 = vpop.permute.xlu0 %5146  ;;  %4818 = vst.msk [vmem:[#allocation5 + $0x128] sm:$0xff] %vm1205_vm15, %v4802_v30 }
 0x33c   : > { %5830 = vmatmul.mubr.bf16.gmra.mrb[80].mxu0 %v5335_v63  ;;  %5163 = vst.msk [vmem:[#allocation5 + $0x130] sm:$0xff] %vm1205_vm15, %v5147_v14  ;;  %6967 = vmatmul.mubr.msk.bf16.vlgmr.msra.gmra.mrb[72].mxu1 %vm861_vm1, %v5317_v29  ;;  %v5340_v24 = vld [vmem:[#allocation5 + $0x100] sm:$0xff] }
 0x33d   : > { %v5341_v20 = vld [vmem:[#allocation5 + $0x108] sm:$0xff]  ;;  %6970 = vmatprep.mubr.msk.bf16.mxu1 %vm861_vm1, %v5322_v5 }
 0x33e   : > { %5837 = vmatprep.mubr.bf16.mxu0 %v5341_v20 }
 0x342   : > { %v5345_v53 = vld [vmem:[#allocation5 + $0x128] sm:$0xff] }
 0x343   : > { %v5346_v33 = vld [vmem:[#allocation5 + $0x130] sm:$0xff] }
 0x344   : > { %5838 = vmatmul.mubr.bf16.gmra.mrb[84].mxu0 %v5340_v24  ;;  %6971 = vmatmul.mubr.msk.bf16.gmra.mrb[76].mxu1 %vm861_vm1, %v5327_v38 }
 0x345   : > { %5845 = vmatprep.mubr.bf16.mxu0 %v5346_v33  ;;  %6974 = vmatprep.mubr.msk.bf16.mxu1 %vm861_vm1, %v5332_v21 }
 0x34c   : > { %5846 = vmatmul.mubr.bf16.gmra.mrb[88].mxu0 %v5345_v53  ;;  %6975 = vmatmul.mubr.msk.bf16.gmra.mrb[80].mxu1 %vm861_vm1, %v5337_v35 }
 0x34d   : > { %6978 = vmatprep.mubr.msk.bf16.mxu1 %vm861_vm1, %v5342_v26 }
 0x354   : > { %6979 = vmatmul.mubr.msk.bf16.gmra.mrb[84].mxu1 %vm861_vm1, %v5347_v28 }
 0x3cf   : > { %v6806_v37 = vpop.f32.mrb[40].mxu1 }
 0x3d0   : > { %v6807_v57 = vpop.f32.mrb[41].mxu1 }
 0x3d1   : > { %v6808_v41 = vadd.f32 %v6807_v57, %v6806_v37  ;;  %v6809_v46 = vpop.f32.mrb[42].mxu1 }
 0x3d2   : > { %v6810_v13 = vpop.f32.mrb[43].mxu1 }
 0x3d3   : > { %v6811_v23 = vadd.f32 %v6810_v13, %v6809_v46 }
 0x3d7   : > { %v6812_v32 = vpop.f32.mrb[44].mxu1 }
 0x3d8   : > { %v6813_v2 = vpop.f32.mrb[45].mxu1 }
 0x3d9   : > { %v6814_v22 = vadd.f32 %v6813_v2, %v6812_v32  ;;  %v6815_v42 = vpop.f32.mrb[46].mxu1 }
 0x3da   : > { %v6816_v39 = vpop.f32.mrb[47].mxu1 }
 0x3db   : > { %v6817_v43 = vadd.f32 %v6816_v39, %v6815_v42 }
 0x3df   : > { %v6818_v45 = vpop.f32.mrb[48].mxu1 }
 0x3e0   : > { %v6819_v44 = vpop.f32.mrb[49].mxu1 }
 0x3e1   : > { %v6870_v47 = vpop.f32.mrb[60].mxu0  ;;  %v6820_v7 = vadd.f32 %v6819_v44, %v6818_v45  ;;  %v6821_v1 = vpop.f32.mrb[50].mxu1 }
 0x3e2   : > { %v6871_v50 = vpop.f32.mrb[61].mxu0  ;;  %v6822_v48 = vpop.f32.mrb[51].mxu1 }
 0x3e3   : > { %v6872_v12 = vadd.f32 %v6871_v50, %v6870_v47  ;;  %v6873_v8 = vpop.f32.mrb[62].mxu0  ;;  %v6823_v34 = vadd.f32 %v6822_v48, %v6821_v1 }
 0x3e4   : > { %v6874_v51 = vpop.f32.mrb[63].mxu0 }
 0x3e5   : > { %v6875_v56 = vadd.f32 %v6874_v51, %v6873_v8  ;;  %v8853_v49 = vadd.f32 %v6872_v12, %v6808_v41 }
 0x3e7   : > { %v6824_v58 = vpop.f32.mrb[52].mxu1  ;;  %v8855_v36 = vadd.f32 %v6875_v56, %v6811_v23 }
 0x3e8   : > { %v6825_v19 = vpop.f32.mrb[53].mxu1 }
 0x3e9   : > { %v6876_v4 = vpop.f32.mrb[64].mxu0  ;;  %v6826_v52 = vadd.f32 %v6825_v19, %v6824_v58  ;;  %v6827_v55 = vpop.f32.mrb[54].mxu1 }
 0x3ea   : > { %v6877_v40 = vpop.f32.mrb[65].mxu0  ;;  %v6828_v62 = vpop.f32.mrb[55].mxu1 }
 0x3eb   : > { %v6878_v59 = vadd.f32 %v6877_v40, %v6876_v4  ;;  %v6879_v6 = vpop.f32.mrb[66].mxu0  ;;  %v6829_v3 = vadd.f32 %v6828_v62, %v6827_v55  ;;  %v6586_v4 = vld [vmem:[%s7480_s18] sm:$0xff]  }
 0x3ec   : > { %v6880_v0 = vpop.f32.mrb[67].mxu0  ;;  %v8877_v40 = vld [vmem:[%s9010_s5] ss:$0 sm:$0xff] }
 0x3ed   : > { %v6881_v54 = vadd.f32 %v6880_v0, %v6879_v6  ;;  %v5800_v61 = vadd.f32 %v6878_v59, %v6814_v22 }
 0x3ef   : > { %v6830_v10 = vpop.f32.mrb[56].mxu1  ;;  %v5803_v27 = vadd.f32 %v6881_v54, %v6817_v43 }
 0x3f0   : > { %v6831_v9 = vpop.f32.mrb[57].mxu1 }
 0x3f1   : > { %v6832_v15 = vadd.f32 %v6831_v9, %v6830_v10  ;;  %v6833_v16 = vpop.f32.mrb[58].mxu1  ;;  %v8883_v10 = vld [vmem:[%s9011_s6] ss:$0 sm:$0xff] }
 0x3f2   : > { %v6834_v17 = vpop.f32.mrb[59].mxu1 }
 0x3f3   : > { %v6882_v25 = vpop.f32.mrb[68].mxu0  ;;  %v6835_v18 = vadd.f32 %v6834_v17, %v6833_v16 }
 0x3f4   : > { %v6883_v31 = vpop.f32.mrb[69].mxu0 }
 0x3f5   : > { %v6884_v60 = vadd.f32 %v6883_v31, %v6882_v25  ;;  %v6885_v11 = vpop.f32.mrb[70].mxu0 }
 0x3f6   : > { %v6886_v63 = vpop.f32.mrb[71].mxu0 }
 0x3f7   : > { %v6887_v29 = vadd.f32 %v6886_v63, %v6885_v11  ;;  %v6836_v30 = vpop.f32.mrb[60].mxu1  ;;  %v8857_v5 = vadd.f32 %v6884_v60, %v6820_v7  ;;  %v6588_v60 = vunpack.c.h.bf16 %v6586_v4 }
 0x3f8   : > { %v6837_v14 = vpop.f32.mrb[61].mxu1 }
 0x3f9   : > { %v6838_v20 = vadd.f32 %v6837_v14, %v6836_v30  ;;  %v6839_v24 = vpop.f32.mrb[62].mxu1  ;;  %v8859_v38 = vadd.f32 %v6887_v29, %v6823_v34  ;;  %v6617_v29 = vld [vmem:[%s7480_s18 + $0x8] sm:$0xff]  }
 0x3fa   : > { %v6840_v21 = vpop.f32.mrb[63].mxu1 }
 0x3fb   : > { %v6841_v33 = vadd.f32 %v6840_v21, %v6839_v24 }
 0x3fe   : > { %v6888_v53 = vpop.f32.mrb[72].mxu0 }
 0x3ff   : > { %v6889_v35 = vpop.f32.mrb[73].mxu0  ;;  %v6842_v26 = vpop.f32.mrb[64].mxu1 }
 0x400   : > { %v6890_v28 = vadd.f32 %v6889_v35, %v6888_v53  ;;  %v6891_v37 = vpop.f32.mrb[74].mxu0  ;;  %v6843_v57 = vpop.f32.mrb[65].mxu1 }
 0x401   : > { %v6892_v41 = vpop.f32.mrb[75].mxu0  ;;  %v8861_v46 = vadd.f32 %v6843_v57, %v6842_v26  ;;  %v6845_v13 = vpop.f32.mrb[66].mxu1  ;;  %v6591_v26 = vunpack.c.l.bf16 %v6617_v29 }
 0x402   : > { %v6893_v23 = vadd.f32 %v6892_v41, %v6891_v37  ;;  %v6846_v32 = vpop.f32.mrb[67].mxu1  ;;  %v5816_v2 = vadd.f32 %v6890_v28, %v6826_v52 }
 0x403   : > { %v8863_v22 = vadd.f32 %v6846_v32, %v6845_v13 }
 0x404   : > { %v5819_v42 = vadd.f32 %v6893_v23, %v6829_v3 }
 0x407   : > { %v6894_v39 = vpop.f32.mrb[76].mxu0  ;;  %v6848_v43 = vpop.f32.mrb[68].mxu1 }
 0x408   : > { %v6895_v45 = vpop.f32.mrb[77].mxu0  ;;  %v6849_v44 = vpop.f32.mrb[69].mxu1 }
 0x409   : > { %v6896_v47 = vadd.f32 %v6895_v45, %v6894_v39  ;;  %v6897_v7 = vpop.f32.mrb[78].mxu0  ;;  %v8865_v1 = vadd.f32 %v6849_v44, %v6848_v43  ;;  %v6851_v50 = vpop.f32.mrb[70].mxu1 }
 0x40a   : > { %v6898_v48 = vpop.f32.mrb[79].mxu0  ;;  %v6852_v12 = vpop.f32.mrb[71].mxu1 }
 0x40b   : > { %v6899_v8 = vadd.f32 %v6898_v48, %v6897_v7  ;;  %v8867_v34 = vadd.f32 %v6852_v12, %v6851_v50  ;;  %v8869_v51 = vadd.f32 %v6896_v47, %v6832_v15  ;;  %v6587_v15 = vunpack.c.l.bf16 %v6586_v4  ;;  %v6618_v12 = vld [vmem:[%s7480_s18 + $0x10] sm:$0xff]  }
 0x40c   : > { %v6592_v47 = vunpack.c.h.bf16 %v6617_v29 }
 0x40d   : > { %v8871_v56 = vadd.f32 %v6899_v8, %v6835_v18 }
 0x40f   : > { %v6900_v58 = vpop.f32.mrb[80].mxu0  ;;  %v6968_v19 = vpop.f32.mrb[72].mxu1 }
 0x410   : > { %v6901_v52 = vpop.f32.mrb[81].mxu0  ;;  %v5897_v55 = vadd.f32 %v6968_v19, %v5800_v61  ;;  %v5888_v62 = vpop.f32.mrb[73].mxu1 }
 0x411   : > { %v6902_v59 = vadd.f32 %v6901_v52, %v6900_v58  ;;  %v6903_v6 = vpop.f32.mrb[82].mxu0  ;;  %v5889_v3 = vadd.f32 %v5888_v62, %v8853_v49  ;;  %v6969_v0 = vpop.f32.mrb[74].mxu1 }
 0x412   : > { %v6904_v54 = vpop.f32.mrb[83].mxu0  ;;  %v5900_v9 = vadd.f32 %v6969_v0, %v5803_v27  ;;  %v5891_v61 = vpop.f32.mrb[75].mxu1  ;;  %v5992_v31 = vmul.f32 %v8877_v40, %v5897_v55  ;;  %v6595_v55 = vunpack.c.l.bf16 %v6618_v12 }
 0x413   : > { %v6905_v16 = vadd.f32 %v6904_v54, %v6903_v6  ;;  %v5990_v17 = vmul.f32 %v8877_v40, %v5889_v3  ;;  %v5892_v25 = vadd.f32 %v5891_v61, %v8855_v36  ;;  %v5832_v18 = vadd.f32 %v6902_v59, %v6838_v20 }
 0x414   : > { %v6015_v21 = vadd.f32 %v8883_v10, %v5992_v31  ;;  %v5993_v36 = vmul.f32 %v8877_v40, %v5900_v9 }
 0x415   : > { %v5991_v49 = vmul.f32 %v8877_v40, %v5892_v25  ;;  %v6013_v11 = vadd.f32 %v8883_v10, %v5990_v17  ;;  %v5835_v63 = vadd.f32 %v6905_v16, %v6841_v33  ;;  %v6596_v25 = vunpack.c.h.bf16 %v6618_v12 }
 0x416   : > { %v6016_v44 = vadd.f32 %v8883_v10, %v5993_v36 }
 0x417   : > { %v6906_v30 = vpop.f32.mrb[84].mxu0  ;;  %v6014_v27 = vadd.f32 %v8883_v10, %v5991_v49  ;;  %v6972_v14 = vpop.f32.mrb[76].mxu1  ;;  %v6029_v24 = vadd.f32 %v6587_v15, %v6013_v11 }
 0x418   : > { %v6907_v53 = vpop.f32.mrb[85].mxu0  ;;  %v5913_v20 = vadd.f32 %v6972_v14, %v5816_v2  ;;  %v5904_v35 = vpop.f32.mrb[77].mxu1  ;;  %v6031_v2 = vadd.f32 %v6591_v26, %v6015_v21  ;;  %v6032_v52 = vadd.f32 %v6592_v47, %v6016_v44  ;;  %v6621_v47 = vld [vmem:[%s7480_s18 + $0x28] sm:$0xff]  }
 0x419   : > { %v6908_v28 = vadd.f32 %v6907_v53, %v6906_v30  ;;  %v6909_v37 = vpop.f32.mrb[86].mxu0  ;;  %v5905_v57 = vadd.f32 %v5904_v35, %v8857_v5  ;;  %v6973_v41 = vpop.f32.mrb[78].mxu1  ;;  %v6045_v33 = vmax.f32 %v6029_v24, 0.0  ;;  %v6030_v13 = vadd.f32 %v6588_v60, %v6014_v27 }
 0x41a   : > { %v6910_v23 = vpop.f32.mrb[87].mxu0  ;;  %v5916_v32 = vadd.f32 %v6973_v41, %v5819_v42  ;;  %v5907_v39 = vpop.f32.mrb[79].mxu1  ;;  %v5996_v17 = vmul.f32 %v8877_v40, %v5913_v20  ;;  %v6048_v31 = vmax.f32 %v6032_v52, 0.0 }
 0x41b   : > { %v6911_v43 = vadd.f32 %v6910_v23, %v6909_v37  ;;  %v5908_v45 = vadd.f32 %v5907_v39, %v8859_v38  ;;  %6061 = vxpose.xlu0.b32.start [1/16] (narrow) %v6045_v33, 64  ;;  %v5840_v7 = vadd.f32 %v6908_v28, %v8861_v46  ;;  %v5994_v50 = vmul.f32 %v8877_v40, %v5905_v57  ;;  %v6620_v57 = vld [vmem:[%s7480_s18 + $0x20] sm:$0xff]  }
 0x41c   : > { %v6046_v5 = vmax.f32 %v6030_v13, 0.0  ;;  %v6047_v38 = vmax.f32 %v6031_v2, 0.0  ;;  %v6603_v41 = vunpack.c.l.bf16 %v6620_v57  ;;  %v6604_v39 = vunpack.c.h.bf16 %v6620_v57 }
 0x41d   : > { %v5843_v48 = vadd.f32 %v6911_v43, %v8863_v22  ;;  %v6017_v59 = vadd.f32 %v8883_v10, %v5994_v50  ;;  %v5995_v46 = vmul.f32 %v8877_v40, %v5908_v45 }
 0x41f   : > { %v6912_v8 = vpop.f32.mrb[88].mxu0  ;;  %v6976_v58 = vpop.f32.mrb[80].mxu1  ;;  %6062 = vxpose.xlu0.b32.cont [2/16] (narrow) %v6046_v5, 64  ;;  %v6033_v60 = vadd.f32 %v6595_v55, %v6017_v59 }
 0x420   : > { %v6913_v42 = vpop.f32.mrb[89].mxu0  ;;  %v5929_v19 = vadd.f32 %v6976_v58, %v5832_v18  ;;  %v5920_v4 = vpop.f32.mrb[81].mxu1  ;;  %v6018_v18 = vadd.f32 %v8883_v10, %v5995_v46 }
 0x421   : > { %v6914_v62 = vadd.f32 %v6913_v42, %v6912_v8  ;;  %v6915_v6 = vpop.f32.mrb[90].mxu0  ;;  %v5921_v3 = vadd.f32 %v5920_v4, %v8869_v51  ;;  %v6977_v22 = vpop.f32.mrb[82].mxu1  ;;  %v6619_v51 = vld [vmem:[%s7480_s18 + $0x18] sm:$0xff]   ;;  %v6049_v24 = vmax.f32 %v6033_v60, 0.0  ;;  %v6608_v8 = vunpack.c.h.bf16 %v6621_v47 }
 0x422   : > { %v6916_v0 = vpop.f32.mrb[91].mxu0  ;;  %v5932_v54 = vadd.f32 %v6977_v22, %v5835_v63  ;;  %v5923_v9 = vpop.f32.mrb[83].mxu1  ;;  %v6019_v63 = vadd.f32 %v8883_v10, %v5996_v17  ;;  %v6034_v21 = vadd.f32 %v6596_v25, %v6018_v18  ;;  %v6000_v43 = vmul.f32 %v8877_v40, %v5929_v19 }
 0x423   : > { %v6917_v61 = vadd.f32 %v6916_v0, %v6915_v6  ;;  %v5924_v15 = vadd.f32 %v5923_v9, %v8871_v56  ;;  %6063 = vxpose.xlu0.b32.cont [3/16] (narrow) %v6047_v38, 64  ;;  %v5848_v16 = vadd.f32 %v6914_v62, %v8865_v1  ;;  %v6599_v56 = vunpack.c.l.bf16 %v6619_v51  ;;  %v6622_v38 = vld [vmem:[%s7480_s18 + $0x30] sm:$0xff]   ;;  %v6623_v9 = vld [vmem:[%s7480_s18 + $0x38] sm:$0xff]   ;;  %s6556_s18 = sshll.u32 %s7269_s28, 4  ;;  %s8953_s28 = scalar_lea.sflag [#allocation7], %s283_s20 }
 0x424   : > { %v5997_v1 = vmul.f32 %v8877_v40, %v5916_v32  ;;  %v5998_v26 = vmul.f32 %v8877_v40, %v5921_v3  ;;  %v6050_v28 = vmax.f32 %v6034_v21, 0.0  ;;  %v6023_v50 = vadd.f32 %v8883_v10, %v6000_v43  ;;  %s6113_s22 = sadd.s32 %s7265_s27, %s6556_s18  ;;  %s7187_s27 = scalar_lea.vmem %s8943_s13, 1024 }
 0x425   : > { %v5851_v49 = vadd.f32 %v6917_v61, %v8867_v34  ;;  %v6600_v34 = vunpack.c.h.bf16 %v6619_v51  ;;  %v6035_v37 = vadd.f32 %v6599_v56, %v6019_v63  ;;  %v5999_v13 = vmul.f32 %v8877_v40, %v5924_v15  ;;  %s6557_s16 = sshll.u32 %s6113_s22, 7  ;;  %p7188_p4 = scmp.ne.s32.totalorder %s8943_s13, %s7187_s27 }
 0x426   : > { %v6020_v35 = vadd.f32 %v8883_v10, %v5997_v1  ;;  %v6021_v33 = vadd.f32 %v8883_v10, %v5998_v26  ;;  %v6001_v5 = vmul.f32 %v8877_v40, %v5932_v54  ;;  %v6611_v52 = vunpack.c.l.bf16 %v6622_v38  ;;  %s8948_s9 = scalar_lea.hbm %s9012_s7, %s6557_s16  ;;  %s7191_s18 = sshll.u32 %s7288_s10, 4  ;;  %s7192_s18 = int_to_ptr.vmem [resolvable:$false] %s7191_s18 }
 0x427   : > { %v6980_v11 = vpop.f32.mrb[84].mxu1  ;;  %6064 = vxpose.xlu0.b32.cont [4/16] (narrow) %v6048_v31, 64  ;;  %v6051_v23 = vmax.f32 %v6035_v37, 0.0  ;;  %v6022_v45 = vadd.f32 %v8883_v10, %v5999_v13  ;;  %v6612_v46 = vunpack.c.h.bf16 %v6622_v38  ;;  %v6615_v61 = vunpack.c.l.bf16 %v6623_v9  ;;  %p7189_p5 = pnand %p7188_p4, %p7383_p3  ;;  %s7193_s22 = scalar_lea.vmem %s7192_s18, 2048 }
 0x428   : > { %v5945_v29 = vadd.f32 %v6980_v11, %v5848_v16  ;;  %v5936_v30 = vpop.f32.mrb[85].mxu1  ;;  %v6036_v32 = vadd.f32 %v6600_v34, %v6020_v35  ;;  %v6037_v2 = vadd.f32 %v6603_v41, %v6021_v33  ;;  %v6024_v58 = vadd.f32 %v8883_v10, %v6001_v5  ;;  %p7194_p7 = scmp.lt.s32.totalorder %s8943_s13, %s7192_s18  ;;  %p7195_p9 = scmp.lt.s32.totalorder %s7193_s22, %s7187_s27 }
 0x429   : > { %v5937_v27 = vadd.f32 %v5936_v30, %v5840_v7  ;;  %v6981_v14 = vpop.f32.mrb[86].mxu1  ;;  %v6607_v7 = vunpack.c.l.bf16 %v6621_v47  ;;  %v6038_v12 = vadd.f32 %v6604_v39, %v6022_v45  ;;  %v6616_v60 = vunpack.c.h.bf16 %v6623_v9  ;;  %p7190_p6 = pneg %p7189_p5 }
 0x42a   : > { %v5948_v53 = vadd.f32 %v6981_v14, %v5851_v49  ;;  %v5939_v36 = vpop.f32.mrb[87].mxu1  ;;  %v6052_v44 = vmax.f32 %v6036_v32, 0.0  ;;  %v6040_v6 = vadd.f32 %v6608_v8, %v6024_v58  ;;  %v6004_v3 = vmul.f32 %v8877_v40, %v5945_v29  ;;  %p7196_p10 = por %p7195_p9, %p7194_p7 }
 0x42b   : > { %v5940_v20 = vadd.f32 %v5939_v36, %v5843_v48  ;;  %6065 = vxpose.xlu0.b32.cont [5/16] (narrow) %v6049_v24, 64  ;;  %v6053_v48 = vmax.f32 %v6037_v2, 0.0  ;;  %v6002_v42 = vmul.f32 %v8877_v40, %v5937_v27  ;;  %v6054_v19 = vmax.f32 %v6038_v12, 0.0 }
 0x42c   : > { %v6039_v4 = vadd.f32 %v6607_v7, %v6023_v50  ;;  %v6056_v0 = vmax.f32 %v6040_v6, 0.0  ;;  %v6027_v15 = vadd.f32 %v8883_v10, %v6004_v3  ;;  %v6005_v16 = vmul.f32 %v8877_v40, %v5948_v53  ;;  %p7197_p11 = pnand %p7196_p10, %p7190_p6 }
 0x42d   : > { %v6025_v55 = vadd.f32 %v8883_v10, %v6002_v42  ;;  %v6003_v62 = vmul.f32 %v8877_v40, %v5940_v20 }
 0x42e   : > { %v6055_v59 = vmax.f32 %v6039_v4, 0.0  ;;  %v6028_v18 = vadd.f32 %v8883_v10, %v6005_v16  ;;  %v6043_v49 = vadd.f32 %v6615_v61, %v6027_v15 }
 0x42f   : > { %6066 = vxpose.xlu0.b32.cont [6/16] (narrow) %v6050_v28, 64  ;;  %v6026_v22 = vadd.f32 %v8883_v10, %v6003_v62  ;;  %v6041_v54 = vadd.f32 %v6611_v52, %v6025_v55 }
 0x430   : > { %v6059_v51 = vmax.f32 %v6043_v49, 0.0  ;;  %v6044_v11 = vadd.f32 %v6616_v60, %v6028_v18 }
 0x431   : > { %v6057_v17 = vmax.f32 %v6041_v54, 0.0  ;;  %v6042_v25 = vadd.f32 %v6612_v46, %v6026_v22 }
 0x432   : > { %v6060_v40 = vmax.f32 %v6044_v11, 0.0 }
 0x433   : > { %6067 = vxpose.xlu0.b32.cont [7/16] (narrow) %v6051_v23, 64  ;;  %v6058_v31 = vmax.f32 %v6042_v25, 0.0 }
 0x437   : > { %6068 = vxpose.xlu0.b32.cont [8/16] (narrow) %v6052_v44, 64 }
 0x43b   : > { %6069 = vxpose.xlu0.b32.cont [9/16] (narrow) %v6053_v48, 64 }
 0x43f   : > { %6070 = vxpose.xlu0.b32.cont [10/16] (narrow) %v6054_v19, 64 }
 0x443   : > { %6071 = vxpose.xlu0.b32.cont [11/16] (narrow) %v6055_v59, 64 }
 0x447   : > { %6072 = vxpose.xlu0.b32.cont [12/16] (narrow) %v6056_v0, 64 }
 0x44b   : > { %6073 = vxpose.xlu0.b32.cont [13/16] (narrow) %v6057_v17, 64 }
 0x44f   : > { %6074 = vxpose.xlu0.b32.cont [14/16] (narrow) %v6058_v31, 64 }
 0x453   : > { %6075 = vxpose.xlu0.b32.cont [15/16] (narrow) %v6059_v51, 64 }
 0x457   : > { %6076 = vxpose.xlu0.b32.end [16/16] (narrow) %v6060_v40, 64 }
 0x49b   : > { %v6077_v63 = vpop.trf.xlu0 }
 0x49c   : > { %6093 = vst [vmem:[%s7567_s23] sm:$0xff] %v6077_v63 }
 0x49f   : > { %v6078_v29 = vpop.trf.xlu0 }
 0x4a0   : > { %6094 = vst [vmem:[%s7567_s23 + $0x8] sm:$0xff] %v6078_v29 }
 0x4a3   : > { %v6079_v10 = vpop.trf.xlu0 }
 0x4a4   : > { %6095 = vst [vmem:[%s7567_s23 + $0x10] sm:$0xff] %v6079_v10 }
 0x4a7   : > { %v6080_v30 = vpop.trf.xlu0 }
 0x4a8   : > { %6096 = vst [vmem:[%s7567_s23 + $0x18] sm:$0xff] %v6080_v30 }
 0x4ab   : > { %v6081_v56 = vpop.trf.xlu0 }
 0x4ac   : > { %6097 = vst [vmem:[%s7567_s23 + $0x20] sm:$0xff] %v6081_v56 }
 0x4af   : > { %v6082_v1 = vpop.trf.xlu0 }
 0x4b0   : > { %6098 = vst [vmem:[%s7567_s23 + $0x28] sm:$0xff] %v6082_v1 }
 0x4b3   : > { %v6083_v27 = vpop.trf.xlu0 }
 0x4b4   : > { %6099 = vst [vmem:[%s7567_s23 + $0x30] sm:$0xff] %v6083_v27 }
 0x4b7   : > { %v6084_v14 = vpop.trf.xlu0 }
 0x4b8   : > { %6100 = vst [vmem:[%s7567_s23 + $0x38] sm:$0xff] %v6084_v14 }
 0x4b9   : > { %7200 = shalt.err (!%p7197_p11)
}
 0x4ba   : > { %s7201_s20 = scalar_lea.hbm %s8948_s9, 1024  ;;  %s7205_s17 = scalar_lea.hbm %s9012_s7, 4096 }
 0x4bb   : > { %p7202_p12 = scmp.ne.s32.totalorder %s8948_s9, %s7201_s20  ;;  %p7206_p1 = scmp.lt.u32.totalorder %s8948_s9, %s9012_s7 }
 0x4bc   : > { %p7207_p2 = scmp.lt.u32.totalorder %s7205_s17, %s7201_s20  ;;  %p7209_p5 = scmp.lt.u32.totalorder %s7201_s20, %s8948_s9 }
 0x4bd   : > { %p7203_p13 = pnand %p7202_p12, %p7383_p3 }
 0x4be   : > { %p7208_p4 = por %p7207_p2, %p7206_p1 }
 0x4bf   : > { %p7204_p0 = pneg %p7203_p13 }
 0x4c0   : > { %p7210_p6 = por %p7209_p5, %p7208_p4 }
 0x4c2   : > { %p7211_p7 = pnand %p7210_p6, %p7204_p0 }
 0x4c4   : > { %7214 = shalt.err (!%p7211_p7)
}
 0x4c5   : > { %s7289_s27 = smov 128   ;;  %s7290_s18 = smov 256  }
 0x4c6   : > { %s7291_s22 = smov 8  }
 0x4c7   : > { %6982 = dma.vmem_to_hbm [thread:$0]  (%p7383_p3), %s8943_s13, 1024, %s8948_s9, %s8953_s28, %s7289_s27, %s7290_s18, %s7291_s22  }
 0x4c8 PF: > { %p6988_p9 = scmp.ge.s32.totalorder %s7281_s8, 2  ;;  %s6131_s23 = sand.u32 1, %s7253_s24  }
 0x4c9   : > { %s6132_s20 = scalar_lea.sflag [#allocation7], %s6131_s23 }
 0x4ca   : > { %p6985_p10 = pnand %p6988_p9, %p7392_p8 }
 0x4cc   : > { %7248 = dma.done.wait (!%p6985_p10), %s6132_s20, 1024  }
 0x4cd   : > { %7250 = vsyncadd (!%p6985_p10), %s6132_s20, 4294966272  ;;  %s20_s8 = sadd.s32 1, %s7281_s8   ;;  %s9027_s24 = smov %s7257_s25 }
 0x4ce   : > { %p17_p11 = scmp.ge.s32.totalorder %s20_s8, 6   ;;  %s9028_s25 = smov %s7261_s26 }
 0x4cf   : > { %s9029_s26 = smov %s7401_s19  ;;  %s9030_s27 = smov %s7273_s29 }
 0x4d0   : > { %s9031_s28 = smov %s7277_s30  ;;  %s9032_s29 = smov %s9035_s11 }
 0x4d1   : > { %s9033_s30 = smov %s9039_s12  ;;  %19 = sbr.rel (!%p17_p11) target bundleno = 5 (0x5), region = 117 }
 0x4d8   :  { %6137 = vsyncpa [#allocation7], 1 }
 0x4d9   :  { %6139 = vsyncpa [#allocation7 + $0x1], 1 }

</bundles_post_ra>
